<compile_context>
chip_gen: v5e
topology: v5e:2x2
jax: 0.10.0
libtpu: 0.0.40
codegen_flags: <defaults>
</compile_context>

<pallas_src>
import jax
import jax.numpy as jnp
from jax import lax
from jax.experimental import pallas as pl
from jax.experimental.pallas import tpu as pltpu


# ------------------------------------------------------------------------------ kernel
def _proj_kernel(x_ref, w_ref, out_ref):
    """One batched contraction over the block: out[n,p,t] = sum_c W[p,c] x[n,c,t]."""
    out_ref[...] = jnp.einsum(
        "pc,nct->npt",
        w_ref[...],                      # (P, C)  -- constant block, stays VMEM-resident
        x_ref[...],                      # (bn, C, T)
        preferred_element_type=jnp.float32,
        precision=lax.Precision.HIGHEST,  # f32 parity with the PyTorch Linear
    ).astype(out_ref.dtype)


# ----------------------------------------------------------------------------- wrapper
def channel_projection_forward(x, w, *, compute_dtype=None, block_bytes_target=1 << 20):
    """ChannelProjection.forward for 3-D (B, C, T) or 4-D (B, S, C, T) inputs.

    w: nn.Linear weight (n_projected_channels, n_channels), no bias.
    compute_dtype: optionally cast x/w (e.g. jnp.bfloat16) BEFORE the kernel to halve
                   HBM traffic on this bandwidth-bound op; accumulation stays f32.
    """
    P, C = w.shape
    ndim = x.ndim
    if ndim == 4:
        B, S, c_in, T = x.shape
        N, lead = B * S, (B, S)
    elif ndim == 3:
        B, c_in, T = x.shape
        N, lead = B, (B,)
    else:
        raise ValueError(f"Unsupported input tensor shape: {x.shape}")
    if c_in != C:
        raise ValueError(f"channel mismatch: got {c_in}, expected {C}")

    out_dtype = x.dtype
    if compute_dtype is not None:
        x = x.astype(compute_dtype)
        w = w.astype(compute_dtype)

    xf = x.reshape(N, C, T)                       # merge leading dims (free reshape)
    itemsize = xf.dtype.itemsize
    w_bytes = P * C * w.dtype.itemsize

    # --- VMEM-budgeted block size: x block ~ block_bytes_target (~1 MiB). ---
    sample_bytes = C * T * itemsize
    bn = max(1, min(N, block_bytes_target // max(1, sample_bytes)))
    # Once the problem is large enough to care, keep >= 8 grid steps so the
    # software pipeline has a real steady state (DMA/compute overlap) and both
    # TensorCores get multiple steps on v7x.
    steps_wanted = 8
    if pl.cdiv(N, bn) < steps_wanted and N >= 4 * steps_wanted:
        bn = -(-N // steps_wanted)
    grid_n = pl.cdiv(N, bn)
    n_pad = grid_n * bn
    if n_pad != N:                                # pad the tail instead of bn=1 fallback
        xf = jnp.pad(xf, ((0, n_pad - N), (0, 0), (0, 0)))

    # Explicit scoped-VMEM budget: double-buffered x + out blocks, weight, headroom.
    x_block_bytes = bn * C * T * itemsize
    o_block_bytes = bn * P * T * jnp.dtype(out_dtype).itemsize
    vmem_bytes = int(2 * (x_block_bytes + o_block_bytes) + 2 * w_bytes + (2 << 20))
    vmem_bytes = min(vmem_bytes, 64 << 20)        # never above v7x physical VMEM

    cost = pl.CostEstimate(
        flops=2 * n_pad * P * C * T,
        transcendentals=0,
        bytes_accessed=(n_pad * C * T + n_pad * P * T) * itemsize + w_bytes,
    )

    out = pl.pallas_call(
        _proj_kernel,
        out_shape=jax.ShapeDtypeStruct((n_pad, P, T), out_dtype),
        grid=(grid_n,),
        in_specs=[
            # Last-two block dims equal the full array dims -> legal for any (C, T).
            pl.BlockSpec((bn, C, T), lambda i: (i, 0, 0)),   # per-step sample block
            pl.BlockSpec((P, C), lambda i: (0, 0)),          # constant block idx: no re-DMA
        ],
        out_specs=pl.BlockSpec((bn, P, T), lambda i: (i, 0, 0)),  # lane-dense T stores
        compiler_params=pltpu.CompilerParams(
            dimension_semantics=("parallel",),
            vmem_limit_bytes=vmem_bytes,
        ),
        cost_estimate=cost,
    )(xf, w)

    out = out[:N]                                 # drop tail padding
    return out.reshape(*lead, P, T)


# ------------------------------------------------------------------------------ params
def init_projection_weight(key, n_channels, n_projected_channels):
    """Mimic nn.Linear(n_channels, n_projected, bias=False) + nn.init.orthogonal_."""
    a = jax.random.normal(key, (n_channels, n_projected_channels), jnp.float32)
    q, _ = jnp.linalg.qr(a)                       # (C, P), orthonormal columns
    return q.T                                    # (P, C), orthonormal rows


# -------------------------------------------------------------------------------- main
if __name__ == "__main__":
    # Small configuration consistent with the module: project 64 MEG channels down to
    # 16 over batched segments of 128 time samples.
    B, S, C, T, P = 2, 4, 64, 128, 16

    key = jax.random.PRNGKey(0)
    kx, kw = jax.random.split(key)
    x = jax.random.normal(kx, (B, S, C, T), jnp.float32)
    w = init_projection_weight(kw, C, P)

    # 4-D path
    out = channel_projection_forward(x, w)
    out = jax.block_until_ready(out)
    assert out.shape == (B, S, P, T), out.shape
    assert bool(jnp.all(jnp.isfinite(out)))
    ref = jnp.einsum("pc,bsct->bspt", w, x, precision=lax.Precision.HIGHEST)
    max_err = float(jnp.max(jnp.abs(out - ref)))
    assert max_err < 1e-3, max_err

    # 3-D path (also exercises tail padding: N=2 with budgeted bn)
    x3 = x[:, 0]                                  # (B, C, T)
    out3 = jax.block_until_ready(channel_projection_forward(x3, w))
    assert out3.shape == (B, P, T), out3.shape
    ref3 = jnp.einsum("pc,bct->bpt", w, x3, precision=lax.Precision.HIGHEST)
    assert float(jnp.max(jnp.abs(out3 - ref3))) < 1e-3

    print("KERNEL_OK")
</pallas_src>

<mosaic_0001>
module attributes {stable_mosaic.version = 11 : i64} {
  func.func @_proj_kernel(%arg0: i32, %arg1: memref<8x64x128xf32, #tpu.memory_space<vmem>>, %arg2: memref<16x64xf32, #tpu.memory_space<vmem>>, %arg3: memref<8x16x128xf32, #tpu.memory_space<vmem>>) attributes {dimension_semantics = [#tpu.dimension_semantics<parallel>], iteration_bounds = array<i64: 1>, scalar_prefetch = 0 : i64, scratch_operands = 0 : i64, tpu.core_type = #tpu.core_type<tc>, window_params = [{transform_indices = @transform_0, window_bounds = array<i64: 8, 64, 128>}, {pipeline_mode = #tpu.pipeline_mode<synchronous>, transform_indices = @transform_1, window_bounds = array<i64: 16, 64>}, {transform_indices = @transform_2, window_bounds = array<i64: 8, 16, 128>}]} {
    %c0 = arith.constant 0 : index
    %c0_0 = arith.constant 0 : index
    %0 = vector.load %arg2[%c0, %c0_0] : memref<16x64xf32, #tpu.memory_space<vmem>>, vector<16x64xf32>
    %c0_1 = arith.constant 0 : index
    %c0_2 = arith.constant 0 : index
    %c0_3 = arith.constant 0 : index
    %1 = vector.load %arg1[%c0_1, %c0_2, %c0_3] : memref<8x64x128xf32, #tpu.memory_space<vmem>>, vector<8x64x128xf32>
    "tpu.trace_start"() <{level = 10 : i32, message = "pc,nct->npt"}> : () -> ()
    %cst = arith.constant dense<0.000000e+00> : vector<8x128x16xf32>
    %2 = tpu.matmul %1, %0, %cst {dimension_numbers = #tpu.dot_dimension_numbers<[1], [1], [0, 2], [0], [0, 0, 0, 2, 1, 0], [], []>, precision = #tpu.contract_precision<fp32>} : vector<8x64x128xf32>, vector<16x64xf32>, vector<8x128x16xf32> -> vector<8x128x16xf32>
    %3 = tpu.transpose %2, [0, 2, 1] : vector<8x128x16xf32> -> vector<8x16x128xf32>
    "tpu.trace_stop"() : () -> ()
    %c0_4 = arith.constant 0 : index
    %c0_5 = arith.constant 0 : index
    %c0_6 = arith.constant 0 : index
    %4 = vector.load %arg3[%c0_4, %c0_5, %c0_6] : memref<8x16x128xf32, #tpu.memory_space<vmem>>, vector<8x16x128xf32>
    tpu.vector_store %arg3[%c0_4, %c0_5, %c0_6], %3 {strides = array<i32>} : memref<8x16x128xf32, #tpu.memory_space<vmem>>, vector<8x16x128xf32>,
    return
  }
  func.func @transform_0(%arg0: i32) -> (i32, i32, i32) {
    %c0_i32 = arith.constant 0 : i32
    %c0_i32_0 = arith.constant 0 : i32
    %c0_i32_1 = arith.constant 0 : i32
    return %arg0, %c0_i32, %c0_i32_0 : i32, i32, i32
  }
  func.func @transform_1(%arg0: i32) -> (i32, i32) {
    %c0_i32 = arith.constant 0 : i32
    %c0_i32_0 = arith.constant 0 : i32
    %c0_i32_1 = arith.constant 0 : i32
    return %c0_i32, %c0_i32_0 : i32, i32
  }
  func.func @transform_2(%arg0: i32) -> (i32, i32, i32) {
    %c0_i32 = arith.constant 0 : i32
    %c0_i32_0 = arith.constant 0 : i32
    %c0_i32_1 = arith.constant 0 : i32
    return %arg0, %c0_i32, %c0_i32_0 : i32, i32, i32
  }
}

</mosaic_0001>

<bundles_post_ra>
// kernel: tpu_custom_call.1
= control target key start
LH: loop header
LB: loop body
LE: loop exit
PB: predicated region body
PF: predicated region fallthrough
CT: control target
= control target key end

     0   :  { %7 = vsyncpa [#allocation3], 0  ;;  %s8023_s0 = inlined_call_operand.hbm [shape: f32[8,64,128], index: 0, kind: input, shape index: {}]   ;;  %s8024_s1 = inlined_call_operand.hbm [shape: f32[16,64], index: 1, kind: input, shape index: {}]   ;;  %s8025_s2 = inlined_call_operand.hbm [shape: f32[8,16,128], index: 2, kind: output, shape index: {}]  }
   0x1   :  { %8 = vsyncpa [#allocation6], 0 }
   0x2   :  { %9 = vsyncpa [#allocation4], 0  ;;  %s14_s11 = sshll.u32 %s8023_s0, 4  ;;  %s5233_s12 = smov [#allocation2]   ;;  %s15_s11 = int_to_ptr.hbm [resolvable:$true] %s14_s11 }
   0x3   :  { %s16_s13 = sshll.u32 %s5233_s12, 4  ;;  %s27_s16 = sshll.u32 %s8024_s1, 4  ;;  %s17_s13 = int_to_ptr.vmem [resolvable:$true] %s16_s13  ;;  %s28_s16 = int_to_ptr.hbm [resolvable:$true] %s27_s16 }
   0x4   :  { %s5234_s17 = smov 128   ;;  %s5235_s18 = smov 8  }
   0x5   :  { %22 = dma.hbm_to_vmem [thread:$0]  %s15_s11, 8192, %s17_s13, [#allocation3], %s5234_s17, %s5234_s17, %s5235_s18  }
   0x6   :  { %s5236_s19 = smov [#allocation5]  }
   0x7   :  { %s29_s20 = sshll.u32 %s5236_s19, 4  ;;  %s30_s20 = int_to_ptr.vmem [resolvable:$true] %s29_s20 }
   0x8   :  { %35 = dma.hbm_to_vmem [thread:$0]  %s28_s16, 256, %s30_s20, [#allocation6], %s5234_s17, %s5234_s17, %s5235_s18  }
   0x9   :  { %5227 = dma.done.wait [#allocation3], 8192  }
   0xa   :  { %5228 = vsyncadd [#allocation3], 4294959104 }
   0xb   :  { %5229 = dma.done.wait [#allocation6], 256  }
   0xc   :  { %5230 = vsyncadd [#allocation6], 4294967040  ;;  %v78_v0 = vld [vmem:[#allocation2 + $0x100] sm:$0xff]  ;;  %v79_v2 = vld [vmem:[#allocation2 + $0x108] sm:$0xff]  ;;  %vm366_vm0 = vcmask 523264   ;;  %s5237_s0 = smov [#allocation7]  }
   0xd   :  { %v46_v1 = vld [vmem:[#allocation2] sm:$0xff]  ;;  %238 = vxpose.xlu0.b32.start [1/8] (short) %v78_v0, 128  ;;  %v47_v3 = vld [vmem:[#allocation2 + $0x8] sm:$0xff]  ;;  %v80_v4 = vld [vmem:[#allocation2 + $0x110] sm:$0xff]  ;;  %s5129_s1 = sshll.u32 %s5237_s0, 4  ;;  %s5131_s23 = sshll.u32 %s8025_s2, 4  ;;  %s5130_s1 = int_to_ptr.vmem [resolvable:$true] %s5129_s1  ;;  %s5132_s23 = int_to_ptr.hbm [resolvable:$true] %s5131_s23 }
   0xe   :  { %110 = vxpose.xlu1.b32.start [1/8] (short) %v46_v1, 128  ;;  %v48_v5 = vld [vmem:[#allocation2 + $0x10] sm:$0xff]  ;;  %v81_v6 = vld [vmem:[#allocation2 + $0x118] sm:$0xff]  ;;  %v82_v8 = vld [vmem:[#allocation2 + $0x120] sm:$0xff] }
   0xf   :  { %v49_v7 = vld [vmem:[#allocation2 + $0x18] sm:$0xff]  ;;  %v50_v9 = vld [vmem:[#allocation2 + $0x20] sm:$0xff]  ;;  %v83_v10 = vld [vmem:[#allocation2 + $0x128] sm:$0xff] }
  0x10   :  { %v51_v11 = vld [vmem:[#allocation2 + $0x28] sm:$0xff]  ;;  %v84_v12 = vld [vmem:[#allocation2 + $0x130] sm:$0xff]  ;;  %v85_v14 = vld [vmem:[#allocation2 + $0x138] sm:$0xff] }
  0x11   :  { %v52_v13 = vld [vmem:[#allocation2 + $0x30] sm:$0xff]  ;;  %v53_v15 = vld [vmem:[#allocation2 + $0x38] sm:$0xff]  ;;  %v86_v16 = vld [vmem:[#allocation2 + $0x140] sm:$0xff] }
  0x12   :  { %270 = vxpose.xlu2.b32.start [1/8] (short) %v86_v16, 128  ;;  %v87_v17 = vld [vmem:[#allocation2 + $0x148] sm:$0xff]  ;;  %v88_v18 = vld [vmem:[#allocation2 + $0x150] sm:$0xff]  ;;  %v89_v22 = vld [vmem:[#allocation2 + $0x158] sm:$0xff] }
  0x13   :  { %v45_v19 = vld [vmem:[#allocation5 + $0x8] sm:$0xff]  ;;  %v44_v24 = vld [vmem:[#allocation5] sm:$0xff]  ;;  %v56_v37 = vld [vmem:[#allocation2 + $0x50] sm:$0xff] }
  0x14   :  { %v755_v20 = vsel %vm366_vm0, %v45_v19, 0  ;;  %v752_v25 = vsel %vm366_vm0, %v44_v24, 0  ;;  %v54_v28 = vld [vmem:[#allocation2 + $0x40] sm:$0xff]  ;;  %v55_v35 = vld [vmem:[#allocation2 + $0x48] sm:$0xff]  ;;  %v57_v39 = vld [vmem:[#allocation2 + $0x58] sm:$0xff] }
  0x15   :  { %239 = vxpose.xlu0.b32.cont [2/8] (short) %v79_v2, 128  ;;  %v771_v21 = vand.u32 4294901760, %v755_v20  ;;  %v773_v27 = vand.u32 4294901760, %v752_v25  ;;  %v90_v36 = vld [vmem:[#allocation2 + $0x160] sm:$0xff]  ;;  %v91_v38 = vld [vmem:[#allocation2 + $0x168] sm:$0xff]  ;;  %v92_v40 = vld [vmem:[#allocation2 + $0x170] sm:$0xff] }
  0x16   :  { %111 = vxpose.xlu1.b32.cont [2/8] (short) %v47_v3, 128  ;;  %v58_v41 = vld [vmem:[#allocation2 + $0x60] sm:$0xff]  ;;  %v93_v42 = vld [vmem:[#allocation2 + $0x178] sm:$0xff]  ;;  %v59_v47 = vld [vmem:[#allocation2 + $0x68] sm:$0xff] }
  0x17   :  { %v1815_v23 = vsub.f32 %v755_v20, %v771_v21  ;;  %772 = vmatpush.xpose.msra.mxu0 %v771_v21  ;;  %5145 = vmatpush.xpose.msra.mxu2 %v771_v21  ;;  %v1821_v30 = vsub.f32 %v752_v25, %v773_v27  ;;  %v60_v60 = vld [vmem:[#allocation2 + $0x70] sm:$0xff] }
  0x19   :  { %v1816_v26 = vand.u32 4294901760, %v1815_v23  ;;  %v1822_v32 = vand.u32 4294901760, %v1821_v30 }
  0x1a   :  { %271 = vxpose.xlu2.b32.cont [2/8] (short) %v87_v17, 128 }
  0x1b   :  { %v1817_v29 = vsub.f32 %v1815_v23, %v1816_v26  ;;  %774 = vmatpush.xpose.msra.mxu0 %v773_v27  ;;  %5146 = vmatpush.xpose.msra.mxu2 %v773_v27  ;;  %v1823_v33 = vsub.f32 %v1821_v30, %v1822_v32 }
  0x1d   :  { %240 = vxpose.xlu0.b32.cont [3/8] (short) %v80_v4, 128  ;;  %v1818_v31 = vand.u32 4294901760, %v1817_v29  ;;  %v1824_v34 = vand.u32 4294901760, %v1823_v33 }
  0x1e   :  { %112 = vxpose.xlu1.b32.cont [3/8] (short) %v48_v5, 128 }
  0x1f   :  { %3804 = vmatpush.xpose.msrb.mxu0 %v1816_v26  ;;  %2355 = vmatpush.xpose.msrb.mxu2 %v1815_v23 }
  0x20   :  { %1819 = vmatpush.xpose.msra.mxu1 %v1818_v31  ;;  %5147 = vmatpush.xpose.msra.mxu3 %v1818_v31 }
  0x22   :  { %272 = vxpose.xlu2.b32.cont [3/8] (short) %v88_v18, 128 }
  0x23   :  { %3808 = vmatpush.xpose.msrb.mxu0 %v1822_v32  ;;  %2358 = vmatpush.xpose.msrb.mxu2 %v1821_v30 }
  0x24   :  { %1825 = vmatpush.xpose.msra.mxu1 %v1824_v34  ;;  %5148 = vmatpush.xpose.msra.mxu3 %v1824_v34 }
  0x25   :  { %241 = vxpose.xlu0.b32.cont [4/8] (short) %v81_v6, 128 }
  0x26   :  { %113 = vxpose.xlu1.b32.cont [4/8] (short) %v49_v7, 128 }
  0x28   :  { %3015 = vmatpush.xpose.msrb.mxu3 %v771_v21  ;;  %4337 = vmatpush.xpose.msrb.mxu1 %v771_v21 }
  0x2a   :  { %273 = vxpose.xlu2.b32.cont [4/8] (short) %v89_v22, 128 }
  0x2c   :  { %3017 = vmatpush.xpose.msrb.mxu3 %v773_v27  ;;  %4339 = vmatpush.xpose.msrb.mxu1 %v773_v27 }
  0x2d   :  { %242 = vxpose.xlu0.b32.cont [5/8] (short) %v82_v8, 128 }
  0x2e   :  { %114 = vxpose.xlu1.b32.cont [5/8] (short) %v50_v9, 128 }
  0x32   :  { %274 = vxpose.xlu2.b32.cont [5/8] (short) %v90_v36, 128 }
  0x35   :  { %243 = vxpose.xlu0.b32.cont [6/8] (short) %v83_v10, 128 }
  0x36   :  { %115 = vxpose.xlu1.b32.cont [6/8] (short) %v51_v11, 128  ;;  %v61_v11 = vld [vmem:[#allocation2 + $0x78] sm:$0xff] }
  0x3a   :  { %275 = vxpose.xlu2.b32.cont [6/8] (short) %v91_v38, 128 }
  0x3d   :  { %244 = vxpose.xlu0.b32.cont [7/8] (short) %v84_v12, 128 }
  0x3e   :  { %116 = vxpose.xlu1.b32.cont [7/8] (short) %v52_v13, 128 }
  0x42   :  { %276 = vxpose.xlu2.b32.cont [7/8] (short) %v92_v40, 128 }
  0x45   :  { %245 = vxpose.xlu0.b32.end [8/8] (short) %v85_v14, 128 }
  0x46   :  { %117 = vxpose.xlu1.b32.end [8/8] (short) %v53_v15, 128 }
  0x4a   :  { %277 = vxpose.xlu2.b32.end [8/8] (short) %v93_v42, 128 }
  0x8d   :  { %142 = vxpose.xlu0.b32.start [1/8] (short) %v54_v28, 128 }
  0x95   :  { %143 = vxpose.xlu0.b32.cont [2/8] (short) %v55_v35, 128 }
  0x9d   :  { %144 = vxpose.xlu0.b32.cont [3/8] (short) %v56_v37, 128 }
  0xa5   :  { %145 = vxpose.xlu0.b32.cont [4/8] (short) %v57_v39, 128 }
  0xad   :  { %146 = vxpose.xlu0.b32.cont [5/8] (short) %v58_v41, 128 }
  0xb1   :  { %v254_v43 = vpop.trf.xlu0 }
  0xb2   :  { %v126_v44 = vpop.trf.xlu1  ;;  %v560_v45 = vsel %vm366_vm0, %v254_v43, 0 }
  0xb3   :  { %v368_v46 = vsel %vm366_vm0, %v126_v44, 0  ;;  %v5269_v48 = vand.u32 4294901760, %v560_v45 }
  0xb4   :  { %v5271_v49 = vand.u32 4294901760, %v368_v46 }
  0xb5   :  { %8522 = vst [vmem:[#allocation11_spill] sm:$0xff] %v5269_v48  ;;  %v5274_v50 = vsub.f32 %v560_v45, %v5269_v48  ;;  %147 = vxpose.xlu0.b32.cont [6/8] (short) %v59_v47, 128  ;;  %2083 = vmatmul.f32.vlgmr.msra.gmra.mxu3 %v5269_v48 }
  0xb6   :  { %v5277_v51 = vsub.f32 %v368_v46, %v5271_v49  ;;  %1827 = vmatmul.f32.vlgmr.msra.gmra.mxu1 %v5271_v49 }
  0xb7   :  { %8523 = vst [vmem:[#allocation12_spill] sm:$0xff] %v5274_v50  ;;  %v8034_v53 = vand.u32 4294901760, %v5274_v50 }
  0xb8   :  { %v8049_v52 = vand.u32 4294901760, %v5277_v51 }
  0xb9   :  { %v255_v54 = vpop.trf.xlu0  ;;  %v1290_v57 = vsub.f32 %v5274_v50, %v8034_v53 }
  0xba   :  { %v127_v55 = vpop.trf.xlu1  ;;  %v778_v56 = vsub.f32 %v5277_v51, %v8049_v52  ;;  %v563_v58 = vsel %vm366_vm0, %v255_v54, 0  ;;  %v100_v52 = vld [vmem:[#allocation2 + $0x1b0] sm:$0xff] }
  0xbb   :  { %v371_v59 = vsel %vm366_vm0, %v127_v55, 0  ;;  %v5291_v61 = vand.u32 4294901760, %v563_v58  ;;  %v1291_v0 = vand.u32 4294901760, %v1290_v57 }
  0xbc   :  { %v5293_v62 = vand.u32 4294901760, %v371_v59  ;;  %v779_v63 = vand.u32 4294901760, %v778_v56 }
  0xbd   :  { %8524 = vst [vmem:[#allocation13_spill] sm:$0xff] %v5291_v61  ;;  %v5296_v1 = vsub.f32 %v563_v58, %v5291_v61  ;;  %148 = vxpose.xlu0.b32.cont [7/8] (short) %v60_v60, 128  ;;  %1292 = vmatmul.f32.vlgmr.msra.gmra.mxu2 %v1291_v0 }
  0xbe   :  { %v5299_v2 = vsub.f32 %v371_v59, %v5293_v62  ;;  %780 = vmatmul.f32.vlgmr.msra.gmra.mxu0 %v779_v63  ;;  %1831 = vmatmul.f32.gmra.mxu1 %v5293_v62 }
  0xbf   :  { %8525 = vst [vmem:[#allocation14_spill] sm:$0xff] %v5296_v1  ;;  %2087 = vmatmul.f32.gmra.mxu3 %v5291_v61  ;;  %v8033_v4 = vand.u32 4294901760, %v5296_v1 }
  0xc0   :  { %v8046_v3 = vand.u32 4294901760, %v5299_v2 }
  0xc1   :  { %v256_v5 = vpop.trf.xlu0  ;;  %v1298_v8 = vsub.f32 %v5296_v1, %v8033_v4 }
  0xc2   :  { %v128_v6 = vpop.trf.xlu1  ;;  %v786_v7 = vsub.f32 %v5299_v2, %v8046_v3  ;;  %v566_v9 = vsel %vm366_vm0, %v256_v5, 0 }
  0xc3   :  { %v374_v10 = vsel %vm366_vm0, %v128_v6, 0  ;;  %v5313_v12 = vand.u32 4294901760, %v566_v9  ;;  %v1299_v15 = vand.u32 4294901760, %v1298_v8 }
  0xc4   :  { %v5315_v13 = vand.u32 4294901760, %v374_v10  ;;  %v787_v14 = vand.u32 4294901760, %v786_v7 }
  0xc5   :  { %8526 = vst [vmem:[#allocation15_spill] sm:$0xff] %v5313_v12  ;;  %v5318_v16 = vsub.f32 %v566_v9, %v5313_v12  ;;  %149 = vxpose.xlu0.b32.end [8/8] (short) %v61_v11, 128  ;;  %1300 = vmatmul.f32.gmra.mxu2 %v1299_v15 }
  0xc6   :  { %v5321_v17 = vsub.f32 %v374_v10, %v5315_v13  ;;  %788 = vmatmul.f32.gmra.mxu0 %v787_v14  ;;  %1835 = vmatmul.f32.gmra.mxu1 %v5315_v13 }
  0xc7   :  { %8527 = vst [vmem:[#allocation16_spill] sm:$0xff] %v5318_v16  ;;  %2091 = vmatmul.f32.gmra.mxu3 %v5313_v12  ;;  %v8032_v19 = vand.u32 4294901760, %v5318_v16 }
  0xc8   :  { %v8045_v18 = vand.u32 4294901760, %v5321_v17 }
  0xc9   :  { %v257_v20 = vpop.trf.xlu0  ;;  %v1306_v23 = vsub.f32 %v5318_v16, %v8032_v19 }
  0xca   :  { %v129_v21 = vpop.trf.xlu1  ;;  %v794_v22 = vsub.f32 %v5321_v17, %v8045_v18  ;;  %v569_v24 = vsel %vm366_vm0, %v257_v20, 0 }
  0xcb   :  { %v377_v25 = vsel %vm366_vm0, %v129_v21, 0  ;;  %v5335_v26 = vand.u32 4294901760, %v569_v24  ;;  %v1307_v29 = vand.u32 4294901760, %v1306_v23 }
  0xcc   :  { %v5337_v27 = vand.u32 4294901760, %v377_v25  ;;  %v795_v28 = vand.u32 4294901760, %v794_v22 }
  0xcd   :  { %8528 = vst [vmem:[#allocation17_spill] sm:$0xff] %v5335_v26  ;;  %v5340_v30 = vsub.f32 %v569_v24, %v5335_v26  ;;  %1308 = vmatmul.f32.gmra.mxu2 %v1307_v29 }
  0xce   :  { %v5343_v31 = vsub.f32 %v377_v25, %v5337_v27  ;;  %796 = vmatmul.f32.gmra.mxu0 %v795_v28  ;;  %1839 = vmatmul.f32.gmra.mxu1 %v5337_v27 }
  0xcf   :  { %8529 = vst [vmem:[#allocation18_spill] sm:$0xff] %v5340_v30  ;;  %2095 = vmatmul.f32.gmra.mxu3 %v5335_v26  ;;  %v8031_v33 = vand.u32 4294901760, %v5340_v30 }
  0xd0   :  { %v8044_v32 = vand.u32 4294901760, %v5343_v31 }
  0xd1   :  { %v258_v34 = vpop.trf.xlu0  ;;  %v1314_v37 = vsub.f32 %v5340_v30, %v8031_v33 }
  0xd2   :  { %v130_v35 = vpop.trf.xlu1  ;;  %v802_v36 = vsub.f32 %v5343_v31, %v8044_v32  ;;  %v572_v38 = vsel %vm366_vm0, %v258_v34, 0 }
  0xd3   :  { %v380_v39 = vsel %vm366_vm0, %v130_v35, 0  ;;  %v5357_v40 = vand.u32 4294901760, %v572_v38  ;;  %v1315_v43 = vand.u32 4294901760, %v1314_v37 }
  0xd4   :  { %v5359_v41 = vand.u32 4294901760, %v380_v39  ;;  %v803_v42 = vand.u32 4294901760, %v802_v36 }
  0xd5   :  { %8530 = vst [vmem:[#allocation19_spill] sm:$0xff] %v5357_v40  ;;  %v5362_v44 = vsub.f32 %v572_v38, %v5357_v40  ;;  %1316 = vmatmul.f32.gmra.mxu2 %v1315_v43 }
  0xd6   :  { %v5365_v45 = vsub.f32 %v380_v39, %v5359_v41  ;;  %804 = vmatmul.f32.gmra.mxu0 %v803_v42  ;;  %1843 = vmatmul.f32.gmra.mxu1 %v5359_v41 }
  0xd7   :  { %8531 = vst [vmem:[#allocation20_spill] sm:$0xff] %v5362_v44  ;;  %2099 = vmatmul.f32.gmra.mxu3 %v5357_v40  ;;  %v8030_v47 = vand.u32 4294901760, %v5362_v44 }
  0xd8   :  { %v8043_v46 = vand.u32 4294901760, %v5365_v45 }
  0xd9   :  { %v259_v54 = vpop.trf.xlu0  ;;  %v1322_v57 = vsub.f32 %v5362_v44, %v8030_v47 }
  0xda   :  { %v131_v55 = vpop.trf.xlu1  ;;  %v810_v56 = vsub.f32 %v5365_v45, %v8043_v46  ;;  %v575_v58 = vsel %vm366_vm0, %v259_v54, 0  ;;  %v94_v54 = vld [vmem:[#allocation2 + $0x180] sm:$0xff] }
  0xdb   :  { %v383_v59 = vsel %vm366_vm0, %v131_v55, 0  ;;  %v5379_v60 = vand.u32 4294901760, %v575_v58  ;;  %v1323_v5 = vand.u32 4294901760, %v1322_v57  ;;  %302 = vxpose.xlu1.b32.start [1/8] (short) %v94_v54, 128 }
  0xdc   :  { %v5381_v63 = vand.u32 4294901760, %v383_v59  ;;  %v811_v0 = vand.u32 4294901760, %v810_v56 }
  0xdd   :  { %8532 = vst [vmem:[#allocation21_spill] sm:$0xff] %v5379_v60  ;;  %v5384_v6 = vsub.f32 %v575_v58, %v5379_v60  ;;  %1324 = vmatmul.f32.gmra.mxu2 %v1323_v5 }
  0xde   :  { %v5387_v7 = vsub.f32 %v383_v59, %v5381_v63  ;;  %812 = vmatmul.f32.gmra.mxu0 %v811_v0  ;;  %1847 = vmatmul.f32.gmra.mxu1 %v5381_v63 }
  0xdf   :  { %8533 = vst [vmem:[#allocation22_spill] sm:$0xff] %v5384_v6  ;;  %2103 = vmatmul.f32.gmra.mxu3 %v5379_v60  ;;  %v8028_v9 = vand.u32 4294901760, %v5384_v6 }
  0xe0   :  { %v8042_v8 = vand.u32 4294901760, %v5387_v7 }
  0xe1   :  { %v260_v10 = vpop.trf.xlu0  ;;  %v1330_v15 = vsub.f32 %v5384_v6, %v8028_v9 }
  0xe2   :  { %v132_v11 = vpop.trf.xlu1  ;;  %v818_v14 = vsub.f32 %v5387_v7, %v8042_v8  ;;  %v578_v20 = vsel %vm366_vm0, %v260_v10, 0  ;;  %v99_v8 = vld [vmem:[#allocation2 + $0x1a8] sm:$0xff] }
  0xe3   :  { %v386_v21 = vsel %vm366_vm0, %v132_v11, 0  ;;  %v5401_v22 = vand.u32 4294901760, %v578_v20  ;;  %v1331_v25 = vand.u32 4294901760, %v1330_v15 }
  0xe4   :  { %v5403_v23 = vand.u32 4294901760, %v386_v21  ;;  %v819_v24 = vand.u32 4294901760, %v818_v14 }
  0xe5   :  { %8534 = vst [vmem:[#allocation23_spill] sm:$0xff] %v5401_v22  ;;  %v5406_v28 = vsub.f32 %v578_v20, %v5401_v22  ;;  %1332 = vmatmul.f32.gmra.mxu2 %v1331_v25  ;;  %v95_v25 = vld [vmem:[#allocation2 + $0x188] sm:$0xff] }
  0xe6   :  { %v5409_v29 = vsub.f32 %v386_v21, %v5403_v23  ;;  %820 = vmatmul.f32.gmra.mxu0 %v819_v24  ;;  %1851 = vmatmul.f32.gmra.mxu1 %v5403_v23 }
  0xe7   :  { %8535 = vst [vmem:[#allocation24_spill] sm:$0xff] %v5406_v28  ;;  %2107 = vmatmul.f32.gmra.mxu3 %v5401_v22  ;;  %v8027_v35 = vand.u32 4294901760, %v5406_v28  ;;  %303 = vxpose.xlu1.b32.cont [2/8] (short) %v95_v25, 128  ;;  %v96_v25 = vld [vmem:[#allocation2 + $0x190] sm:$0xff] }
  0xe8   :  { %v8039_v34 = vand.u32 4294901760, %v5409_v29 }
  0xe9   :  { %v261_v36 = vpop.trf.xlu0  ;;  %v1338_v39 = vsub.f32 %v5406_v28, %v8027_v35 }
  0xea   :  { %v133_v37 = vpop.trf.xlu1  ;;  %v826_v38 = vsub.f32 %v5409_v29, %v8039_v34  ;;  %v581_v42 = vsel %vm366_vm0, %v261_v36, 0 }
  0xeb   :  { %v389_v43 = vsel %vm366_vm0, %v133_v37, 0  ;;  %v5423_v55 = vand.u32 4294901760, %v581_v42  ;;  %v1339_v58 = vand.u32 4294901760, %v1338_v39 }
  0xec   :  { %v5425_v56 = vand.u32 4294901760, %v389_v43  ;;  %v827_v57 = vand.u32 4294901760, %v826_v38 }
  0xed   :  { %8536 = vst [vmem:[#allocation25_spill] sm:$0xff] %v5423_v55  ;;  %v5428_v59 = vsub.f32 %v581_v42, %v5423_v55  ;;  %1340 = vmatmul.f32.gmra.mxu2 %v1339_v58  ;;  %v62_v58 = vld [vmem:[#allocation2 + $0x80] sm:$0xff] }
  0xee   :  { %v5431_v0 = vsub.f32 %v389_v43, %v5425_v56  ;;  %828 = vmatmul.f32.gmra.mxu0 %v827_v57  ;;  %1855 = vmatmul.f32.gmra.mxu1 %v5425_v56 }
  0xef   :  { %8537 = vst [vmem:[#allocation26_spill] sm:$0xff] %v5428_v59  ;;  %2111 = vmatmul.f32.gmra.mxu3 %v5423_v55  ;;  %v8026_v10 = vand.u32 4294901760, %v5428_v59  ;;  %174 = vxpose.xlu2.b32.start [1/8] (short) %v62_v58, 128 }
  0xf0   :  { %v8038_v5 = vand.u32 4294901760, %v5431_v0  ;;  %304 = vxpose.xlu1.b32.cont [3/8] (short) %v96_v25, 128 }
  0xf1   :  { %v262_v11 = vpop.trf.xlu0  ;;  %v1346_v20 = vsub.f32 %v5428_v59, %v8026_v10 }
  0xf2   :  { %v134_v14 = vpop.trf.xlu1  ;;  %v834_v15 = vsub.f32 %v5431_v0, %v8038_v5  ;;  %v584_v21 = vsel %vm366_vm0, %v262_v11, 0 }
  0xf3   :  { %v392_v24 = vsel %vm366_vm0, %v134_v14, 0  ;;  %v5445_v36 = vand.u32 4294901760, %v584_v21  ;;  %v1347_v39 = vand.u32 4294901760, %v1346_v20 }
  0xf4   :  { %v5447_v37 = vand.u32 4294901760, %v392_v24  ;;  %v835_v38 = vand.u32 4294901760, %v834_v15 }
  0xf5   :  { %8538 = vst [vmem:[#allocation27_spill] sm:$0xff] %v5445_v36  ;;  %v5450_v42 = vsub.f32 %v584_v21, %v5445_v36  ;;  %1348 = vmatmul.f32.gmra.mxu2 %v1347_v39 }
  0xf6   :  { %v5453_v43 = vsub.f32 %v392_v24, %v5447_v37  ;;  %836 = vmatmul.f32.gmra.mxu0 %v835_v38  ;;  %1859 = vmatmul.f32.gmra.mxu1 %v5447_v37 }
  0xf7   :  { %8539 = vst [vmem:[#allocation28_spill] sm:$0xff] %v5450_v42  ;;  %2115 = vmatmul.f32.gmra.mxu3 %v5445_v36  ;;  %v8029_v57 = vand.u32 4294901760, %v5450_v42 }
  0xf8   :  { %v8037_v54 = vand.u32 4294901760, %v5453_v43 }
  0xf9   :  { %v263_v11 = vpop.trf.xlu0  ;;  %v1354_v20 = vsub.f32 %v5450_v42, %v8029_v57  ;;  %v63_v57 = vld [vmem:[#allocation2 + $0x88] sm:$0xff] }
  0xfa   :  { %v135_v14 = vpop.trf.xlu1  ;;  %v842_v15 = vsub.f32 %v5453_v43, %v8037_v54  ;;  %v587_v21 = vsel %vm366_vm0, %v263_v11, 0  ;;  %175 = vxpose.xlu2.b32.cont [2/8] (short) %v63_v57, 128 }
  0xfb   :  { %v395_v24 = vsel %vm366_vm0, %v135_v14, 0  ;;  %v5467_v38 = vand.u32 4294901760, %v587_v21  ;;  %v1355_v10 = vand.u32 4294901760, %v1354_v20 }
  0xfc   :  { %v5469_v39 = vand.u32 4294901760, %v395_v24  ;;  %v843_v58 = vand.u32 4294901760, %v842_v15 }
  0xfd   :  { %8540 = vst [vmem:[#allocation29_spill] sm:$0xff] %v5467_v38  ;;  %v5472_v35 = vsub.f32 %v587_v21, %v5467_v38  ;;  %1356 = vmatmul.f32.gmra.mxu2 %v1355_v10 }
  0xfe   :  { %v5475_v9 = vsub.f32 %v395_v24, %v5469_v39  ;;  %844 = vmatmul.f32.gmra.mxu0 %v843_v58  ;;  %1863 = vmatmul.f32.gmra.mxu1 %v5469_v39  ;;  %v97_v58 = vld [vmem:[#allocation2 + $0x198] sm:$0xff] }
  0xff   :  { %8541 = vst [vmem:[#allocation30_spill] sm:$0xff] %v5472_v35  ;;  %2119 = vmatmul.f32.gmra.mxu3 %v5467_v38  ;;  %v8035_v14 = vand.u32 4294901760, %v5472_v35  ;;  %305 = vxpose.xlu1.b32.cont [4/8] (short) %v97_v58, 128 }
 0x100   :  { %v8036_v11 = vand.u32 4294901760, %v5475_v9 }
 0x101   :  { %v264_v15 = vpop.trf.xlu0  ;;  %v1362_v10 = vsub.f32 %v5472_v35, %v8035_v14  ;;  %v64_v14 = vld [vmem:[#allocation2 + $0x90] sm:$0xff] }
 0x102   :  { %v136_v20 = vpop.trf.xlu1  ;;  %v850_v21 = vsub.f32 %v5475_v9, %v8036_v11  ;;  %v590_v24 = vsel %vm366_vm0, %v264_v15, 0  ;;  %176 = vxpose.xlu2.b32.cont [3/8] (short) %v64_v14, 128 }
 0x103   :  { %v398_v25 = vsel %vm366_vm0, %v136_v20, 0  ;;  %v5489_v47 = vand.u32 4294901760, %v590_v24  ;;  %v1363_v19 = vand.u32 4294901760, %v1362_v10 }
 0x104   :  { %v5491_v33 = vand.u32 4294901760, %v398_v25  ;;  %v851_v57 = vand.u32 4294901760, %v850_v21 }
 0x105   :  { %8542 = vst [vmem:[#allocation31_spill] sm:$0xff] %v5489_v47  ;;  %v5494_v4 = vsub.f32 %v590_v24, %v5489_v47  ;;  %1364 = vmatmul.f32.gmra.mxu2 %v1363_v19 }
 0x106   :  { %v5497_v53 = vsub.f32 %v398_v25, %v5491_v33  ;;  %852 = vmatmul.f32.gmra.mxu0 %v851_v57  ;;  %1867 = vmatmul.f32.gmra.mxu1 %v5491_v33  ;;  %v98_v57 = vld [vmem:[#allocation2 + $0x1a0] sm:$0xff] }
 0x107   :  { %8543 = vst [vmem:[#allocation32_spill] sm:$0xff] %v5494_v4  ;;  %2123 = vmatmul.f32.gmra.mxu3 %v5489_v47  ;;  %v8041_v20 = vand.u32 4294901760, %v5494_v4  ;;  %306 = vxpose.xlu1.b32.cont [5/8] (short) %v98_v57, 128 }
 0x108   :  { %v8040_v15 = vand.u32 4294901760, %v5497_v53 }
 0x109   :  { %v265_v21 = vpop.trf.xlu0  ;;  %v1370_v19 = vsub.f32 %v5494_v4, %v8041_v20  ;;  %v5525_v20 = vpop.trf.xlu2 }
 0x10a   :  { %v137_v10 = vpop.trf.xlu1  ;;  %v858_v24 = vsub.f32 %v5497_v53, %v8040_v15  ;;  %v593_v25 = vsel %vm366_vm0, %v265_v21, 0 }
 0x10b   :  { %v401_v58 = vsel %vm366_vm0, %v137_v10, 0  ;;  %v5511_v11 = vand.u32 4294901760, %v593_v25  ;;  %v1371_v5 = vand.u32 4294901760, %v1370_v19 }
 0x10c   :  { %v5513_v54 = vand.u32 4294901760, %v401_v58  ;;  %v859_v14 = vand.u32 4294901760, %v858_v24  ;;  %v65_v24 = vld [vmem:[#allocation2 + $0x98] sm:$0xff] }
 0x10d   :  { %8544 = vst [vmem:[#allocation33_spill] sm:$0xff] %v5511_v11  ;;  %v5516_v34 = vsub.f32 %v593_v25, %v5511_v11  ;;  %1372 = vmatmul.f32.gmra.mxu2 %v1371_v5  ;;  %177 = vxpose.xlu2.b32.cont [4/8] (short) %v65_v24, 128 }
 0x10e   :  { %v5519_v15 = vsub.f32 %v401_v58, %v5513_v54  ;;  %860 = vmatmul.f32.gmra.mxu0 %v859_v14  ;;  %1871 = vmatmul.f32.gmra.mxu1 %v5513_v54 }
 0x10f   :  { %8545 = vst [vmem:[#allocation34_spill] sm:$0xff] %v5516_v34  ;;  %2127 = vmatmul.f32.gmra.mxu3 %v5511_v11  ;;  %v8048_v10 = vand.u32 4294901760, %v5516_v34  ;;  %307 = vxpose.xlu1.b32.cont [6/8] (short) %v99_v8, 128 }
 0x110   :  { %v8047_v21 = vand.u32 4294901760, %v5519_v15 }
 0x111   :  { %v266_v19 = vpop.trf.xlu0  ;;  %v1378_v5 = vsub.f32 %v5516_v34, %v8048_v10  ;;  %v5549_v10 = vpop.trf.xlu2 }
 0x112   :  { %v138_v25 = vpop.trf.xlu1  ;;  %v866_v58 = vsub.f32 %v5519_v15, %v8047_v21  ;;  %v596_v57 = vsel %vm366_vm0, %v266_v19, 0 }
 0x113   :  { %v404_v14 = vsel %vm366_vm0, %v138_v25, 0  ;;  %v5535_v46 = vand.u32 4294901760, %v596_v57  ;;  %v1379_v18 = vand.u32 4294901760, %v1378_v5 }
 0x114   :  { %v5537_v32 = vand.u32 4294901760, %v404_v14  ;;  %v867_v24 = vand.u32 4294901760, %v866_v58  ;;  %v66_v58 = vld [vmem:[#allocation2 + $0xa0] sm:$0xff] }
 0x115   :  { %8546 = vst [vmem:[#allocation35_spill] sm:$0xff] %v5535_v46  ;;  %v5540_v3 = vsub.f32 %v596_v57, %v5535_v46  ;;  %1380 = vmatmul.f32.gmra.mxu2 %v1379_v18  ;;  %178 = vxpose.xlu2.b32.cont [5/8] (short) %v66_v58, 128 }
 0x116   :  { %v5543_v21 = vsub.f32 %v404_v14, %v5537_v32  ;;  %868 = vmatmul.f32.gmra.mxu0 %v867_v24  ;;  %1875 = vmatmul.f32.gmra.mxu1 %v5537_v32 }
 0x117   :  { %8547 = vst [vmem:[#allocation36_spill] sm:$0xff] %v5540_v3  ;;  %2131 = vmatmul.f32.gmra.mxu3 %v5535_v46  ;;  %v8059_v25 = vand.u32 4294901760, %v5540_v3  ;;  %308 = vxpose.xlu1.b32.cont [7/8] (short) %v100_v52, 128 }
 0x118   :  { %v8058_v19 = vand.u32 4294901760, %v5543_v21 }
 0x119   :  { %v267_v8 = vpop.trf.xlu0  ;;  %v1386_v18 = vsub.f32 %v5540_v3, %v8059_v25  ;;  %v5573_v25 = vpop.trf.xlu2 }
 0x11a   :  { %v139_v5 = vpop.trf.xlu1  ;;  %v874_v57 = vsub.f32 %v5543_v21, %v8058_v19  ;;  %v599_v14 = vsel %vm366_vm0, %v267_v8, 0 }
 0x11b   :  { %v407_v24 = vsel %vm366_vm0, %v139_v5, 0  ;;  %v5559_v46 = vand.u32 4294901760, %v599_v14  ;;  %v1387_v11 = vand.u32 4294901760, %v1386_v18 }
 0x11c   :  { %v5561_v34 = vand.u32 4294901760, %v407_v24  ;;  %v875_v58 = vand.u32 4294901760, %v874_v57  ;;  %v67_v57 = vld [vmem:[#allocation2 + $0xa8] sm:$0xff] }
 0x11d   :  { %8548 = vst [vmem:[#allocation37_spill] sm:$0xff] %v5559_v46  ;;  %v5564_v4 = vsub.f32 %v599_v14, %v5559_v46  ;;  %1388 = vmatmul.f32.gmra.mxu2 %v1387_v11  ;;  %179 = vxpose.xlu2.b32.cont [6/8] (short) %v67_v57, 128 }
 0x11e   :  { %v5567_v19 = vsub.f32 %v407_v24, %v5561_v34  ;;  %876 = vmatmul.f32.gmra.mxu0 %v875_v58  ;;  %1879 = vmatmul.f32.gmra.mxu1 %v5561_v34 }
 0x11f   :  { %8549 = vst [vmem:[#allocation38_spill] sm:$0xff] %v5564_v4  ;;  %2135 = vmatmul.f32.gmra.mxu3 %v5559_v46  ;;  %v8071_v5 = vand.u32 4294901760, %v5564_v4  ;;  %v101_v46 = vld [vmem:[#allocation2 + $0x1b8] sm:$0xff] }
 0x120   :  { %v8070_v8 = vand.u32 4294901760, %v5567_v19  ;;  %309 = vxpose.xlu1.b32.end [8/8] (short) %v101_v46, 128 }
 0x121   :  { %v268_v52 = vpop.trf.xlu0  ;;  %v1394_v11 = vsub.f32 %v5564_v4, %v8071_v5  ;;  %v5597_v5 = vpop.trf.xlu2 }
 0x122   :  { %v140_v18 = vpop.trf.xlu1  ;;  %v882_v14 = vsub.f32 %v5567_v19, %v8070_v8  ;;  %v602_v24 = vsel %vm366_vm0, %v268_v52, 0 }
 0x123   :  { %v410_v58 = vsel %vm366_vm0, %v140_v18, 0  ;;  %v5583_v3 = vand.u32 4294901760, %v602_v24  ;;  %v1395_v35 = vand.u32 4294901760, %v1394_v11 }
 0x124   :  { %v5585_v47 = vand.u32 4294901760, %v410_v58  ;;  %v883_v57 = vand.u32 4294901760, %v882_v14  ;;  %v68_v14 = vld [vmem:[#allocation2 + $0xb0] sm:$0xff] }
 0x125   :  { %8550 = vst [vmem:[#allocation39_spill] sm:$0xff] %v5583_v3  ;;  %v5588_v38 = vsub.f32 %v602_v24, %v5583_v3  ;;  %1396 = vmatmul.f32.gmra.mxu2 %v1395_v35  ;;  %180 = vxpose.xlu2.b32.cont [7/8] (short) %v68_v14, 128  ;;  %v608_v24 = vsel %vm366_vm0, %v5525_v20, 0 }
 0x126   :  { %v5591_v8 = vsub.f32 %v410_v58, %v5585_v47  ;;  %884 = vmatmul.f32.gmra.mxu0 %v883_v57  ;;  %1883 = vmatmul.f32.gmra.mxu1 %v5585_v47  ;;  %v5613_v59 = vand.u32 4294901760, %v608_v24 }
 0x127   :  { %8551 = vst [vmem:[#allocation40_spill] sm:$0xff] %v5588_v38  ;;  %2139 = vmatmul.f32.gmra.mxu3 %v5583_v3  ;;  %v8083_v18 = vand.u32 4294901760, %v5588_v38 }
 0x128   :  { %v8082_v52 = vand.u32 4294901760, %v5591_v8  ;;  %8553 = vst [vmem:[#allocation42_spill] sm:$0xff] %v5613_v59 }
 0x129   :  { %v269_v46 = vpop.trf.xlu0  ;;  %v1402_v58 = vsub.f32 %v5588_v38, %v8083_v18  ;;  %v5628_v18 = vsub.f32 %v608_v24, %v5613_v59 }
 0x12a   :  { %v141_v11 = vpop.trf.xlu1  ;;  %v890_v35 = vsub.f32 %v5591_v8, %v8082_v52  ;;  %v605_v57 = vsel %vm366_vm0, %v269_v46, 0 }
 0x12b   :  { %v413_v3 = vsel %vm366_vm0, %v141_v11, 0  ;;  %v5609_v4 = vand.u32 4294901760, %v605_v57  ;;  %v1403_v36 = vand.u32 4294901760, %v1402_v58  ;;  %v69_v58 = vld [vmem:[#allocation2 + $0xb8] sm:$0xff]  ;;  %8555 = vst [vmem:[#allocation44_spill] sm:$0xff] %v5628_v18 }
 0x12c   :  { %v5611_v14 = vand.u32 4294901760, %v413_v3  ;;  %v891_v42 = vand.u32 4294901760, %v890_v35  ;;  %v5625_v35 = vpop.trf.xlu2 }
 0x12d   :  { %8552 = vst [vmem:[#allocation41_spill] sm:$0xff] %v5609_v4  ;;  %v5616_v20 = vsub.f32 %v605_v57, %v5609_v4  ;;  %1404 = vmatmul.f32.gmra.mxu2 %v1403_v36  ;;  %181 = vxpose.xlu2.b32.end [8/8] (short) %v69_v58, 128 }
 0x12e   :  { %v5619_v52 = vsub.f32 %v413_v3, %v5611_v14  ;;  %892 = vmatmul.f32.gmra.mxu0 %v891_v42  ;;  %1887 = vmatmul.f32.gmra.mxu1 %v5611_v14  ;;  %v611_v3 = vsel %vm366_vm0, %v5549_v10, 0  ;;  %v8106_v10 = vand.u32 4294901760, %v5628_v18 }
 0x12f   :  { %8554 = vst [vmem:[#allocation43_spill] sm:$0xff] %v5616_v20  ;;  %2143 = vmatmul.f32.gmra.mxu3 %v5609_v4  ;;  %v8094_v11 = vand.u32 4294901760, %v5616_v20  ;;  %v5643_v28 = vand.u32 4294901760, %v611_v3 }
 0x130   :  { %v8095_v46 = vand.u32 4294901760, %v5619_v52 }
 0x131   :  { %v158_v57 = vpop.trf.xlu0  ;;  %v1410_v42 = vsub.f32 %v5616_v20, %v8094_v11  ;;  %8557 = vst [vmem:[#allocation46_spill] sm:$0xff] %v5643_v28 }
 0x132   :  { %v898_v36 = vsub.f32 %v5619_v52, %v8095_v46  ;;  %v416_v4 = vsel %vm366_vm0, %v158_v57, 0 }
 0x133   :  { %v5639_v38 = vpop.f32.mrf.mxu1  ;;  %v5641_v55 = vand.u32 4294901760, %v416_v4  ;;  %v1411_v58 = vand.u32 4294901760, %v1410_v42  ;;  %v1418_v42 = vsub.f32 %v5628_v18, %v8106_v10 }
 0x134   :  { %8556 = vst [vmem:[#allocation45_spill] sm:$0xff] %v5639_v38  ;;  %v899_v24 = vand.u32 4294901760, %v898_v36  ;;  %v5652_v11 = vpop.trf.xlu2  ;;  %v5655_v36 = vsub.f32 %v611_v3, %v5643_v28 }
 0x135   :  { %v5647_v22 = vsub.f32 %v416_v4, %v5641_v55  ;;  %1412 = vmatmul.f32.gmra.mxu2 %v1411_v58  ;;  %v1419_v10 = vand.u32 4294901760, %v1418_v42 }
 0x136   :  { %900 = vmatmul.f32.gmra.mxu0 %v899_v24  ;;  %1891 = vmatmul.f32.gmra.mxu1 %v5641_v55  ;;  %8558 = vst [vmem:[#allocation47_spill] sm:$0xff] %v5655_v36  ;;  %v614_v24 = vsel %vm366_vm0, %v5573_v25, 0  ;;  %v8122_v18 = vand.u32 4294901760, %v5655_v36 }
 0x137   :  { %2147 = vmatmul.f32.gmra.mxu3 %v5613_v59  ;;  %v8109_v57 = vand.u32 4294901760, %v5647_v22  ;;  %v5672_v44 = vand.u32 4294901760, %v614_v24 }
 0x138   :  { %v2084_v46 = vpop.f32.mrf.mxu3  ;;  %v1426_v42 = vsub.f32 %v5655_v36, %v8122_v18 }
 0x139   :  { %v159_v4 = vpop.trf.xlu0  ;;  %v906_v58 = vsub.f32 %v5647_v22, %v8109_v57  ;;  %8561 = vst [vmem:[#allocation50_spill] sm:$0xff] %v5672_v44 }
 0x13a   :  { %v419_v59 = vsel %vm366_vm0, %v159_v4, 0  ;;  %v1427_v1 = vand.u32 4294901760, %v1426_v42 }
 0x13b   :  { %v5666_v20 = vpop.f32.mrf.mxu0  ;;  %v5668_v6 = vand.u32 4294901760, %v419_v59  ;;  %v5670_v3 = vpop.f32.mrf.mxu1  ;;  %v907_v60 = vand.u32 4294901760, %v906_v58  ;;  %v5684_v58 = vsub.f32 %v614_v24, %v5672_v44 }
 0x13c   :  { %8559 = vst [vmem:[#allocation48_spill] sm:$0xff] %v5666_v20  ;;  %v5681_v57 = vpop.trf.xlu2 }
 0x13d   :  { %8560 = vst [vmem:[#allocation49_spill] sm:$0xff] %v5670_v3  ;;  %v5676_v25 = vsub.f32 %v419_v59, %v5668_v6  ;;  %1420 = vmatmul.f32.gmra.mxu2 %v1419_v10 }
 0x13e   :  { %908 = vmatmul.f32.gmra.mxu0 %v907_v60  ;;  %1895 = vmatmul.f32.gmra.mxu1 %v5668_v6  ;;  %8562 = vst [vmem:[#allocation51_spill] sm:$0xff] %v5684_v58  ;;  %v617_v60 = vsel %vm366_vm0, %v5597_v5, 0  ;;  %v8136_v5 = vand.u32 4294901760, %v5684_v58 }
 0x13f   :  { %2151 = vmatmul.f32.gmra.mxu3 %v5643_v28  ;;  %v8129_v4 = vand.u32 4294901760, %v5676_v25  ;;  %v5703_v36 = vand.u32 4294901760, %v617_v60 }
 0x140   :  { %v1293_v40 = vpop.f32.mrf.mxu2  ;;  %v1434_v42 = vsub.f32 %v5684_v58, %v8136_v5 }
 0x141   :  { %v160_v59 = vpop.trf.xlu0  ;;  %v914_v10 = vsub.f32 %v5676_v25, %v8129_v4  ;;  %v5694_v28 = vadd.f32 %v2084_v46, %v1293_v40  ;;  %8567 = vst [vmem:[#allocation56_spill] sm:$0xff] %v5703_v36 }
 0x142   :  { %v2088_v30 = vpop.f32.mrf.mxu3  ;;  %v422_v26 = vsel %vm366_vm0, %v160_v59, 0  ;;  %v5715_v59 = vsub.f32 %v617_v60, %v5703_v36 }
 0x143   :  { %8563 = vst [vmem:[#allocation52_spill] sm:$0xff] %v5694_v28  ;;  %v5697_v24 = vpop.f32.mrf.mxu0  ;;  %v5699_v16 = vand.u32 4294901760, %v422_v26  ;;  %v5701_v12 = vpop.f32.mrf.mxu1  ;;  %v915_v18 = vand.u32 4294901760, %v914_v10 }
 0x144   :  { %8564 = vst [vmem:[#allocation53_spill] sm:$0xff] %v5697_v24  ;;  %v5712_v46 = vpop.trf.xlu2 }
 0x145   :  { %8565 = vst [vmem:[#allocation54_spill] sm:$0xff] %v5699_v16  ;;  %v5707_v61 = vsub.f32 %v422_v26, %v5699_v16  ;;  %1428 = vmatmul.f32.gmra.mxu2 %v1427_v1  ;;  %v620_v1 = vsel %vm366_vm0, %v5625_v35, 0  ;;  %v8142_v35 = vand.u32 4294901760, %v5715_v59 }
 0x146   :  { %8566 = vst [vmem:[#allocation55_spill] sm:$0xff] %v5701_v12  ;;  %916 = vmatmul.f32.gmra.mxu0 %v915_v18  ;;  %1899 = vmatmul.f32.gmra.mxu1 %v5699_v16  ;;  %v5734_v58 = vand.u32 4294901760, %v620_v1  ;;  %v1435_v12 = vand.u32 4294901760, %v1434_v42 }
 0x147   :  { %8568 = vst [vmem:[#allocation57_spill] sm:$0xff] %v5707_v61  ;;  %2155 = vmatmul.f32.gmra.mxu3 %v5672_v44  ;;  %v8139_v40 = vand.u32 4294901760, %v5707_v61  ;;  %v1442_v42 = vsub.f32 %v5715_v59, %v8142_v35 }
 0x148   :  { %8569 = vst [vmem:[#allocation58_spill] sm:$0xff] %v5715_v59  ;;  %v1301_v10 = vpop.f32.mrf.mxu2 }
 0x149   :  { %v161_v26 = vpop.trf.xlu0  ;;  %v922_v18 = vsub.f32 %v5707_v61, %v8139_v40  ;;  %v5725_v4 = vadd.f32 %v2088_v30, %v1301_v10  ;;  %8574 = vst [vmem:[#allocation63_spill] sm:$0xff] %v5734_v58 }
 0x14a   :  { %v2092_v44 = vpop.f32.mrf.mxu3  ;;  %v425_v28 = vsel %vm366_vm0, %v161_v26, 0  ;;  %v5746_v26 = vsub.f32 %v620_v1, %v5734_v58 }
 0x14b   :  { %8570 = vst [vmem:[#allocation59_spill] sm:$0xff] %v5725_v4  ;;  %v5728_v60 = vpop.f32.mrf.mxu0  ;;  %v5730_v50 = vand.u32 4294901760, %v425_v28  ;;  %v5732_v48 = vpop.f32.mrf.mxu1  ;;  %v923_v5 = vand.u32 4294901760, %v922_v18 }
 0x14c   :  { %8571 = vst [vmem:[#allocation60_spill] sm:$0xff] %v5728_v60  ;;  %v5743_v10 = vpop.trf.xlu2 }
 0x14d   :  { %8572 = vst [vmem:[#allocation61_spill] sm:$0xff] %v5730_v50  ;;  %v5738_v3 = vsub.f32 %v425_v28, %v5730_v50  ;;  %1436 = vmatmul.f32.gmra.mxu2 %v1435_v12  ;;  %v623_v12 = vsel %vm366_vm0, %v5652_v11, 0  ;;  %v8150_v11 = vand.u32 4294901760, %v5746_v26 }
 0x14e   :  { %8573 = vst [vmem:[#allocation62_spill] sm:$0xff] %v5732_v48  ;;  %924 = vmatmul.f32.gmra.mxu0 %v923_v5  ;;  %1903 = vmatmul.f32.gmra.mxu1 %v5730_v50  ;;  %v5765_v59 = vand.u32 4294901760, %v623_v12  ;;  %v1443_v50 = vand.u32 4294901760, %v1442_v42 }
 0x14f   :  { %8575 = vst [vmem:[#allocation64_spill] sm:$0xff] %v5738_v3  ;;  %2159 = vmatmul.f32.gmra.mxu3 %v5703_v36  ;;  %v8147_v30 = vand.u32 4294901760, %v5738_v3  ;;  %v1450_v42 = vsub.f32 %v5746_v26, %v8150_v11 }
 0x150   :  { %8576 = vst [vmem:[#allocation65_spill] sm:$0xff] %v5746_v26  ;;  %v1309_v18 = vpop.f32.mrf.mxu2 }
 0x151   :  { %v162_v28 = vpop.trf.xlu0  ;;  %v930_v5 = vsub.f32 %v5738_v3, %v8147_v30  ;;  %v5756_v40 = vadd.f32 %v2092_v44, %v1309_v18  ;;  %8581 = vst [vmem:[#allocation70_spill] sm:$0xff] %v5765_v59 }
 0x152   :  { %v2096_v36 = vpop.f32.mrf.mxu3  ;;  %v428_v4 = vsel %vm366_vm0, %v162_v28, 0  ;;  %v5777_v28 = vsub.f32 %v623_v12, %v5765_v59 }
 0x153   :  { %8577 = vst [vmem:[#allocation66_spill] sm:$0xff] %v5756_v40  ;;  %v5759_v1 = vpop.f32.mrf.mxu0  ;;  %v5761_v48 = vand.u32 4294901760, %v428_v4  ;;  %v5763_v60 = vpop.f32.mrf.mxu1  ;;  %v931_v35 = vand.u32 4294901760, %v930_v5 }
 0x154   :  { %8578 = vst [vmem:[#allocation67_spill] sm:$0xff] %v5759_v1  ;;  %v5774_v18 = vpop.trf.xlu2 }
 0x155   :  { %8579 = vst [vmem:[#allocation68_spill] sm:$0xff] %v5761_v48  ;;  %v5769_v24 = vsub.f32 %v428_v4, %v5761_v48  ;;  %1444 = vmatmul.f32.gmra.mxu2 %v1443_v50  ;;  %v626_v50 = vsel %vm366_vm0, %v5681_v57, 0  ;;  %v8160_v57 = vand.u32 4294901760, %v5777_v28 }
 0x156   :  { %8580 = vst [vmem:[#allocation69_spill] sm:$0xff] %v5763_v60  ;;  %932 = vmatmul.f32.gmra.mxu0 %v931_v35  ;;  %1907 = vmatmul.f32.gmra.mxu1 %v5761_v48  ;;  %v5796_v26 = vand.u32 4294901760, %v626_v50  ;;  %v1451_v48 = vand.u32 4294901760, %v1450_v42 }
 0x157   :  { %8582 = vst [vmem:[#allocation71_spill] sm:$0xff] %v5769_v24  ;;  %2163 = vmatmul.f32.gmra.mxu3 %v5734_v58  ;;  %v8157_v44 = vand.u32 4294901760, %v5769_v24  ;;  %v1458_v42 = vsub.f32 %v5777_v28, %v8160_v57 }
 0x158   :  { %8583 = vst [vmem:[#allocation72_spill] sm:$0xff] %v5777_v28  ;;  %v1317_v5 = vpop.f32.mrf.mxu2 }
 0x159   :  { %v163_v4 = vpop.trf.xlu0  ;;  %v938_v35 = vsub.f32 %v5769_v24, %v8157_v44  ;;  %v5787_v30 = vadd.f32 %v2096_v36, %v1317_v5  ;;  %8588 = vst [vmem:[#allocation77_spill] sm:$0xff] %v5796_v26 }
 0x15a   :  { %v2100_v58 = vpop.f32.mrf.mxu3  ;;  %v431_v40 = vsel %vm366_vm0, %v163_v4, 0  ;;  %v5808_v4 = vsub.f32 %v626_v50, %v5796_v26 }
 0x15b   :  { %8584 = vst [vmem:[#allocation73_spill] sm:$0xff] %v5787_v30  ;;  %v5790_v12 = vpop.f32.mrf.mxu0  ;;  %v5792_v60 = vand.u32 4294901760, %v431_v40  ;;  %v5794_v1 = vpop.f32.mrf.mxu1  ;;  %v939_v11 = vand.u32 4294901760, %v938_v35 }
 0x15c   :  { %8585 = vst [vmem:[#allocation74_spill] sm:$0xff] %v5790_v12  ;;  %v5805_v5 = vpop.trf.xlu2 }
 0x15d   :  { %8586 = vst [vmem:[#allocation75_spill] sm:$0xff] %v5792_v60  ;;  %v5800_v3 = vsub.f32 %v431_v40, %v5792_v60  ;;  %1452 = vmatmul.f32.gmra.mxu2 %v1451_v48  ;;  %v629_v48 = vsel %vm366_vm0, %v5712_v46, 0  ;;  %v8170_v46 = vand.u32 4294901760, %v5808_v4 }
 0x15e   :  { %8587 = vst [vmem:[#allocation76_spill] sm:$0xff] %v5794_v1  ;;  %940 = vmatmul.f32.gmra.mxu0 %v939_v11  ;;  %1911 = vmatmul.f32.gmra.mxu1 %v5792_v60  ;;  %v5827_v28 = vand.u32 4294901760, %v629_v48  ;;  %v1459_v60 = vand.u32 4294901760, %v1458_v42 }
 0x15f   :  { %8589 = vst [vmem:[#allocation78_spill] sm:$0xff] %v5800_v3  ;;  %2167 = vmatmul.f32.gmra.mxu3 %v5765_v59  ;;  %v8167_v36 = vand.u32 4294901760, %v5800_v3  ;;  %v1466_v42 = vsub.f32 %v5808_v4, %v8170_v46 }
 0x160   :  { %8590 = vst [vmem:[#allocation79_spill] sm:$0xff] %v5808_v4  ;;  %v1325_v35 = vpop.f32.mrf.mxu2 }
 0x161   :  { %v164_v40 = vpop.trf.xlu0  ;;  %v946_v11 = vsub.f32 %v5800_v3, %v8167_v36  ;;  %v5818_v44 = vadd.f32 %v2100_v58, %v1325_v35  ;;  %8595 = vst [vmem:[#allocation84_spill] sm:$0xff] %v5827_v28 }
 0x162   :  { %v2104_v59 = vpop.f32.mrf.mxu3  ;;  %v434_v30 = vsel %vm366_vm0, %v164_v40, 0  ;;  %v5839_v40 = vsub.f32 %v629_v48, %v5827_v28 }
 0x163   :  { %8591 = vst [vmem:[#allocation80_spill] sm:$0xff] %v5818_v44  ;;  %v5821_v50 = vpop.f32.mrf.mxu0  ;;  %v5823_v1 = vand.u32 4294901760, %v434_v30  ;;  %v5825_v12 = vpop.f32.mrf.mxu1  ;;  %v947_v57 = vand.u32 4294901760, %v946_v11 }
 0x164   :  { %8592 = vst [vmem:[#allocation81_spill] sm:$0xff] %v5821_v50  ;;  %v5836_v35 = vpop.trf.xlu2  ;;  %v8180_v3 = vand.u32 4294901760, %v5839_v40 }
 0x165   :  { %8593 = vst [vmem:[#allocation82_spill] sm:$0xff] %v5823_v1  ;;  %v5831_v24 = vsub.f32 %v434_v30, %v5823_v1  ;;  %1460 = vmatmul.f32.gmra.mxu2 %v1459_v60  ;;  %v632_v60 = vsel %vm366_vm0, %v5743_v10, 0  ;;  %v1467_v10 = vand.u32 4294901760, %v1466_v42 }
 0x166   :  { %8594 = vst [vmem:[#allocation83_spill] sm:$0xff] %v5825_v12  ;;  %948 = vmatmul.f32.gmra.mxu0 %v947_v57  ;;  %1915 = vmatmul.f32.gmra.mxu1 %v5823_v1  ;;  %v102_v12 = vld [vmem:[#allocation2 + $0x1c0] sm:$0xff]  ;;  %v5858_v1 = vand.u32 4294901760, %v632_v60 }
 0x167   :  { %8596 = vst [vmem:[#allocation85_spill] sm:$0xff] %v5831_v24  ;;  %2171 = vmatmul.f32.gmra.mxu3 %v5796_v26  ;;  %v8177_v58 = vand.u32 4294901760, %v5831_v24  ;;  %334 = vxpose.xlu0.b32.start [1/8] (short) %v102_v12, 128 }
 0x168   :  { %8597 = vst [vmem:[#allocation86_spill] sm:$0xff] %v5839_v40  ;;  %v1333_v11 = vpop.f32.mrf.mxu2  ;;  %v5870_v12 = vsub.f32 %v632_v60, %v5858_v1 }
 0x169   :  { %v165_v30 = vpop.trf.xlu0  ;;  %v954_v57 = vsub.f32 %v5831_v24, %v8177_v58  ;;  %v5849_v36 = vadd.f32 %v2104_v59, %v1333_v11  ;;  %8602 = vst [vmem:[#allocation91_spill] sm:$0xff] %v5858_v1  ;;  %v70_v11 = vld [vmem:[#allocation2 + $0xc0] sm:$0xff] }
 0x16a   :  { %v2108_v26 = vpop.f32.mrf.mxu3  ;;  %v437_v44 = vsel %vm366_vm0, %v165_v30, 0  ;;  %206 = vxpose.xlu1.b32.start [1/8] (short) %v70_v11, 128  ;;  %8604 = vst [vmem:[#allocation93_spill] sm:$0xff] %v5870_v12 }
 0x16b   :  { %8598 = vst [vmem:[#allocation87_spill] sm:$0xff] %v5849_v36  ;;  %v5852_v48 = vpop.f32.mrf.mxu0  ;;  %v5854_v50 = vand.u32 4294901760, %v437_v44  ;;  %v5856_v46 = vpop.f32.mrf.mxu1  ;;  %v955_v4 = vand.u32 4294901760, %v954_v57  ;;  %v635_v57 = vsel %vm366_vm0, %v5774_v18, 0  ;;  %v8190_v18 = vand.u32 4294901760, %v5870_v12 }
 0x16c   :  { %8599 = vst [vmem:[#allocation88_spill] sm:$0xff] %v5852_v48  ;;  %v5867_v58 = vpop.trf.xlu2 }
 0x16d   :  { %8600 = vst [vmem:[#allocation89_spill] sm:$0xff] %v5854_v50  ;;  %v5862_v59 = vsub.f32 %v437_v44, %v5854_v50  ;;  %1468 = vmatmul.f32.gmra.mxu2 %v1467_v10  ;;  %v1474_v44 = vsub.f32 %v5839_v40, %v8180_v3 }
 0x16e   :  { %8601 = vst [vmem:[#allocation90_spill] sm:$0xff] %v5856_v46  ;;  %956 = vmatmul.f32.gmra.mxu0 %v955_v4  ;;  %1919 = vmatmul.f32.gmra.mxu1 %v5854_v50  ;;  %v103_v46 = vld [vmem:[#allocation2 + $0x1c8] sm:$0xff]  ;;  %v5890_v50 = vand.u32 4294901760, %v635_v57 }
 0x16f   :  { %8603 = vst [vmem:[#allocation92_spill] sm:$0xff] %v5862_v59  ;;  %2175 = vmatmul.f32.gmra.mxu3 %v5827_v28  ;;  %v8187_v30 = vand.u32 4294901760, %v5862_v59  ;;  %335 = vxpose.xlu0.b32.cont [2/8] (short) %v103_v46, 128  ;;  %v1475_v24 = vand.u32 4294901760, %v1474_v44  ;;  %v1482_v44 = vsub.f32 %v5870_v12, %v8190_v18 }
 0x170   :  { %v1341_v42 = vpop.f32.mrf.mxu2  ;;  %8609 = vst [vmem:[#allocation98_spill] sm:$0xff] %v5890_v50  ;;  %v5901_v46 = vsub.f32 %v635_v57, %v5890_v50 }
 0x171   :  { %v166_v4 = vpop.trf.xlu0  ;;  %v962_v10 = vsub.f32 %v5862_v59, %v8187_v30  ;;  %v5880_v28 = vadd.f32 %v2108_v26, %v1341_v42  ;;  %v71_v42 = vld [vmem:[#allocation2 + $0xc8] sm:$0xff]  ;;  %v1483_v59 = vand.u32 4294901760, %v1482_v44 }
 0x172   :  { %v2112_v36 = vpop.f32.mrf.mxu3  ;;  %v440_v11 = vsel %vm366_vm0, %v166_v4, 0  ;;  %207 = vxpose.xlu1.b32.cont [2/8] (short) %v71_v42, 128  ;;  %8611 = vst [vmem:[#allocation100_spill] sm:$0xff] %v5901_v46 }
 0x173   :  { %8605 = vst [vmem:[#allocation94_spill] sm:$0xff] %v5880_v28  ;;  %v5883_v60 = vpop.f32.mrf.mxu0  ;;  %v5885_v48 = vand.u32 4294901760, %v440_v11  ;;  %v5887_v3 = vpop.f32.mrf.mxu1  ;;  %v963_v40 = vand.u32 4294901760, %v962_v10 }
 0x174   :  { %8606 = vst [vmem:[#allocation95_spill] sm:$0xff] %v5883_v60  ;;  %v5898_v30 = vpop.trf.xlu2 }
 0x175   :  { %8607 = vst [vmem:[#allocation96_spill] sm:$0xff] %v5885_v48  ;;  %v5893_v26 = vsub.f32 %v440_v11, %v5885_v48  ;;  %1476 = vmatmul.f32.gmra.mxu2 %v1475_v24  ;;  %v638_v24 = vsel %vm366_vm0, %v5805_v5, 0  ;;  %v8200_v5 = vand.u32 4294901760, %v5901_v46 }
 0x176   :  { %8608 = vst [vmem:[#allocation97_spill] sm:$0xff] %v5887_v3  ;;  %964 = vmatmul.f32.gmra.mxu0 %v963_v40  ;;  %1923 = vmatmul.f32.gmra.mxu1 %v5885_v48  ;;  %v104_v3 = vld [vmem:[#allocation2 + $0x1d0] sm:$0xff]  ;;  %v5921_v48 = vand.u32 4294901760, %v638_v24 }
 0x177   :  { %8610 = vst [vmem:[#allocation99_spill] sm:$0xff] %v5893_v26  ;;  %v8197_v4 = vand.u32 4294901760, %v5893_v26  ;;  %2179 = vmatmul.f32.gmra.mxu3 %v5858_v1  ;;  %336 = vxpose.xlu0.b32.cont [3/8] (short) %v104_v3, 128  ;;  %v1490_v44 = vsub.f32 %v5901_v46, %v8200_v5 }
 0x178   :  { %v1349_v10 = vpop.f32.mrf.mxu2  ;;  %8616 = vst [vmem:[#allocation105_spill] sm:$0xff] %v5921_v48  ;;  %v5930_v3 = vsub.f32 %v638_v24, %v5921_v48 }
 0x179   :  { %v167_v40 = vpop.trf.xlu0  ;;  %v970_v11 = vsub.f32 %v5893_v26, %v8197_v4  ;;  %v5911_v1 = vadd.f32 %v2112_v36, %v1349_v10  ;;  %v72_v10 = vld [vmem:[#allocation2 + $0xd0] sm:$0xff]  ;;  %v1491_v26 = vand.u32 4294901760, %v1490_v44 }
 0x17a   :  { %v2116_v28 = vpop.f32.mrf.mxu3  ;;  %v443_v42 = vsel %vm366_vm0, %v167_v40, 0  ;;  %208 = vxpose.xlu1.b32.cont [3/8] (short) %v72_v10, 128  ;;  %8618 = vst [vmem:[#allocation107_spill] sm:$0xff] %v5930_v3 }
 0x17b   :  { %8612 = vst [vmem:[#allocation101_spill] sm:$0xff] %v5911_v1  ;;  %v5914_v57 = vpop.f32.mrf.mxu0  ;;  %v5916_v60 = vand.u32 4294901760, %v443_v42  ;;  %v5918_v18 = vpop.f32.mrf.mxu1  ;;  %v971_v12 = vand.u32 4294901760, %v970_v11 }
 0x17c   :  { %8613 = vst [vmem:[#allocation102_spill] sm:$0xff] %v5914_v57  ;;  %v5935_v11 = vpop.trf.xlu2 }
 0x17d   :  { %8614 = vst [vmem:[#allocation103_spill] sm:$0xff] %v5916_v60  ;;  %v5924_v36 = vsub.f32 %v443_v42, %v5916_v60  ;;  %1484 = vmatmul.f32.gmra.mxu2 %v1483_v59  ;;  %v641_v59 = vsel %vm366_vm0, %v5836_v35, 0  ;;  %v8210_v35 = vand.u32 4294901760, %v5930_v3 }
 0x17e   :  { %8615 = vst [vmem:[#allocation104_spill] sm:$0xff] %v5918_v18  ;;  %972 = vmatmul.f32.gmra.mxu0 %v971_v12  ;;  %1927 = vmatmul.f32.gmra.mxu1 %v5916_v60  ;;  %v105_v18 = vld [vmem:[#allocation2 + $0x1d8] sm:$0xff]  ;;  %v5952_v60 = vand.u32 4294901760, %v641_v59 }
 0x17f   :  { %8617 = vst [vmem:[#allocation106_spill] sm:$0xff] %v5924_v36  ;;  %v8207_v40 = vand.u32 4294901760, %v5924_v36  ;;  %2183 = vmatmul.f32.gmra.mxu3 %v5890_v50  ;;  %337 = vxpose.xlu0.b32.cont [4/8] (short) %v105_v18, 128 }
 0x180   :  { %v1357_v42 = vpop.f32.mrf.mxu2  ;;  %8623 = vst [vmem:[#allocation112_spill] sm:$0xff] %v5952_v60  ;;  %v5961_v18 = vsub.f32 %v641_v59, %v5952_v60 }
 0x181   :  { %v168_v12 = vpop.trf.xlu0  ;;  %v978_v4 = vsub.f32 %v5924_v36, %v8207_v40  ;;  %v5942_v50 = vadd.f32 %v2116_v28, %v1357_v42  ;;  %v73_v42 = vld [vmem:[#allocation2 + $0xd8] sm:$0xff] }
 0x182   :  { %v2120_v10 = vpop.f32.mrf.mxu3  ;;  %v446_v24 = vsel %vm366_vm0, %v168_v12, 0  ;;  %209 = vxpose.xlu1.b32.cont [4/8] (short) %v73_v42, 128  ;;  %8625 = vst [vmem:[#allocation114_spill] sm:$0xff] %v5961_v18 }
 0x183   :  { %8619 = vst [vmem:[#allocation108_spill] sm:$0xff] %v5942_v50  ;;  %v5945_v1 = vpop.f32.mrf.mxu0  ;;  %v5947_v5 = vand.u32 4294901760, %v446_v24  ;;  %v5949_v46 = vpop.f32.mrf.mxu1  ;;  %v979_v57 = vand.u32 4294901760, %v978_v4  ;;  %v1498_v4 = vsub.f32 %v5930_v3, %v8210_v35  ;;  %v106_v50 = vld [vmem:[#allocation2 + $0x1e0] sm:$0xff] }
 0x184   :  { %8620 = vst [vmem:[#allocation109_spill] sm:$0xff] %v5945_v1  ;;  %v5980_v1 = vpop.trf.xlu2 }
 0x185   :  { %8621 = vst [vmem:[#allocation110_spill] sm:$0xff] %v5947_v5  ;;  %v5955_v28 = vsub.f32 %v446_v24, %v5947_v5  ;;  %1492 = vmatmul.f32.gmra.mxu2 %v1491_v26  ;;  %v644_v26 = vsel %vm366_vm0, %v5867_v58, 0  ;;  %v8220_v58 = vand.u32 4294901760, %v5961_v18 }
 0x186   :  { %8622 = vst [vmem:[#allocation111_spill] sm:$0xff] %v5949_v46  ;;  %980 = vmatmul.f32.gmra.mxu0 %v979_v57  ;;  %1931 = vmatmul.f32.gmra.mxu1 %v5947_v5  ;;  %v5983_v5 = vand.u32 4294901760, %v644_v26 }
 0x187   :  { %8624 = vst [vmem:[#allocation113_spill] sm:$0xff] %v5955_v28  ;;  %v8215_v12 = vand.u32 4294901760, %v5955_v28  ;;  %2187 = vmatmul.f32.gmra.mxu3 %v5921_v48  ;;  %338 = vxpose.xlu0.b32.cont [5/8] (short) %v106_v50, 128 }
 0x188   :  { %v1365_v44 = vpop.f32.mrf.mxu2  ;;  %8630 = vst [vmem:[#allocation119_spill] sm:$0xff] %v5983_v5  ;;  %v5994_v50 = vsub.f32 %v644_v26, %v5983_v5 }
 0x189   :  { %v169_v24 = vpop.trf.xlu0  ;;  %v986_v57 = vsub.f32 %v5955_v28, %v8215_v12  ;;  %v5971_v40 = vadd.f32 %v2120_v10, %v1365_v44  ;;  %v1499_v10 = vand.u32 4294901760, %v1498_v4  ;;  %v1506_v4 = vsub.f32 %v5961_v18, %v8220_v58 }
 0x18a   :  { %v2124_v48 = vpop.f32.mrf.mxu3  ;;  %v449_v42 = vsel %vm366_vm0, %v169_v24, 0  ;;  %v74_v24 = vld [vmem:[#allocation2 + $0xe0] sm:$0xff]  ;;  %8632 = vst [vmem:[#allocation121_spill] sm:$0xff] %v5994_v50 }
 0x18b   :  { %8626 = vst [vmem:[#allocation115_spill] sm:$0xff] %v5971_v40  ;;  %v5974_v59 = vpop.f32.mrf.mxu0  ;;  %v5976_v46 = vand.u32 4294901760, %v449_v42  ;;  %v5978_v35 = vpop.f32.mrf.mxu1  ;;  %v987_v3 = vand.u32 4294901760, %v986_v57  ;;  %210 = vxpose.xlu1.b32.cont [5/8] (short) %v74_v24, 128 }
 0x18c   :  { %8627 = vst [vmem:[#allocation116_spill] sm:$0xff] %v5974_v59  ;;  %v5991_v57 = vpop.trf.xlu1  ;;  %v107_v59 = vld [vmem:[#allocation2 + $0x1e8] sm:$0xff] }
 0x18d   :  { %8628 = vst [vmem:[#allocation117_spill] sm:$0xff] %v5976_v46  ;;  %v5986_v44 = vsub.f32 %v449_v42, %v5976_v46  ;;  %1500 = vmatmul.f32.gmra.mxu2 %v1499_v10  ;;  %v647_v10 = vsel %vm366_vm0, %v5898_v30, 0  ;;  %v8232_v30 = vand.u32 4294901760, %v5994_v50 }
 0x18e   :  { %8629 = vst [vmem:[#allocation118_spill] sm:$0xff] %v5978_v35  ;;  %988 = vmatmul.f32.gmra.mxu0 %v987_v3  ;;  %1935 = vmatmul.f32.gmra.mxu1 %v5976_v46  ;;  %v6013_v28 = vpop.trf.xlu2  ;;  %v6016_v36 = vand.u32 4294901760, %v647_v10 }
 0x18f   :  { %8631 = vst [vmem:[#allocation120_spill] sm:$0xff] %v5986_v44  ;;  %v8227_v12 = vand.u32 4294901760, %v5986_v44  ;;  %2191 = vmatmul.f32.gmra.mxu3 %v5952_v60  ;;  %339 = vxpose.xlu0.b32.cont [6/8] (short) %v107_v59, 128 }
 0x190   :  { %v1373_v42 = vpop.f32.mrf.mxu2  ;;  %8637 = vst [vmem:[#allocation126_spill] sm:$0xff] %v6016_v36  ;;  %v6027_v59 = vsub.f32 %v647_v10, %v6016_v36 }
 0x191   :  { %v170_v3 = vpop.trf.xlu0  ;;  %v994_v40 = vsub.f32 %v5986_v44, %v8227_v12  ;;  %v6004_v60 = vadd.f32 %v2124_v48, %v1373_v42  ;;  %v1507_v48 = vand.u32 4294901760, %v1506_v4  ;;  %v75_v42 = vld [vmem:[#allocation2 + $0xe8] sm:$0xff]  ;;  %v1514_v4 = vsub.f32 %v5994_v50, %v8232_v30 }
 0x192   :  { %v2128_v24 = vpop.f32.mrf.mxu3  ;;  %v452_v35 = vsel %vm366_vm0, %v170_v3, 0  ;;  %8639 = vst [vmem:[#allocation128_spill] sm:$0xff] %v6027_v59 }
 0x193   :  { %8633 = vst [vmem:[#allocation122_spill] sm:$0xff] %v6004_v60  ;;  %v6007_v26 = vpop.f32.mrf.mxu0  ;;  %v6009_v46 = vand.u32 4294901760, %v452_v35  ;;  %v6011_v58 = vpop.f32.mrf.mxu1  ;;  %v995_v18 = vand.u32 4294901760, %v994_v40  ;;  %211 = vxpose.xlu1.b32.cont [6/8] (short) %v75_v42, 128 }
 0x194   :  { %8634 = vst [vmem:[#allocation123_spill] sm:$0xff] %v6007_v26  ;;  %v6024_v40 = vpop.trf.xlu1  ;;  %v108_v26 = vld [vmem:[#allocation2 + $0x1f0] sm:$0xff] }
 0x195   :  { %8635 = vst [vmem:[#allocation124_spill] sm:$0xff] %v6009_v46  ;;  %v6019_v12 = vsub.f32 %v452_v35, %v6009_v46  ;;  %1508 = vmatmul.f32.gmra.mxu2 %v1507_v48 }
 0x196   :  { %8636 = vst [vmem:[#allocation125_spill] sm:$0xff] %v6011_v58  ;;  %996 = vmatmul.f32.gmra.mxu0 %v995_v18  ;;  %1939 = vmatmul.f32.gmra.mxu1 %v6009_v46  ;;  %v650_v18 = vsel %vm366_vm0, %v5935_v11, 0  ;;  %v6046_v44 = vpop.trf.xlu2  ;;  %v8244_v11 = vand.u32 4294901760, %v6027_v59 }
 0x197   :  { %8638 = vst [vmem:[#allocation127_spill] sm:$0xff] %v6019_v12  ;;  %v8239_v3 = vand.u32 4294901760, %v6019_v12  ;;  %2195 = vmatmul.f32.gmra.mxu3 %v5983_v5  ;;  %340 = vxpose.xlu0.b32.cont [7/8] (short) %v108_v26, 128  ;;  %v6049_v61 = vand.u32 4294901760, %v650_v18 }
 0x198   :  { %v1381_v35 = vpop.f32.mrf.mxu2 }
 0x199   :  { %v171_v60 = vpop.trf.xlu0  ;;  %v1002_v48 = vsub.f32 %v6019_v12, %v8239_v3  ;;  %v6037_v5 = vadd.f32 %v2128_v24, %v1381_v35  ;;  %8644 = vst [vmem:[#allocation133_spill] sm:$0xff] %v6049_v61  ;;  %v1515_v24 = vand.u32 4294901760, %v1514_v4  ;;  %v76_v35 = vld [vmem:[#allocation2 + $0xf0] sm:$0xff]  ;;  %v6060_v26 = vsub.f32 %v650_v18, %v6049_v61 }
 0x19a   :  { %v2132_v42 = vpop.f32.mrf.mxu3  ;;  %v455_v58 = vsel %vm366_vm0, %v171_v60, 0  ;;  %v1522_v4 = vsub.f32 %v6027_v59, %v8244_v11 }
 0x19b   :  { %8640 = vst [vmem:[#allocation129_spill] sm:$0xff] %v6037_v5  ;;  %v6040_v10 = vpop.f32.mrf.mxu0  ;;  %v6042_v46 = vand.u32 4294901760, %v455_v58  ;;  %v6044_v30 = vpop.f32.mrf.mxu1  ;;  %v1003_v50 = vand.u32 4294901760, %v1002_v48  ;;  %212 = vxpose.xlu1.b32.cont [7/8] (short) %v76_v35, 128 }
 0x19c   :  { %8641 = vst [vmem:[#allocation130_spill] sm:$0xff] %v6040_v10  ;;  %v6057_v48 = vpop.trf.xlu1  ;;  %v109_v10 = vld [vmem:[#allocation2 + $0x1f8] sm:$0xff] }
 0x19d   :  { %8642 = vst [vmem:[#allocation131_spill] sm:$0xff] %v6042_v46  ;;  %v6052_v3 = vsub.f32 %v455_v58, %v6042_v46  ;;  %1516 = vmatmul.f32.gmra.mxu2 %v1515_v24 }
 0x19e   :  { %8643 = vst [vmem:[#allocation132_spill] sm:$0xff] %v6044_v30  ;;  %1004 = vmatmul.f32.gmra.mxu0 %v1003_v50  ;;  %1943 = vmatmul.f32.gmra.mxu1 %v6042_v46  ;;  %v653_v50 = vsel %vm366_vm0, %v5980_v1, 0  ;;  %v6079_v12 = vpop.trf.xlu2  ;;  %v8256_v1 = vand.u32 4294901760, %v6060_v26 }
 0x19f   :  { %8645 = vst [vmem:[#allocation134_spill] sm:$0xff] %v6052_v3  ;;  %v8251_v60 = vand.u32 4294901760, %v6052_v3  ;;  %2199 = vmatmul.f32.gmra.mxu3 %v6016_v36  ;;  %341 = vxpose.xlu0.b32.end [8/8] (short) %v109_v10, 128  ;;  %v6082_v16 = vand.u32 4294901760, %v653_v50 }
 0x1a0   :  { %8646 = vst [vmem:[#allocation135_spill] sm:$0xff] %v6060_v26  ;;  %v1389_v58 = vpop.f32.mrf.mxu2 }
 0x1a1   :  { %v172_v5 = vpop.trf.xlu0  ;;  %v1010_v24 = vsub.f32 %v6052_v3, %v8251_v60  ;;  %v6070_v36 = vadd.f32 %v2132_v42, %v1389_v58  ;;  %8651 = vst [vmem:[#allocation140_spill] sm:$0xff] %v6082_v16  ;;  %v1523_v42 = vand.u32 4294901760, %v1522_v4  ;;  %v77_v58 = vld [vmem:[#allocation2 + $0xf8] sm:$0xff]  ;;  %v6095_v4 = vsub.f32 %v653_v50, %v6082_v16 }
 0x1a2   :  { %v2136_v35 = vpop.f32.mrf.mxu3  ;;  %v458_v30 = vsel %vm366_vm0, %v172_v5, 0  ;;  %v464_v5 = vsel %vm366_vm0, %v6013_v28, 0 }
 0x1a3   :  { %8647 = vst [vmem:[#allocation136_spill] sm:$0xff] %v6070_v36  ;;  %v6073_v18 = vpop.f32.mrf.mxu0  ;;  %v6075_v46 = vand.u32 4294901760, %v458_v30  ;;  %v6077_v11 = vpop.f32.mrf.mxu1  ;;  %v1011_v59 = vand.u32 4294901760, %v1010_v24  ;;  %213 = vxpose.xlu1.b32.end [8/8] (short) %v77_v58, 128  ;;  %v656_v36 = vsel %vm366_vm0, %v5991_v57, 0  ;;  %v8266_v57 = vand.u32 4294901760, %v6095_v4 }
 0x1a4   :  { %8648 = vst [vmem:[#allocation137_spill] sm:$0xff] %v6073_v18  ;;  %v6092_v10 = vpop.trf.xlu1  ;;  %v6117_v38 = vand.u32 4294901760, %v656_v36 }
 0x1a5   :  { %8649 = vst [vmem:[#allocation138_spill] sm:$0xff] %v6075_v46  ;;  %v6085_v60 = vsub.f32 %v458_v30, %v6075_v46  ;;  %1524 = vmatmul.f32.gmra.mxu2 %v1523_v42  ;;  %v1530_v30 = vsub.f32 %v6060_v26, %v8256_v1 }
 0x1a6   :  { %8650 = vst [vmem:[#allocation139_spill] sm:$0xff] %v6077_v11  ;;  %1012 = vmatmul.f32.gmra.mxu0 %v1011_v59  ;;  %1947 = vmatmul.f32.gmra.mxu1 %v6075_v46  ;;  %v193_v3 = vpop.trf.xlu2 }
 0x1a7   :  { %8652 = vst [vmem:[#allocation141_spill] sm:$0xff] %v6085_v60  ;;  %v8261_v24 = vand.u32 4294901760, %v6085_v60  ;;  %2203 = vmatmul.f32.gmra.mxu3 %v6049_v61  ;;  %v6105_v61 = vand.u32 4294901760, %v464_v5 }
 0x1a8   :  { %8653 = vst [vmem:[#allocation142_spill] sm:$0xff] %v6095_v4  ;;  %v1397_v59 = vpop.f32.mrf.mxu2 }
 0x1a9   :  { %v173_v42 = vpop.trf.xlu0  ;;  %v1018_v28 = vsub.f32 %v6085_v60, %v8261_v24  ;;  %8654 = vst [vmem:[#allocation143_spill] sm:$0xff] %v6105_v61  ;;  %v6107_v58 = vadd.f32 %v2136_v35, %v1397_v59  ;;  %v1531_v24 = vand.u32 4294901760, %v1530_v30  ;;  %v6123_v35 = vsub.f32 %v464_v5, %v6105_v61 }
 0x1aa   :  { %v2140_v11 = vpop.f32.mrf.mxu3  ;;  %v461_v50 = vsel %vm366_vm0, %v173_v42, 0  ;;  %8659 = vst [vmem:[#allocation148_spill] sm:$0xff] %v6117_v38  ;;  %v467_v59 = vsel %vm366_vm0, %v6046_v44, 0  ;;  %v6133_v30 = vsub.f32 %v656_v36, %v6117_v38 }
 0x1ab   :  { %8655 = vst [vmem:[#allocation144_spill] sm:$0xff] %v6107_v58  ;;  %v6110_v18 = vpop.f32.mrf.mxu0  ;;  %v6112_v46 = vand.u32 4294901760, %v461_v50  ;;  %v6114_v1 = vpop.f32.mrf.mxu1  ;;  %v1019_v26 = vand.u32 4294901760, %v1018_v28 }
 0x1ac   :  { %8656 = vst [vmem:[#allocation145_spill] sm:$0xff] %v6110_v18  ;;  %v6130_v28 = vpop.trf.xlu1 }
 0x1ad   :  { %8657 = vst [vmem:[#allocation146_spill] sm:$0xff] %v6112_v46  ;;  %v6120_v60 = vsub.f32 %v461_v50, %v6112_v46  ;;  %1532 = vmatmul.f32.gmra.mxu2 %v1531_v24  ;;  %v659_v50 = vsel %vm366_vm0, %v6024_v40, 0  ;;  %v8278_v24 = vand.u32 4294901760, %v6133_v30 }
 0x1ae   :  { %8658 = vst [vmem:[#allocation147_spill] sm:$0xff] %v6114_v1  ;;  %1020 = vmatmul.f32.gmra.mxu0 %v1019_v26  ;;  %1951 = vmatmul.f32.gmra.mxu1 %v6112_v46  ;;  %v1538_v26 = vsub.f32 %v6095_v4, %v8266_v57  ;;  %v194_v4 = vpop.trf.xlu2  ;;  %v6153_v46 = vand.u32 4294901760, %v659_v50 }
 0x1af   :  { %8660 = vst [vmem:[#allocation149_spill] sm:$0xff] %v6123_v35  ;;  %v8271_v42 = vand.u32 4294901760, %v6120_v60  ;;  %2207 = vmatmul.f32.gmra.mxu3 %v6082_v16  ;;  %v6144_v16 = vand.u32 4294901760, %v467_v59 }
 0x1b0   :  { %8661 = vst [vmem:[#allocation150_spill] sm:$0xff] %v6133_v30  ;;  %v1405_v5 = vpop.f32.mrf.mxu2  ;;  %v1539_v40 = vand.u32 4294901760, %v1538_v26  ;;  %v6168_v26 = vsub.f32 %v659_v50, %v6153_v46 }
 0x1b1   :  { %v1026_v44 = vsub.f32 %v6120_v60, %v8271_v42  ;;  %8662 = vst [vmem:[#allocation151_spill] sm:$0xff] %v6144_v16  ;;  %v6146_v58 = vadd.f32 %v2140_v11, %v1405_v5  ;;  %v6156_v20 = vsub.f32 %v467_v59, %v6144_v16  ;;  %v8668_v42 = vand.u32 4294901760, %v6123_v35 }
 0x1b2   :  { %v2144_v36 = vpop.f32.mrf.mxu3  ;;  %8666 = vst [vmem:[#allocation155_spill] sm:$0xff] %v6153_v46  ;;  %v470_v5 = vsel %vm366_vm0, %v6079_v12, 0 }
 0x1b3   :  { %8663 = vst [vmem:[#allocation152_spill] sm:$0xff] %v6146_v58  ;;  %v6148_v1 = vpop.f32.mrf.mxu0  ;;  %v6150_v18 = vpop.f32.mrf.mxu1  ;;  %v1027_v57 = vand.u32 4294901760, %v1026_v44  ;;  %v1034_v11 = vsub.f32 %v6123_v35, %v8668_v42 }
 0x1b4   :  { %8664 = vst [vmem:[#allocation153_spill] sm:$0xff] %v6148_v1  ;;  %v6165_v44 = vpop.trf.xlu1 }
 0x1b5   :  { %8665 = vst [vmem:[#allocation154_spill] sm:$0xff] %v6150_v18  ;;  %1540 = vmatmul.f32.gmra.mxu2 %v1539_v40  ;;  %v662_v40 = vsel %vm366_vm0, %v6057_v48, 0  ;;  %v1035_v58 = vand.u32 4294901760, %v1034_v11  ;;  %v6176_v18 = vand.u32 4294901760, %v470_v5  ;;  %v8676_v48 = vand.u32 4294901760, %v6156_v20 }
 0x1b6   :  { %1028 = vmatmul.f32.gmra.mxu0 %v1027_v57  ;;  %8667 = vst [vmem:[#allocation156_spill] sm:$0xff] %v6156_v20  ;;  %1955 = vmatmul.f32.gmra.mxu1 %v6105_v61  ;;  %v1546_v57 = vsub.f32 %v6133_v30, %v8278_v24  ;;  %v195_v35 = vpop.trf.xlu2  ;;  %v6185_v24 = vand.u32 4294901760, %v662_v40  ;;  %v473_v11 = vsel %vm366_vm0, %v193_v3, 0 }
 0x1b7   :  { %2211 = vmatmul.f32.gmra.mxu3 %v6117_v38  ;;  %8669 = vst [vmem:[#allocation157_spill] sm:$0xff] %v6168_v26  ;;  %v6188_v42 = vsub.f32 %v470_v5, %v6176_v18 }
 0x1b8   :  { %v1413_v59 = vpop.f32.mrf.mxu2  ;;  %8670 = vst [vmem:[#allocation158_spill] sm:$0xff] %v6176_v18  ;;  %v1547_v30 = vand.u32 4294901760, %v1546_v57  ;;  %v6199_v61 = vsub.f32 %v662_v40, %v6185_v24 }
 0x1b9   :  { %v6178_v12 = vadd.f32 %v2144_v36, %v1413_v59  ;;  %8674 = vst [vmem:[#allocation162_spill] sm:$0xff] %v6185_v24  ;;  %v1042_v36 = vsub.f32 %v6156_v20, %v8676_v48 }
 0x1ba   :  { %v2148_v38 = vpop.f32.mrf.mxu3  ;;  %8675 = vst [vmem:[#allocation163_spill] sm:$0xff] %v6188_v42 }
 0x1bb   :  { %8671 = vst [vmem:[#allocation159_spill] sm:$0xff] %v6178_v12  ;;  %v6180_v1 = vpop.f32.mrf.mxu0  ;;  %v6182_v50 = vpop.f32.mrf.mxu1  ;;  %v1043_v48 = vand.u32 4294901760, %v1042_v36  ;;  %v476_v36 = vsel %vm366_vm0, %v194_v4, 0 }
 0x1bc   :  { %8672 = vst [vmem:[#allocation160_spill] sm:$0xff] %v6180_v1  ;;  %v6196_v59 = vpop.trf.xlu1 }
 0x1bd   :  { %8673 = vst [vmem:[#allocation161_spill] sm:$0xff] %v6182_v50  ;;  %1548 = vmatmul.f32.gmra.mxu2 %v1547_v30  ;;  %v665_v30 = vsel %vm366_vm0, %v6092_v10, 0  ;;  %v6207_v50 = vand.u32 4294901760, %v473_v11  ;;  %v8685_v10 = vand.u32 4294901760, %v6188_v42 }
 0x1be   :  { %1036 = vmatmul.f32.gmra.mxu0 %v1035_v58  ;;  %1959 = vmatmul.f32.gmra.mxu1 %v6144_v16  ;;  %8677 = vst [vmem:[#allocation164_spill] sm:$0xff] %v6199_v61  ;;  %v8678_v58 = vand.u32 4294901760, %v6168_v26  ;;  %v196_v20 = vpop.trf.xlu2 }
 0x1bf   :  { %2215 = vmatmul.f32.gmra.mxu3 %v6153_v46  ;;  %8679 = vst [vmem:[#allocation165_spill] sm:$0xff] %v6207_v50  ;;  %v6219_v12 = vsub.f32 %v473_v11, %v6207_v50 }
 0x1c0   :  { %v1554_v5 = vsub.f32 %v6168_v26, %v8678_v58  ;;  %v1421_v57 = vpop.f32.mrf.mxu2  ;;  %v6216_v58 = vand.u32 4294901760, %v665_v30 }
 0x1c1   :  { %v6209_v3 = vadd.f32 %v2148_v38, %v1421_v57  ;;  %8684 = vst [vmem:[#allocation170_spill] sm:$0xff] %v6219_v12  ;;  %v1050_v38 = vsub.f32 %v6188_v42, %v8685_v10 }
 0x1c2   :  { %v2152_v46 = vpop.f32.mrf.mxu3  ;;  %8683 = vst [vmem:[#allocation169_spill] sm:$0xff] %v6216_v58  ;;  %v1555_v26 = vand.u32 4294901760, %v1554_v5  ;;  %v6230_v16 = vsub.f32 %v665_v30, %v6216_v58  ;;  %v8687_v5 = vand.u32 4294901760, %v6199_v61 }
 0x1c3   :  { %8680 = vst [vmem:[#allocation166_spill] sm:$0xff] %v6209_v3  ;;  %v6211_v1 = vpop.f32.mrf.mxu0  ;;  %v6213_v40 = vpop.f32.mrf.mxu1  ;;  %v1051_v10 = vand.u32 4294901760, %v1050_v38  ;;  %v479_v38 = vsel %vm366_vm0, %v195_v35, 0 }
 0x1c4   :  { %8681 = vst [vmem:[#allocation167_spill] sm:$0xff] %v6211_v1  ;;  %v6227_v57 = vpop.trf.xlu1  ;;  %v1562_v11 = vsub.f32 %v6199_v61, %v8687_v5 }
 0x1c5   :  { %8682 = vst [vmem:[#allocation168_spill] sm:$0xff] %v6213_v40  ;;  %1556 = vmatmul.f32.gmra.mxu2 %v1555_v26  ;;  %v668_v26 = vsel %vm366_vm0, %v6130_v28, 0  ;;  %v6238_v40 = vand.u32 4294901760, %v476_v36  ;;  %v8694_v28 = vand.u32 4294901760, %v6219_v12 }
 0x1c6   :  { %1044 = vmatmul.f32.gmra.mxu0 %v1043_v48  ;;  %1963 = vmatmul.f32.gmra.mxu1 %v6176_v18  ;;  %8686 = vst [vmem:[#allocation171_spill] sm:$0xff] %v6230_v16  ;;  %v197_v42 = vpop.trf.xlu2  ;;  %v6247_v5 = vand.u32 4294901760, %v668_v26  ;;  %v1563_v61 = vand.u32 4294901760, %v1562_v11  ;;  %v8696_v11 = vand.u32 4294901760, %v6230_v16 }
 0x1c7   :  { %2219 = vmatmul.f32.gmra.mxu3 %v6185_v24  ;;  %8688 = vst [vmem:[#allocation172_spill] sm:$0xff] %v6238_v40  ;;  %v6250_v3 = vsub.f32 %v476_v36, %v6238_v40 }
 0x1c8   :  { %v1429_v48 = vpop.f32.mrf.mxu2  ;;  %8692 = vst [vmem:[#allocation176_spill] sm:$0xff] %v6247_v5  ;;  %v6261_v18 = vsub.f32 %v668_v26, %v6247_v5  ;;  %v1570_v36 = vsub.f32 %v6230_v16, %v8696_v11 }
 0x1c9   :  { %v6240_v4 = vadd.f32 %v2152_v46, %v1429_v48  ;;  %8693 = vst [vmem:[#allocation177_spill] sm:$0xff] %v6250_v3  ;;  %v1058_v46 = vsub.f32 %v6219_v12, %v8694_v28 }
 0x1ca   :  { %v2156_v24 = vpop.f32.mrf.mxu3  ;;  %8695 = vst [vmem:[#allocation178_spill] sm:$0xff] %v6261_v18  ;;  %v1571_v16 = vand.u32 4294901760, %v1570_v36  ;;  %v8705_v36 = vand.u32 4294901760, %v6261_v18 }
 0x1cb   :  { %8689 = vst [vmem:[#allocation173_spill] sm:$0xff] %v6240_v4  ;;  %v6242_v1 = vpop.f32.mrf.mxu0  ;;  %v6244_v30 = vpop.f32.mrf.mxu1  ;;  %v1059_v28 = vand.u32 4294901760, %v1058_v46  ;;  %v482_v46 = vsel %vm366_vm0, %v196_v20, 0 }
 0x1cc   :  { %8690 = vst [vmem:[#allocation174_spill] sm:$0xff] %v6242_v1  ;;  %v6258_v48 = vpop.trf.xlu1 }
 0x1cd   :  { %8691 = vst [vmem:[#allocation175_spill] sm:$0xff] %v6244_v30  ;;  %1564 = vmatmul.f32.gmra.mxu2 %v1563_v61  ;;  %v671_v61 = vsel %vm366_vm0, %v6165_v44, 0  ;;  %v6269_v30 = vand.u32 4294901760, %v479_v38  ;;  %v8703_v44 = vand.u32 4294901760, %v6250_v3 }
 0x1ce   :  { %1052 = vmatmul.f32.gmra.mxu0 %v1051_v10  ;;  %1967 = vmatmul.f32.gmra.mxu1 %v6207_v50  ;;  %v198_v12 = vpop.trf.xlu2  ;;  %v6278_v11 = vand.u32 4294901760, %v671_v61 }
 0x1cf   :  { %2223 = vmatmul.f32.gmra.mxu3 %v6216_v58  ;;  %8697 = vst [vmem:[#allocation179_spill] sm:$0xff] %v6269_v30  ;;  %v6281_v4 = vsub.f32 %v479_v38, %v6269_v30  ;;  %v1578_v38 = vsub.f32 %v6261_v18, %v8705_v36 }
 0x1d0   :  { %v1437_v10 = vpop.f32.mrf.mxu2  ;;  %8701 = vst [vmem:[#allocation183_spill] sm:$0xff] %v6278_v11  ;;  %v6292_v50 = vsub.f32 %v671_v61, %v6278_v11 }
 0x1d1   :  { %v6271_v35 = vadd.f32 %v2156_v24, %v1437_v10  ;;  %8702 = vst [vmem:[#allocation184_spill] sm:$0xff] %v6281_v4  ;;  %v1066_v24 = vsub.f32 %v6250_v3, %v8703_v44  ;;  %v1579_v36 = vand.u32 4294901760, %v1578_v38 }
 0x1d2   :  { %v2160_v58 = vpop.f32.mrf.mxu3  ;;  %8704 = vst [vmem:[#allocation185_spill] sm:$0xff] %v6292_v50 }
 0x1d3   :  { %8698 = vst [vmem:[#allocation180_spill] sm:$0xff] %v6271_v35  ;;  %v6273_v1 = vpop.f32.mrf.mxu0  ;;  %v6275_v26 = vpop.f32.mrf.mxu1  ;;  %v1067_v44 = vand.u32 4294901760, %v1066_v24 }
 0x1d4   :  { %8699 = vst [vmem:[#allocation181_spill] sm:$0xff] %v6273_v1  ;;  %v6289_v10 = vpop.trf.xlu1 }
 0x1d5   :  { %8700 = vst [vmem:[#allocation182_spill] sm:$0xff] %v6275_v26  ;;  %1572 = vmatmul.f32.gmra.mxu2 %v1571_v16  ;;  %v674_v16 = vsel %vm366_vm0, %v6196_v59, 0  ;;  %v6300_v26 = vand.u32 4294901760, %v482_v46  ;;  %v8712_v59 = vand.u32 4294901760, %v6281_v4 }
 0x1d6   :  { %1060 = vmatmul.f32.gmra.mxu0 %v1059_v28  ;;  %1971 = vmatmul.f32.gmra.mxu1 %v6238_v40  ;;  %v6309_v40 = vand.u32 4294901760, %v674_v16 }
 0x1d7   :  { %2227 = vmatmul.f32.gmra.mxu3 %v6247_v5  ;;  %8706 = vst [vmem:[#allocation186_spill] sm:$0xff] %v6300_v26  ;;  %v6312_v35 = vsub.f32 %v482_v46, %v6300_v26  ;;  %v1074_v24 = vsub.f32 %v6281_v4, %v8712_v59  ;;  %v8714_v46 = vand.u32 4294901760, %v6292_v50 }
 0x1d8   :  { %v1445_v28 = vpop.f32.mrf.mxu2  ;;  %8710 = vst [vmem:[#allocation190_spill] sm:$0xff] %v6309_v40  ;;  %v6323_v38 = vsub.f32 %v674_v16, %v6309_v40 }
 0x1d9   :  { %v6302_v20 = vadd.f32 %v2160_v58, %v1445_v28  ;;  %8711 = vst [vmem:[#allocation191_spill] sm:$0xff] %v6312_v35  ;;  %v199_v58 = vpop.trf.xlu2  ;;  %v485_v28 = vsel %vm366_vm0, %v197_v42, 0  ;;  %v1075_v18 = vand.u32 4294901760, %v1074_v24 }
 0x1da   :  { %v2164_v5 = vpop.f32.mrf.mxu3  ;;  %8713 = vst [vmem:[#allocation192_spill] sm:$0xff] %v6323_v38 }
 0x1db   :  { %8707 = vst [vmem:[#allocation187_spill] sm:$0xff] %v6302_v20  ;;  %v6304_v1 = vpop.f32.mrf.mxu0  ;;  %v6306_v61 = vpop.f32.mrf.mxu1 }
 0x1dc   :  { %8708 = vst [vmem:[#allocation188_spill] sm:$0xff] %v6304_v1  ;;  %v6320_v3 = vpop.trf.xlu1 }
 0x1dd   :  { %8709 = vst [vmem:[#allocation189_spill] sm:$0xff] %v6306_v61  ;;  %1580 = vmatmul.f32.gmra.mxu2 %v1579_v36  ;;  %v677_v36 = vsel %vm366_vm0, %v6227_v57, 0  ;;  %v6331_v61 = vand.u32 4294901760, %v485_v28  ;;  %v8721_v57 = vand.u32 4294901760, %v6312_v35 }
 0x1de   :  { %1068 = vmatmul.f32.gmra.mxu0 %v1067_v44  ;;  %1975 = vmatmul.f32.gmra.mxu1 %v6269_v30  ;;  %v1586_v44 = vsub.f32 %v6292_v50, %v8714_v46  ;;  %v6340_v30 = vand.u32 4294901760, %v677_v36 }
 0x1df   :  { %2231 = vmatmul.f32.gmra.mxu3 %v6278_v11  ;;  %8715 = vst [vmem:[#allocation193_spill] sm:$0xff] %v6331_v61  ;;  %v6343_v59 = vsub.f32 %v485_v28, %v6331_v61  ;;  %v1082_v24 = vsub.f32 %v6312_v35, %v8721_v57 }
 0x1e0   :  { %v1453_v20 = vpop.f32.mrf.mxu2  ;;  %8719 = vst [vmem:[#allocation197_spill] sm:$0xff] %v6340_v30  ;;  %v1587_v46 = vand.u32 4294901760, %v1586_v44  ;;  %v6354_v44 = vsub.f32 %v677_v36, %v6340_v30 }
 0x1e1   :  { %v6333_v42 = vadd.f32 %v2164_v5, %v1453_v20  ;;  %8720 = vst [vmem:[#allocation198_spill] sm:$0xff] %v6343_v59  ;;  %v488_v5 = vsel %vm366_vm0, %v198_v12, 0  ;;  %v200_v20 = vpop.trf.xlu2  ;;  %v1083_v50 = vand.u32 4294901760, %v1082_v24 }
 0x1e2   :  { %v2168_v11 = vpop.f32.mrf.mxu3  ;;  %8722 = vst [vmem:[#allocation199_spill] sm:$0xff] %v6354_v44  ;;  %v6362_v12 = vand.u32 4294901760, %v488_v5 }
 0x1e3   :  { %8716 = vst [vmem:[#allocation194_spill] sm:$0xff] %v6333_v42  ;;  %v6335_v1 = vpop.f32.mrf.mxu0  ;;  %v6337_v16 = vpop.f32.mrf.mxu1 }
 0x1e4   :  { %8717 = vst [vmem:[#allocation195_spill] sm:$0xff] %v6335_v1  ;;  %v6351_v4 = vpop.trf.xlu1  ;;  %v6374_v57 = vsub.f32 %v488_v5, %v6362_v12 }
 0x1e5   :  { %8718 = vst [vmem:[#allocation196_spill] sm:$0xff] %v6337_v16  ;;  %1588 = vmatmul.f32.gmra.mxu2 %v1587_v46  ;;  %v680_v46 = vsel %vm366_vm0, %v6258_v48, 0  ;;  %v8730_v48 = vand.u32 4294901760, %v6343_v59 }
 0x1e6   :  { %1076 = vmatmul.f32.gmra.mxu0 %v1075_v18  ;;  %1979 = vmatmul.f32.gmra.mxu1 %v6300_v26  ;;  %v8723_v18 = vand.u32 4294901760, %v6323_v38  ;;  %8724 = vst [vmem:[#allocation200_spill] sm:$0xff] %v6362_v12  ;;  %v6371_v26 = vand.u32 4294901760, %v680_v46 }
 0x1e7   :  { %2235 = vmatmul.f32.gmra.mxu3 %v6309_v40  ;;  %8729 = vst [vmem:[#allocation205_spill] sm:$0xff] %v6374_v57  ;;  %v1090_v24 = vsub.f32 %v6343_v59, %v8730_v48 }
 0x1e8   :  { %v1594_v28 = vsub.f32 %v6323_v38, %v8723_v18  ;;  %v1461_v42 = vpop.f32.mrf.mxu2  ;;  %8728 = vst [vmem:[#allocation204_spill] sm:$0xff] %v6371_v26  ;;  %v6385_v35 = vsub.f32 %v680_v46, %v6371_v26 }
 0x1e9   :  { %v6364_v40 = vadd.f32 %v2168_v11, %v1461_v42  ;;  %v491_v11 = vsel %vm366_vm0, %v199_v58, 0  ;;  %v1091_v48 = vand.u32 4294901760, %v1090_v24  ;;  %v201_v58 = vpop.trf.xlu2 }
 0x1ea   :  { %v2172_v16 = vpop.f32.mrf.mxu3  ;;  %v1595_v18 = vand.u32 4294901760, %v1594_v28  ;;  %8731 = vst [vmem:[#allocation206_spill] sm:$0xff] %v6385_v35  ;;  %v6393_v38 = vand.u32 4294901760, %v491_v11 }
 0x1eb   :  { %8725 = vst [vmem:[#allocation201_spill] sm:$0xff] %v6364_v40  ;;  %v6366_v1 = vpop.f32.mrf.mxu0  ;;  %v6368_v36 = vpop.f32.mrf.mxu1 }
 0x1ec   :  { %8726 = vst [vmem:[#allocation202_spill] sm:$0xff] %v6366_v1  ;;  %v6382_v42 = vpop.trf.xlu1  ;;  %v6405_v40 = vsub.f32 %v491_v11, %v6393_v38 }
 0x1ed   :  { %8727 = vst [vmem:[#allocation203_spill] sm:$0xff] %v6368_v36  ;;  %1596 = vmatmul.f32.gmra.mxu2 %v1595_v18  ;;  %v683_v18 = vsel %vm366_vm0, %v6289_v10, 0  ;;  %v8739_v10 = vand.u32 4294901760, %v6374_v57 }
 0x1ee   :  { %1084 = vmatmul.f32.gmra.mxu0 %v1083_v50  ;;  %1983 = vmatmul.f32.gmra.mxu1 %v6331_v61  ;;  %v8732_v50 = vand.u32 4294901760, %v6354_v44  ;;  %8733 = vst [vmem:[#allocation207_spill] sm:$0xff] %v6393_v38 }
 0x1ef   :  { %2239 = vmatmul.f32.gmra.mxu3 %v6340_v30  ;;  %8738 = vst [vmem:[#allocation212_spill] sm:$0xff] %v6405_v40  ;;  %v1098_v24 = vsub.f32 %v6374_v57, %v8739_v10 }
 0x1f0   :  { %v1602_v5 = vsub.f32 %v6354_v44, %v8732_v50  ;;  %v1469_v28 = vpop.f32.mrf.mxu2  ;;  %v6402_v50 = vand.u32 4294901760, %v683_v18 }
 0x1f1   :  { %v6395_v30 = vadd.f32 %v2172_v16, %v1469_v28  ;;  %v494_v16 = vsel %vm366_vm0, %v200_v20, 0  ;;  %v1099_v10 = vand.u32 4294901760, %v1098_v24  ;;  %v202_v57 = vpop.trf.xlu2  ;;  %v497_v24 = vsel %vm366_vm0, %v201_v58, 0 }
 0x1f2   :  { %v2176_v36 = vpop.f32.mrf.mxu3  ;;  %8737 = vst [vmem:[#allocation211_spill] sm:$0xff] %v6402_v50  ;;  %v1603_v44 = vand.u32 4294901760, %v1602_v5  ;;  %v6416_v59 = vsub.f32 %v683_v18, %v6402_v50  ;;  %v8741_v5 = vand.u32 4294901760, %v6385_v35 }
 0x1f3   :  { %8734 = vst [vmem:[#allocation208_spill] sm:$0xff] %v6395_v30  ;;  %v6397_v1 = vpop.f32.mrf.mxu0  ;;  %v6399_v46 = vpop.f32.mrf.mxu1 }
 0x1f4   :  { %8735 = vst [vmem:[#allocation209_spill] sm:$0xff] %v6397_v1  ;;  %v6413_v28 = vpop.trf.xlu1  ;;  %v1610_v11 = vsub.f32 %v6385_v35, %v8741_v5 }
 0x1f5   :  { %8736 = vst [vmem:[#allocation210_spill] sm:$0xff] %v6399_v46  ;;  %1604 = vmatmul.f32.gmra.mxu2 %v1603_v44  ;;  %v686_v44 = vsel %vm366_vm0, %v6320_v3, 0  ;;  %v6424_v46 = vand.u32 4294901760, %v494_v16  ;;  %v8748_v3 = vand.u32 4294901760, %v6405_v40 }
 0x1f6   :  { %1092 = vmatmul.f32.gmra.mxu0 %v1091_v48  ;;  %1987 = vmatmul.f32.gmra.mxu1 %v6362_v12  ;;  %8740 = vst [vmem:[#allocation213_spill] sm:$0xff] %v6416_v59  ;;  %v8345_v12 = vand.u32 4294901760, %v6416_v59  ;;  %v6433_v5 = vand.u32 4294901760, %v686_v44  ;;  %v1611_v35 = vand.u32 4294901760, %v1610_v11 }
 0x1f7   :  { %2243 = vmatmul.f32.gmra.mxu3 %v6371_v26  ;;  %8742 = vst [vmem:[#allocation214_spill] sm:$0xff] %v6424_v46  ;;  %v6436_v30 = vsub.f32 %v494_v16, %v6424_v46 }
 0x1f8   :  { %v1477_v48 = vpop.f32.mrf.mxu2  ;;  %8746 = vst [vmem:[#allocation218_spill] sm:$0xff] %v6433_v5  ;;  %v1618_v11 = vsub.f32 %v6416_v59, %v8345_v12 }
 0x1f9   :  { %v6426_v20 = vadd.f32 %v2176_v36, %v1477_v48  ;;  %8747 = vst [vmem:[#allocation219_spill] sm:$0xff] %v6436_v30  ;;  %v1106_v36 = vsub.f32 %v6405_v40, %v8748_v3  ;;  %v6445_v48 = vsub.f32 %v686_v44, %v6433_v5  ;;  %v689_v3 = vsel %vm366_vm0, %v6351_v4, 0 }
 0x1fa   :  { %v2180_v26 = vpop.f32.mrf.mxu3  ;;  %v6464_v59 = vand.u32 4294901760, %v689_v3 }
 0x1fb   :  { %8743 = vst [vmem:[#allocation215_spill] sm:$0xff] %v6426_v20  ;;  %v6428_v1 = vpop.f32.mrf.mxu0  ;;  %v6430_v18 = vpop.f32.mrf.mxu1  ;;  %v6453_v20 = vand.u32 4294901760, %v497_v24 }
 0x1fc   :  { %8744 = vst [vmem:[#allocation216_spill] sm:$0xff] %v6428_v1  ;;  %v6476_v12 = vsub.f32 %v689_v3, %v6464_v59 }
 0x1fd   :  { %8745 = vst [vmem:[#allocation217_spill] sm:$0xff] %v6430_v18  ;;  %1612 = vmatmul.f32.gmra.mxu2 %v1611_v35  ;;  %v1107_v35 = vand.u32 4294901760, %v1106_v36  ;;  %v6455_v18 = vpop.trf.xlu1  ;;  %v6467_v4 = vsub.f32 %v497_v24, %v6453_v20  ;;  %v8756_v36 = vand.u32 4294901760, %v6436_v30 }
 0x1fe   :  { %1100 = vmatmul.f32.gmra.mxu0 %v1099_v10  ;;  %1991 = vmatmul.f32.gmra.mxu1 %v6393_v38  ;;  %8749 = vst [vmem:[#allocation220_spill] sm:$0xff] %v6445_v48  ;;  %v1619_v10 = vand.u32 4294901760, %v1618_v11  ;;  %v8758_v11 = vand.u32 4294901760, %v6445_v48 }
 0x1ff   :  { %2247 = vmatmul.f32.gmra.mxu3 %v6402_v50  ;;  %8750 = vst [vmem:[#allocation221_spill] sm:$0xff] %v6453_v20  ;;  %v1114_v40 = vsub.f32 %v6436_v30, %v8756_v36  ;;  %v692_v36 = vsel %vm366_vm0, %v6382_v42, 0 }
 0x200   :  { %v1485_v16 = vpop.f32.mrf.mxu2  ;;  %8754 = vst [vmem:[#allocation225_spill] sm:$0xff] %v6464_v59  ;;  %v1626_v24 = vsub.f32 %v6445_v48, %v8758_v11  ;;  %v6495_v48 = vand.u32 4294901760, %v692_v36 }
 0x201   :  { %v6457_v58 = vadd.f32 %v2180_v26, %v1485_v16  ;;  %8755 = vst [vmem:[#allocation226_spill] sm:$0xff] %v6467_v4  ;;  %v203_v26 = vpop.trf.xlu2  ;;  %v500_v16 = vsel %vm366_vm0, %v202_v57, 0 }
 0x202   :  { %v2184_v50 = vpop.f32.mrf.mxu3  ;;  %8757 = vst [vmem:[#allocation227_spill] sm:$0xff] %v6476_v12 }
 0x203   :  { %8751 = vst [vmem:[#allocation222_spill] sm:$0xff] %v6457_v58  ;;  %v6459_v44 = vpop.f32.mrf.mxu0  ;;  %v6461_v1 = vpop.f32.mrf.mxu1  ;;  %v1627_v58 = vand.u32 4294901760, %v1626_v24  ;;  %v6509_v24 = vsub.f32 %v692_v36, %v6495_v48 }
 0x204   :  { %8752 = vst [vmem:[#allocation223_spill] sm:$0xff] %v6459_v44 }
 0x205   :  { %8753 = vst [vmem:[#allocation224_spill] sm:$0xff] %v6461_v1  ;;  %1620 = vmatmul.f32.gmra.mxu2 %v1619_v10  ;;  %v1115_v10 = vand.u32 4294901760, %v1114_v40  ;;  %v6484_v1 = vand.u32 4294901760, %v500_v16  ;;  %v6492_v30 = vpop.trf.xlu1  ;;  %v8765_v40 = vand.u32 4294901760, %v6467_v4 }
 0x206   :  { %1108 = vmatmul.f32.gmra.mxu0 %v1107_v35  ;;  %1995 = vmatmul.f32.gmra.mxu1 %v6424_v46  ;;  %8763 = vst [vmem:[#allocation232_spill] sm:$0xff] %v6495_v48 }
 0x207   :  { %2251 = vmatmul.f32.gmra.mxu3 %v6433_v5  ;;  %8759 = vst [vmem:[#allocation228_spill] sm:$0xff] %v6484_v1  ;;  %v6498_v42 = vsub.f32 %v500_v16, %v6484_v1  ;;  %v8767_v16 = vand.u32 4294901760, %v6476_v12 }
 0x208   :  { %v1493_v35 = vpop.f32.mrf.mxu2  ;;  %8766 = vst [vmem:[#allocation234_spill] sm:$0xff] %v6509_v24 }
 0x209   :  { %v6486_v44 = vadd.f32 %v2184_v50, %v1493_v35  ;;  %8764 = vst [vmem:[#allocation233_spill] sm:$0xff] %v6498_v42  ;;  %v1122_v50 = vsub.f32 %v6467_v4, %v8765_v40  ;;  %v503_v35 = vsel %vm366_vm0, %v203_v26, 0 }
 0x20a   :  { %v2188_v57 = vpop.f32.mrf.mxu3  ;;  %v6517_v26 = vand.u32 4294901760, %v503_v35 }
 0x20b   :  { %8760 = vst [vmem:[#allocation229_spill] sm:$0xff] %v6486_v44  ;;  %v6488_v5 = vpop.f32.mrf.mxu0  ;;  %v6490_v3 = vpop.f32.mrf.mxu1 }
 0x20c   :  { %8761 = vst [vmem:[#allocation230_spill] sm:$0xff] %v6488_v5  ;;  %v204_v44 = vpop.trf.xlu2  ;;  %v6506_v11 = vpop.trf.xlu0  ;;  %v1123_v5 = vand.u32 4294901760, %v1122_v50  ;;  %v6529_v40 = vsub.f32 %v503_v35, %v6517_v26 }
 0x20d   :  { %8762 = vst [vmem:[#allocation231_spill] sm:$0xff] %v6490_v3  ;;  %1628 = vmatmul.f32.gmra.mxu2 %v1627_v58  ;;  %v695_v58 = vsel %vm366_vm0, %v6413_v28, 0  ;;  %v8774_v28 = vand.u32 4294901760, %v6498_v42 }
 0x20e   :  { %1116 = vmatmul.f32.gmra.mxu0 %v1115_v10  ;;  %1999 = vmatmul.f32.gmra.mxu1 %v6453_v20  ;;  %v1634_v10 = vsub.f32 %v6476_v12, %v8767_v16  ;;  %8768 = vst [vmem:[#allocation235_spill] sm:$0xff] %v6517_v26  ;;  %v6526_v16 = vand.u32 4294901760, %v695_v58 }
 0x20f   :  { %2255 = vmatmul.f32.gmra.mxu3 %v6464_v59  ;;  %v222_v46 = vpop.trf.xlu1  ;;  %8773 = vst [vmem:[#allocation240_spill] sm:$0xff] %v6529_v40 }
 0x210   :  { %v1501_v3 = vpop.f32.mrf.mxu2  ;;  %8772 = vst [vmem:[#allocation239_spill] sm:$0xff] %v6526_v16  ;;  %v1635_v12 = vand.u32 4294901760, %v1634_v10  ;;  %v6540_v38 = vsub.f32 %v695_v58, %v6526_v16 }
 0x211   :  { %v6519_v59 = vadd.f32 %v2188_v57, %v1501_v3  ;;  %v1130_v57 = vsub.f32 %v6498_v42, %v8774_v28  ;;  %v506_v3 = vsel %vm366_vm0, %v204_v44, 0 }
 0x212   :  { %v2192_v4 = vpop.f32.mrf.mxu3  ;;  %8775 = vst [vmem:[#allocation241_spill] sm:$0xff] %v6540_v38 }
 0x213   :  { %8769 = vst [vmem:[#allocation236_spill] sm:$0xff] %v6519_v59  ;;  %v6521_v20 = vpop.f32.mrf.mxu0  ;;  %v6523_v36 = vpop.f32.mrf.mxu1  ;;  %v1131_v28 = vand.u32 4294901760, %v1130_v57  ;;  %v8783_v57 = vand.u32 4294901760, %v6529_v40 }
 0x214   :  { %8770 = vst [vmem:[#allocation237_spill] sm:$0xff] %v6521_v20  ;;  %v6537_v50 = vpop.trf.xlu0  ;;  %v205_v44 = vpop.trf.xlu2 }
 0x215   :  { %8771 = vst [vmem:[#allocation238_spill] sm:$0xff] %v6523_v36  ;;  %1636 = vmatmul.f32.gmra.mxu2 %v1635_v12  ;;  %v698_v12 = vsel %vm366_vm0, %v6455_v18, 0  ;;  %v6548_v36 = vand.u32 4294901760, %v506_v3 }
 0x216   :  { %1124 = vmatmul.f32.gmra.mxu0 %v1123_v5  ;;  %2003 = vmatmul.f32.gmra.mxu1 %v6484_v1  ;;  %v8776_v5 = vand.u32 4294901760, %v6509_v24 }
 0x217   :  { %2259 = vmatmul.f32.gmra.mxu3 %v6495_v48  ;;  %8777 = vst [vmem:[#allocation242_spill] sm:$0xff] %v6548_v36  ;;  %v223_v1 = vpop.trf.xlu1  ;;  %v6560_v18 = vsub.f32 %v506_v3, %v6548_v36 }
 0x218   :  { %v1642_v35 = vsub.f32 %v6509_v24, %v8776_v5  ;;  %v1509_v10 = vpop.f32.mrf.mxu2  ;;  %v6557_v24 = vand.u32 4294901760, %v698_v12 }
 0x219   :  { %v6550_v48 = vadd.f32 %v2192_v4, %v1509_v10  ;;  %8782 = vst [vmem:[#allocation247_spill] sm:$0xff] %v6560_v18  ;;  %v1138_v4 = vsub.f32 %v6529_v40, %v8783_v57  ;;  %v509_v10 = vsel %vm366_vm0, %v205_v44, 0 }
 0x21a   :  { %v2196_v20 = vpop.f32.mrf.mxu3  ;;  %8781 = vst [vmem:[#allocation246_spill] sm:$0xff] %v6557_v24  ;;  %v1643_v59 = vand.u32 4294901760, %v1642_v35  ;;  %v6571_v5 = vsub.f32 %v698_v12, %v6557_v24  ;;  %v8785_v35 = vand.u32 4294901760, %v6540_v38 }
 0x21b   :  { %8778 = vst [vmem:[#allocation243_spill] sm:$0xff] %v6550_v48  ;;  %v6552_v42 = vpop.f32.mrf.mxu0  ;;  %v6554_v58 = vpop.f32.mrf.mxu1  ;;  %v1139_v57 = vand.u32 4294901760, %v1138_v4  ;;  %v512_v4 = vsel %vm366_vm0, %v222_v46, 0 }
 0x21c   :  { %8779 = vst [vmem:[#allocation244_spill] sm:$0xff] %v6552_v42  ;;  %v6568_v48 = vpop.trf.xlu0  ;;  %v1650_v3 = vsub.f32 %v6540_v38, %v8785_v35  ;;  %v6579_v42 = vand.u32 4294901760, %v509_v10 }
 0x21d   :  { %8780 = vst [vmem:[#allocation245_spill] sm:$0xff] %v6554_v58  ;;  %1644 = vmatmul.f32.gmra.mxu2 %v1643_v59  ;;  %v701_v59 = vsel %vm366_vm0, %v6492_v30, 0  ;;  %v8792_v30 = vand.u32 4294901760, %v6560_v18 }
 0x21e   :  { %1132 = vmatmul.f32.gmra.mxu0 %v1131_v28  ;;  %2007 = vmatmul.f32.gmra.mxu1 %v6517_v26  ;;  %8784 = vst [vmem:[#allocation248_spill] sm:$0xff] %v6571_v5  ;;  %v6588_v35 = vand.u32 4294901760, %v701_v59  ;;  %v1651_v38 = vand.u32 4294901760, %v1650_v3  ;;  %v6591_v58 = vsub.f32 %v509_v10, %v6579_v42  ;;  %v8794_v3 = vand.u32 4294901760, %v6571_v5 }
 0x21f   :  { %2263 = vmatmul.f32.gmra.mxu3 %v6526_v16  ;;  %8786 = vst [vmem:[#allocation249_spill] sm:$0xff] %v6579_v42  ;;  %v224_v26 = vpop.trf.xlu1 }
 0x220   :  { %v1517_v28 = vpop.f32.mrf.mxu2  ;;  %8790 = vst [vmem:[#allocation253_spill] sm:$0xff] %v6588_v35  ;;  %v6602_v61 = vsub.f32 %v701_v59, %v6588_v35  ;;  %v1658_v10 = vsub.f32 %v6571_v5, %v8794_v3 }
 0x221   :  { %v6581_v44 = vadd.f32 %v2196_v20, %v1517_v28  ;;  %8791 = vst [vmem:[#allocation254_spill] sm:$0xff] %v6591_v58  ;;  %v1146_v20 = vsub.f32 %v6560_v18, %v8792_v30 }
 0x222   :  { %v2200_v16 = vpop.f32.mrf.mxu3  ;;  %8793 = vst [vmem:[#allocation255_spill] sm:$0xff] %v6602_v61  ;;  %v1659_v5 = vand.u32 4294901760, %v1658_v10  ;;  %v8803_v10 = vand.u32 4294901760, %v6602_v61 }
 0x223   :  { %8787 = vst [vmem:[#allocation250_spill] sm:$0xff] %v6581_v44  ;;  %v6583_v40 = vpop.f32.mrf.mxu0  ;;  %v6585_v12 = vpop.f32.mrf.mxu1  ;;  %v1147_v30 = vand.u32 4294901760, %v1146_v20  ;;  %v515_v20 = vsel %vm366_vm0, %v223_v1, 0 }
 0x224   :  { %8788 = vst [vmem:[#allocation251_spill] sm:$0xff] %v6583_v40  ;;  %v6599_v28 = vpop.trf.xlu0 }
 0x225   :  { %8789 = vst [vmem:[#allocation252_spill] sm:$0xff] %v6585_v12  ;;  %1652 = vmatmul.f32.gmra.mxu2 %v1651_v38  ;;  %v704_v38 = vsel %vm366_vm0, %v6506_v11, 0  ;;  %v6610_v12 = vand.u32 4294901760, %v512_v4  ;;  %v8801_v11 = vand.u32 4294901760, %v6591_v58 }
 0x226   :  { %1140 = vmatmul.f32.gmra.mxu0 %v1139_v57  ;;  %2011 = vmatmul.f32.gmra.mxu1 %v6548_v36  ;;  %v6619_v3 = vand.u32 4294901760, %v704_v38 }
 0x227   :  { %2267 = vmatmul.f32.gmra.mxu3 %v6557_v24  ;;  %8795 = vst [vmem:[#allocation256_spill] sm:$0xff] %v6610_v12  ;;  %v225_v18 = vpop.trf.xlu1  ;;  %v6622_v44 = vsub.f32 %v512_v4, %v6610_v12  ;;  %v1666_v4 = vsub.f32 %v6602_v61, %v8803_v10 }
 0x228   :  { %v1525_v57 = vpop.f32.mrf.mxu2  ;;  %8799 = vst [vmem:[#allocation260_spill] sm:$0xff] %v6619_v3  ;;  %v6633_v36 = vsub.f32 %v704_v38, %v6619_v3 }
 0x229   :  { %v6612_v46 = vadd.f32 %v2200_v16, %v1525_v57  ;;  %8800 = vst [vmem:[#allocation261_spill] sm:$0xff] %v6622_v44  ;;  %v1154_v16 = vsub.f32 %v6591_v58, %v8801_v11  ;;  %v1667_v61 = vand.u32 4294901760, %v1666_v4 }
 0x22a   :  { %v2204_v24 = vpop.f32.mrf.mxu3  ;;  %8802 = vst [vmem:[#allocation262_spill] sm:$0xff] %v6633_v36  ;;  %v8811_v4 = vand.u32 4294901760, %v6633_v36 }
 0x22b   :  { %8796 = vst [vmem:[#allocation257_spill] sm:$0xff] %v6612_v46  ;;  %v6614_v40 = vpop.f32.mrf.mxu0  ;;  %v6616_v59 = vpop.f32.mrf.mxu1  ;;  %v1155_v11 = vand.u32 4294901760, %v1154_v16  ;;  %v518_v16 = vsel %vm366_vm0, %v224_v26, 0 }
 0x22c   :  { %8797 = vst [vmem:[#allocation258_spill] sm:$0xff] %v6614_v40  ;;  %v6630_v57 = vpop.trf.xlu0 }
 0x22d   :  { %8798 = vst [vmem:[#allocation259_spill] sm:$0xff] %v6616_v59  ;;  %1660 = vmatmul.f32.gmra.mxu2 %v1659_v5  ;;  %v707_v5 = vsel %vm366_vm0, %v6537_v50, 0  ;;  %v6641_v59 = vand.u32 4294901760, %v515_v20  ;;  %v8809_v50 = vand.u32 4294901760, %v6622_v44 }
 0x22e   :  { %1148 = vmatmul.f32.gmra.mxu0 %v1147_v30  ;;  %2015 = vmatmul.f32.gmra.mxu1 %v6579_v42  ;;  %v6650_v10 = vand.u32 4294901760, %v707_v5 }
 0x22f   :  { %2271 = vmatmul.f32.gmra.mxu3 %v6588_v35  ;;  %v226_v58 = vpop.trf.xlu1  ;;  %v6653_v46 = vsub.f32 %v515_v20, %v6641_v59  ;;  %v1674_v20 = vsub.f32 %v6633_v36, %v8811_v4 }
 0x230   :  { %v1533_v30 = vpop.f32.mrf.mxu2  ;;  %8807 = vst [vmem:[#allocation266_spill] sm:$0xff] %v6650_v10  ;;  %v6664_v42 = vsub.f32 %v707_v5, %v6650_v10 }
 0x231   :  { %v6643_v1 = vadd.f32 %v2204_v24, %v1533_v30  ;;  %8808 = vst [vmem:[#allocation267_spill] sm:$0xff] %v6653_v46  ;;  %v1162_v24 = vsub.f32 %v6622_v44, %v8809_v50  ;;  %v1675_v36 = vand.u32 4294901760, %v1674_v20 }
 0x232   :  { %v2208_v35 = vpop.f32.mrf.mxu3  ;;  %8810 = vst [vmem:[#allocation268_spill] sm:$0xff] %v6664_v42 }
 0x233   :  { %8804 = vst [vmem:[#allocation263_spill] sm:$0xff] %v6643_v1  ;;  %v6645_v40 = vpop.f32.mrf.mxu0  ;;  %v6647_v38 = vpop.f32.mrf.mxu1  ;;  %v1163_v50 = vand.u32 4294901760, %v1162_v24  ;;  %v521_v24 = vsel %vm366_vm0, %v225_v18, 0 }
 0x234   :  { %8805 = vst [vmem:[#allocation264_spill] sm:$0xff] %v6645_v40  ;;  %v6661_v30 = vpop.trf.xlu0 }
 0x235   :  { %8806 = vst [vmem:[#allocation265_spill] sm:$0xff] %v6647_v38  ;;  %1668 = vmatmul.f32.gmra.mxu2 %v1667_v61  ;;  %v710_v61 = vsel %vm366_vm0, %v6568_v48, 0  ;;  %v6672_v38 = vand.u32 4294901760, %v518_v16  ;;  %v8818_v48 = vand.u32 4294901760, %v6653_v46 }
 0x236   :  { %1156 = vmatmul.f32.gmra.mxu0 %v1155_v11  ;;  %2019 = vmatmul.f32.gmra.mxu1 %v6610_v12  ;;  %v8414_v12 = vand.u32 4294901760, %v6664_v42  ;;  %v6681_v4 = vand.u32 4294901760, %v710_v61 }
 0x237   :  { %2275 = vmatmul.f32.gmra.mxu3 %v6619_v3  ;;  %8812 = vst [vmem:[#allocation269_spill] sm:$0xff] %v6672_v38  ;;  %v227_v44 = vpop.trf.xlu1  ;;  %v6684_v1 = vsub.f32 %v518_v16, %v6672_v38 }
 0x238   :  { %v1541_v11 = vpop.f32.mrf.mxu2  ;;  %8816 = vst [vmem:[#allocation273_spill] sm:$0xff] %v6681_v4  ;;  %v1682_v20 = vsub.f32 %v6664_v42, %v8414_v12 }
 0x239   :  { %v6674_v26 = vadd.f32 %v2208_v35, %v1541_v11  ;;  %8817 = vst [vmem:[#allocation274_spill] sm:$0xff] %v6684_v1  ;;  %v1170_v35 = vsub.f32 %v6653_v46, %v8818_v48  ;;  %v6693_v11 = vsub.f32 %v710_v61, %v6681_v4  ;;  %v713_v48 = vsel %vm366_vm0, %v6599_v28, 0 }
 0x23a   :  { %v2212_v3 = vpop.f32.mrf.mxu3  ;;  %v6712_v42 = vand.u32 4294901760, %v713_v48 }
 0x23b   :  { %8813 = vst [vmem:[#allocation270_spill] sm:$0xff] %v6674_v26  ;;  %v6676_v40 = vpop.f32.mrf.mxu0  ;;  %v6678_v5 = vpop.f32.mrf.mxu1  ;;  %v6701_v26 = vand.u32 4294901760, %v521_v24 }
 0x23c   :  { %8814 = vst [vmem:[#allocation271_spill] sm:$0xff] %v6676_v40  ;;  %v6724_v12 = vsub.f32 %v713_v48, %v6712_v42 }
 0x23d   :  { %8815 = vst [vmem:[#allocation272_spill] sm:$0xff] %v6678_v5  ;;  %1676 = vmatmul.f32.gmra.mxu2 %v1675_v36  ;;  %v1171_v36 = vand.u32 4294901760, %v1170_v35  ;;  %v6703_v5 = vpop.trf.xlu0  ;;  %v6715_v28 = vsub.f32 %v521_v24, %v6701_v26  ;;  %v8826_v35 = vand.u32 4294901760, %v6684_v1 }
 0x23e   :  { %1164 = vmatmul.f32.gmra.mxu0 %v1163_v50  ;;  %2023 = vmatmul.f32.gmra.mxu1 %v6641_v59  ;;  %8819 = vst [vmem:[#allocation275_spill] sm:$0xff] %v6693_v11  ;;  %v1683_v50 = vand.u32 4294901760, %v1682_v20  ;;  %v8828_v20 = vand.u32 4294901760, %v6693_v11 }
 0x23f   :  { %2279 = vmatmul.f32.gmra.mxu3 %v6650_v10  ;;  %8820 = vst [vmem:[#allocation276_spill] sm:$0xff] %v6701_v26  ;;  %v228_v46 = vpop.trf.xlu1 }
 0x240   :  { %v1549_v16 = vpop.f32.mrf.mxu2  ;;  %8824 = vst [vmem:[#allocation280_spill] sm:$0xff] %v6712_v42 }
 0x241   :  { %v6705_v18 = vadd.f32 %v2212_v3, %v1549_v16  ;;  %8825 = vst [vmem:[#allocation281_spill] sm:$0xff] %v6715_v28  ;;  %v1178_v3 = vsub.f32 %v6684_v1, %v8826_v35  ;;  %v524_v16 = vsel %vm366_vm0, %v226_v58, 0  ;;  %v716_v35 = vsel %vm366_vm0, %v6630_v57, 0 }
 0x242   :  { %v2216_v10 = vpop.f32.mrf.mxu3  ;;  %8827 = vst [vmem:[#allocation282_spill] sm:$0xff] %v6724_v12  ;;  %v8835_v57 = vand.u32 4294901760, %v6715_v28 }
 0x243   :  { %8821 = vst [vmem:[#allocation277_spill] sm:$0xff] %v6705_v18  ;;  %v6707_v61 = vpop.f32.mrf.mxu0  ;;  %v6709_v40 = vpop.f32.mrf.mxu1 }
 0x244   :  { %8822 = vst [vmem:[#allocation278_spill] sm:$0xff] %v6707_v61 }
 0x245   :  { %8823 = vst [vmem:[#allocation279_spill] sm:$0xff] %v6709_v40  ;;  %1684 = vmatmul.f32.gmra.mxu2 %v1683_v50  ;;  %v1179_v50 = vand.u32 4294901760, %v1178_v3  ;;  %v6732_v40 = vand.u32 4294901760, %v524_v16  ;;  %v357_v3 = vpop.trf.xlu0 }
 0x246   :  { %1172 = vmatmul.f32.gmra.mxu0 %v1171_v36  ;;  %2027 = vmatmul.f32.gmra.mxu1 %v6672_v38  ;;  %v1690_v36 = vsub.f32 %v6693_v11, %v8828_v20  ;;  %v6741_v20 = vand.u32 4294901760, %v716_v35 }
 0x247   :  { %2283 = vmatmul.f32.gmra.mxu3 %v6681_v4  ;;  %8829 = vst [vmem:[#allocation283_spill] sm:$0xff] %v6732_v40  ;;  %v229_v1 = vpop.trf.xlu1  ;;  %v6744_v18 = vsub.f32 %v524_v16, %v6732_v40 }
 0x248   :  { %v1557_v24 = vpop.f32.mrf.mxu2  ;;  %8833 = vst [vmem:[#allocation287_spill] sm:$0xff] %v6741_v20  ;;  %v1691_v11 = vand.u32 4294901760, %v1690_v36  ;;  %v6753_v38 = vsub.f32 %v716_v35, %v6741_v20  ;;  %v8837_v36 = vand.u32 4294901760, %v6724_v12 }
 0x249   :  { %v6734_v61 = vadd.f32 %v2216_v10, %v1557_v24  ;;  %8834 = vst [vmem:[#allocation288_spill] sm:$0xff] %v6744_v18  ;;  %v1186_v10 = vsub.f32 %v6715_v28, %v8835_v57  ;;  %v527_v24 = vsel %vm366_vm0, %v227_v44, 0  ;;  %v719_v57 = vsel %vm366_vm0, %v6661_v30, 0 }
 0x24a   :  { %v2220_v58 = vpop.f32.mrf.mxu3  ;;  %8836 = vst [vmem:[#allocation289_spill] sm:$0xff] %v6753_v38  ;;  %v1698_v16 = vsub.f32 %v6724_v12, %v8837_v36  ;;  %v8844_v30 = vand.u32 4294901760, %v6744_v18 }
 0x24b   :  { %8830 = vst [vmem:[#allocation284_spill] sm:$0xff] %v6734_v61  ;;  %v6736_v4 = vpop.f32.mrf.mxu0  ;;  %v6738_v48 = vpop.f32.mrf.mxu1 }
 0x24c   :  { %8831 = vst [vmem:[#allocation285_spill] sm:$0xff] %v6736_v4  ;;  %v1699_v36 = vand.u32 4294901760, %v1698_v16  ;;  %v8846_v16 = vand.u32 4294901760, %v6753_v38 }
 0x24d   :  { %8832 = vst [vmem:[#allocation286_spill] sm:$0xff] %v6738_v48  ;;  %1692 = vmatmul.f32.gmra.mxu2 %v1691_v11  ;;  %v1187_v11 = vand.u32 4294901760, %v1186_v10  ;;  %v6761_v48 = vand.u32 4294901760, %v527_v24  ;;  %v1194_v10 = vsub.f32 %v6744_v18, %v8844_v30  ;;  %v358_v28 = vpop.trf.xlu0 }
 0x24e   :  { %1180 = vmatmul.f32.gmra.mxu0 %v1179_v50  ;;  %2031 = vmatmul.f32.gmra.mxu1 %v6701_v26  ;;  %v6770_v26 = vand.u32 4294901760, %v719_v57 }
 0x24f   :  { %2287 = vmatmul.f32.gmra.mxu3 %v6712_v42  ;;  %8838 = vst [vmem:[#allocation290_spill] sm:$0xff] %v6761_v48  ;;  %v6773_v61 = vsub.f32 %v527_v24, %v6761_v48  ;;  %v1706_v24 = vsub.f32 %v6753_v38, %v8846_v16  ;;  %v1195_v30 = vand.u32 4294901760, %v1194_v10 }
 0x250   :  { %v1565_v50 = vpop.f32.mrf.mxu2  ;;  %8842 = vst [vmem:[#allocation294_spill] sm:$0xff] %v6770_v26 }
 0x251   :  { %v6763_v4 = vadd.f32 %v2220_v58, %v1565_v50  ;;  %8843 = vst [vmem:[#allocation295_spill] sm:$0xff] %v6773_v61  ;;  %v230_v58 = vpop.trf.xlu1  ;;  %v530_v50 = vsel %vm366_vm0, %v228_v46, 0  ;;  %v1707_v16 = vand.u32 4294901760, %v1706_v24 }
 0x252   :  { %v2224_v44 = vpop.f32.mrf.mxu3 }
 0x253   :  { %8839 = vst [vmem:[#allocation291_spill] sm:$0xff] %v6763_v4  ;;  %v6765_v42 = vpop.f32.mrf.mxu0  ;;  %v6767_v35 = vpop.f32.mrf.mxu1  ;;  %v6782_v4 = vsub.f32 %v719_v57, %v6770_v26 }
 0x254   :  { %8840 = vst [vmem:[#allocation292_spill] sm:$0xff] %v6765_v42 }
 0x255   :  { %8841 = vst [vmem:[#allocation293_spill] sm:$0xff] %v6767_v35  ;;  %1700 = vmatmul.f32.gmra.mxu2 %v1699_v36  ;;  %v722_v36 = vsel %vm366_vm0, %v6703_v5, 0  ;;  %v6790_v35 = vand.u32 4294901760, %v530_v50  ;;  %v8852_v5 = vand.u32 4294901760, %v6773_v61  ;;  %v8854_v24 = vand.u32 4294901760, %v6782_v4 }
 0x256   :  { %1188 = vmatmul.f32.gmra.mxu0 %v1187_v11  ;;  %2035 = vmatmul.f32.gmra.mxu1 %v6732_v40  ;;  %8845 = vst [vmem:[#allocation296_spill] sm:$0xff] %v6782_v4  ;;  %v6799_v40 = vand.u32 4294901760, %v722_v36 }
 0x257   :  { %2291 = vmatmul.f32.gmra.mxu3 %v6741_v20  ;;  %v6802_v12 = vsub.f32 %v530_v50, %v6790_v35  ;;  %v1202_v10 = vsub.f32 %v6773_v61, %v8852_v5  ;;  %v1714_v50 = vsub.f32 %v6782_v4, %v8854_v24  ;;  %v725_v5 = vsel %vm366_vm0, %v357_v3, 0 }
 0x258   :  { %v1573_v11 = vpop.f32.mrf.mxu2  ;;  %8850 = vst [vmem:[#allocation300_spill] sm:$0xff] %v6799_v40  ;;  %v6811_v18 = vsub.f32 %v722_v36, %v6799_v40 }
 0x259   :  { %v6792_v46 = vadd.f32 %v2224_v44, %v1573_v11  ;;  %8851 = vst [vmem:[#allocation301_spill] sm:$0xff] %v6802_v12  ;;  %v533_v44 = vsel %vm366_vm0, %v229_v1, 0  ;;  %v231_v11 = vpop.trf.xlu1  ;;  %v1715_v24 = vand.u32 4294901760, %v1714_v50  ;;  %v8861_v3 = vand.u32 4294901760, %v6802_v12 }
 0x25a   :  { %v2228_v20 = vpop.f32.mrf.mxu3  ;;  %8853 = vst [vmem:[#allocation302_spill] sm:$0xff] %v6811_v18  ;;  %v6818_v38 = vand.u32 4294901760, %v533_v44  ;;  %v8453_v61 = vand.u32 4294901760, %v6811_v18 }
 0x25b   :  { %8847 = vst [vmem:[#allocation297_spill] sm:$0xff] %v6792_v46  ;;  %v6794_v42 = vpop.f32.mrf.mxu0  ;;  %v6796_v57 = vpop.f32.mrf.mxu1 }
 0x25c   :  { %8848 = vst [vmem:[#allocation298_spill] sm:$0xff] %v6794_v42  ;;  %v6830_v46 = vsub.f32 %v533_v44, %v6818_v38  ;;  %v1722_v50 = vsub.f32 %v6811_v18, %v8453_v61 }
 0x25d   :  { %8849 = vst [vmem:[#allocation299_spill] sm:$0xff] %v6796_v57  ;;  %1708 = vmatmul.f32.gmra.mxu2 %v1707_v16  ;;  %v1203_v16 = vand.u32 4294901760, %v1202_v10  ;;  %v359_v57 = vpop.trf.xlu0  ;;  %v1210_v10 = vsub.f32 %v6802_v12, %v8861_v3 }
 0x25e   :  { %1196 = vmatmul.f32.gmra.mxu0 %v1195_v30  ;;  %2039 = vmatmul.f32.gmra.mxu1 %v6761_v48  ;;  %8855 = vst [vmem:[#allocation303_spill] sm:$0xff] %v6818_v38  ;;  %v6827_v48 = vand.u32 4294901760, %v725_v5  ;;  %v1723_v18 = vand.u32 4294901760, %v1722_v50 }
 0x25f   :  { %2295 = vmatmul.f32.gmra.mxu3 %v6770_v26  ;;  %8860 = vst [vmem:[#allocation308_spill] sm:$0xff] %v6830_v46  ;;  %v1211_v3 = vand.u32 4294901760, %v1210_v10  ;;  %v539_v10 = vsel %vm366_vm0, %v231_v11, 0 }
 0x260   :  { %v1581_v30 = vpop.f32.mrf.mxu2  ;;  %8859 = vst [vmem:[#allocation307_spill] sm:$0xff] %v6827_v48 }
 0x261   :  { %v6820_v1 = vadd.f32 %v2228_v20, %v1581_v30  ;;  %v536_v20 = vsel %vm366_vm0, %v230_v58, 0  ;;  %v6839_v30 = vsub.f32 %v725_v5, %v6827_v48  ;;  %v232_v4 = vpop.trf.xlu1 }
 0x262   :  { %v2232_v26 = vpop.f32.mrf.mxu3 }
 0x263   :  { %8856 = vst [vmem:[#allocation304_spill] sm:$0xff] %v6820_v1  ;;  %v6822_v42 = vpop.f32.mrf.mxu0  ;;  %v6824_v36 = vpop.f32.mrf.mxu1  ;;  %v728_v1 = vsel %vm366_vm0, %v358_v28, 0  ;;  %v8463_v12 = vand.u32 4294901760, %v6839_v30 }
 0x264   :  { %8857 = vst [vmem:[#allocation305_spill] sm:$0xff] %v6822_v42  ;;  %v6855_v61 = vand.u32 4294901760, %v728_v1 }
 0x265   :  { %8858 = vst [vmem:[#allocation306_spill] sm:$0xff] %v6824_v36  ;;  %1716 = vmatmul.f32.gmra.mxu2 %v1715_v24  ;;  %v6846_v24 = vand.u32 4294901760, %v536_v20  ;;  %v360_v42 = vpop.trf.xlu0  ;;  %v1730_v50 = vsub.f32 %v6839_v30, %v8463_v12 }
 0x266   :  { %1204 = vmatmul.f32.gmra.mxu0 %v1203_v16  ;;  %2043 = vmatmul.f32.gmra.mxu1 %v6790_v35  ;;  %8862 = vst [vmem:[#allocation309_spill] sm:$0xff] %v6839_v30  ;;  %v8456_v16 = vand.u32 4294901760, %v6830_v46 }
 0x267   :  { %2299 = vmatmul.f32.gmra.mxu3 %v6799_v40  ;;  %8866 = vst [vmem:[#allocation313_spill] sm:$0xff] %v6855_v61  ;;  %v6858_v28 = vsub.f32 %v536_v20, %v6846_v24  ;;  %v1731_v12 = vand.u32 4294901760, %v1730_v50 }
 0x268   :  { %v1589_v44 = vpop.f32.mrf.mxu2 }
 0x269   :  { %v6848_v36 = vadd.f32 %v2232_v26, %v1589_v44  ;;  %8867 = vst [vmem:[#allocation314_spill] sm:$0xff] %v6858_v28  ;;  %v1218_v26 = vsub.f32 %v6830_v46, %v8456_v16  ;;  %v6867_v44 = vsub.f32 %v728_v1, %v6855_v61  ;;  %v233_v1 = vpop.trf.xlu1 }
 0x26a   :  { %v2236_v58 = vpop.f32.mrf.mxu3 }
 0x26b   :  { %8863 = vst [vmem:[#allocation310_spill] sm:$0xff] %v6848_v36  ;;  %v6850_v40 = vpop.f32.mrf.mxu0  ;;  %v6852_v5 = vpop.f32.mrf.mxu1  ;;  %v731_v36 = vsel %vm366_vm0, %v359_v57, 0  ;;  %v1219_v16 = vand.u32 4294901760, %v1218_v26  ;;  %v8875_v57 = vand.u32 4294901760, %v6858_v28 }
 0x26c   :  { %8864 = vst [vmem:[#allocation311_spill] sm:$0xff] %v6850_v40 }
 0x26d   :  { %8865 = vst [vmem:[#allocation312_spill] sm:$0xff] %v6852_v5  ;;  %1724 = vmatmul.f32.gmra.mxu2 %v1723_v18  ;;  %v6874_v18 = vand.u32 4294901760, %v539_v10  ;;  %v361_v26 = vpop.trf.xlu0 }
 0x26e   :  { %1212 = vmatmul.f32.gmra.mxu0 %v1211_v3  ;;  %2047 = vmatmul.f32.gmra.mxu1 %v6818_v38  ;;  %8868 = vst [vmem:[#allocation315_spill] sm:$0xff] %v6867_v44  ;;  %v6883_v38 = vand.u32 4294901760, %v731_v36 }
 0x26f   :  { %2303 = vmatmul.f32.gmra.mxu3 %v6827_v48  ;;  %8869 = vst [vmem:[#allocation316_spill] sm:$0xff] %v6874_v18  ;;  %v6886_v3 = vsub.f32 %v539_v10, %v6874_v18 }
 0x270   :  { %v1597_v20 = vpop.f32.mrf.mxu2  ;;  %8873 = vst [vmem:[#allocation320_spill] sm:$0xff] %v6883_v38  ;;  %v6895_v46 = vsub.f32 %v731_v36, %v6883_v38 }
 0x271   :  { %v6876_v5 = vadd.f32 %v2236_v58, %v1597_v20  ;;  %8874 = vst [vmem:[#allocation321_spill] sm:$0xff] %v6886_v3  ;;  %v1226_v58 = vsub.f32 %v6858_v28, %v8875_v57  ;;  %v542_v20 = vsel %vm366_vm0, %v232_v4, 0  ;;  %v734_v57 = vsel %vm366_vm0, %v360_v42, 0 }
 0x272   :  { %v2240_v11 = vpop.f32.mrf.mxu3  ;;  %8876 = vst [vmem:[#allocation322_spill] sm:$0xff] %v6895_v46  ;;  %v6911_v28 = vand.u32 4294901760, %v734_v57  ;;  %v8884_v42 = vand.u32 4294901760, %v6886_v3 }
 0x273   :  { %8870 = vst [vmem:[#allocation317_spill] sm:$0xff] %v6876_v5  ;;  %v6878_v40 = vpop.f32.mrf.mxu0  ;;  %v6880_v48 = vpop.f32.mrf.mxu1  ;;  %v1227_v30 = vand.u32 4294901760, %v1226_v58 }
 0x274   :  { %8871 = vst [vmem:[#allocation318_spill] sm:$0xff] %v6878_v40  ;;  %v1234_v58 = vsub.f32 %v6886_v3, %v8884_v42  ;;  %v737_v42 = vsel %vm366_vm0, %v361_v26, 0 }
 0x275   :  { %8872 = vst [vmem:[#allocation319_spill] sm:$0xff] %v6880_v48  ;;  %1732 = vmatmul.f32.gmra.mxu2 %v1731_v12  ;;  %v6902_v12 = vand.u32 4294901760, %v542_v20  ;;  %v362_v36 = vpop.trf.xlu0 }
 0x276   :  { %1220 = vmatmul.f32.gmra.mxu0 %v1219_v16  ;;  %2051 = vmatmul.f32.gmra.mxu1 %v6846_v24  ;;  %v8877_v16 = vand.u32 4294901760, %v6867_v44  ;;  %8882 = vst [vmem:[#allocation327_spill] sm:$0xff] %v6911_v28 }
 0x277   :  { %2307 = vmatmul.f32.gmra.mxu3 %v6855_v61  ;;  %8878 = vst [vmem:[#allocation323_spill] sm:$0xff] %v6902_v12  ;;  %v6914_v5 = vsub.f32 %v542_v20, %v6902_v12 }
 0x278   :  { %v1738_v10 = vsub.f32 %v6867_v44, %v8877_v16  ;;  %v1605_v50 = vpop.f32.mrf.mxu2 }
 0x279   :  { %v6904_v48 = vadd.f32 %v2240_v11, %v1605_v50  ;;  %8883 = vst [vmem:[#allocation328_spill] sm:$0xff] %v6914_v5  ;;  %v234_v11 = vpop.trf.xlu1  ;;  %v545_v50 = vsel %vm366_vm0, %v233_v1, 0  ;;  %v8892_v26 = vand.u32 4294901760, %v6914_v5 }
 0x27a   :  { %v2244_v4 = vpop.f32.mrf.mxu3  ;;  %v1739_v16 = vand.u32 4294901760, %v1738_v10 }
 0x27b   :  { %8879 = vst [vmem:[#allocation324_spill] sm:$0xff] %v6904_v48  ;;  %v6906_v40 = vpop.f32.mrf.mxu0  ;;  %v6908_v61 = vpop.f32.mrf.mxu1  ;;  %v6923_v48 = vsub.f32 %v734_v57, %v6911_v28 }
 0x27c   :  { %8880 = vst [vmem:[#allocation325_spill] sm:$0xff] %v6906_v40 }
 0x27d   :  { %8881 = vst [vmem:[#allocation326_spill] sm:$0xff] %v6908_v61  ;;  %1740 = vmatmul.f32.gmra.mxu2 %v1739_v16  ;;  %v1235_v16 = vand.u32 4294901760, %v1234_v58  ;;  %v6930_v61 = vand.u32 4294901760, %v545_v50  ;;  %v1242_v58 = vsub.f32 %v6914_v5, %v8892_v26  ;;  %v740_v26 = vsel %vm366_vm0, %v362_v36, 0 }
 0x27e   :  { %1228 = vmatmul.f32.gmra.mxu0 %v1227_v30  ;;  %2055 = vmatmul.f32.gmra.mxu1 %v6874_v18  ;;  %8885 = vst [vmem:[#allocation329_spill] sm:$0xff] %v6923_v48  ;;  %v8886_v30 = vand.u32 4294901760, %v6895_v46  ;;  %v6939_v18 = vand.u32 4294901760, %v737_v42 }
 0x27f   :  { %2311 = vmatmul.f32.gmra.mxu3 %v6883_v38  ;;  %v6942_v44 = vsub.f32 %v545_v50, %v6930_v61 }
 0x280   :  { %v1746_v20 = vsub.f32 %v6895_v46, %v8886_v30  ;;  %v1613_v10 = vpop.f32.mrf.mxu2  ;;  %8890 = vst [vmem:[#allocation333_spill] sm:$0xff] %v6939_v18  ;;  %v6951_v57 = vsub.f32 %v737_v42, %v6939_v18 }
 0x281   :  { %v6932_v40 = vadd.f32 %v2244_v4, %v1613_v10  ;;  %8891 = vst [vmem:[#allocation334_spill] sm:$0xff] %v6942_v44  ;;  %v548_v4 = vsel %vm366_vm0, %v234_v11, 0  ;;  %v235_v10 = vpop.trf.xlu1  ;;  %v8901_v36 = vand.u32 4294901760, %v6942_v44 }
 0x282   :  { %v2248_v1 = vpop.f32.mrf.mxu3  ;;  %v1747_v30 = vand.u32 4294901760, %v1746_v20  ;;  %8893 = vst [vmem:[#allocation335_spill] sm:$0xff] %v6951_v57  ;;  %v8894_v20 = vand.u32 4294901760, %v6923_v48  ;;  %v6958_v46 = vand.u32 4294901760, %v548_v4  ;;  %v8492_v5 = vand.u32 4294901760, %v6951_v57 }
 0x283   :  { %8887 = vst [vmem:[#allocation330_spill] sm:$0xff] %v6932_v40  ;;  %v6934_v38 = vpop.f32.mrf.mxu0  ;;  %v6936_v3 = vpop.f32.mrf.mxu1 }
 0x284   :  { %8888 = vst [vmem:[#allocation331_spill] sm:$0xff] %v6934_v38  ;;  %v1754_v50 = vsub.f32 %v6923_v48, %v8894_v20  ;;  %v6970_v40 = vsub.f32 %v548_v4, %v6958_v46 }
 0x285   :  { %8889 = vst [vmem:[#allocation332_spill] sm:$0xff] %v6936_v3  ;;  %1748 = vmatmul.f32.gmra.mxu2 %v1747_v30  ;;  %v1243_v30 = vand.u32 4294901760, %v1242_v58  ;;  %v363_v3 = vpop.trf.xlu0  ;;  %v1250_v58 = vsub.f32 %v6942_v44, %v8901_v36 }
 0x286   :  { %1236 = vmatmul.f32.gmra.mxu0 %v1235_v16  ;;  %2059 = vmatmul.f32.gmra.mxu1 %v6902_v12  ;;  %8895 = vst [vmem:[#allocation336_spill] sm:$0xff] %v6958_v46  ;;  %v6967_v12 = vand.u32 4294901760, %v740_v26  ;;  %v1755_v20 = vand.u32 4294901760, %v1754_v50  ;;  %v1762_v50 = vsub.f32 %v6951_v57, %v8492_v5 }
 0x287   :  { %2315 = vmatmul.f32.gmra.mxu3 %v6911_v28  ;;  %8900 = vst [vmem:[#allocation341_spill] sm:$0xff] %v6970_v40  ;;  %v1251_v36 = vand.u32 4294901760, %v1250_v58 }
 0x288   :  { %v1621_v16 = vpop.f32.mrf.mxu2  ;;  %8899 = vst [vmem:[#allocation340_spill] sm:$0xff] %v6967_v12  ;;  %v1763_v5 = vand.u32 4294901760, %v1762_v50 }
 0x289   :  { %v6960_v11 = vadd.f32 %v2248_v1, %v1621_v16  ;;  %v551_v1 = vsel %vm366_vm0, %v235_v10, 0  ;;  %v6979_v16 = vsub.f32 %v740_v26, %v6967_v12  ;;  %v236_v48 = vpop.trf.xlu1 }
 0x28a   :  { %v2252_v28 = vpop.f32.mrf.mxu3  ;;  %v554_v58 = vsel %vm366_vm0, %v236_v48, 0 }
 0x28b   :  { %8896 = vst [vmem:[#allocation337_spill] sm:$0xff] %v6960_v11  ;;  %v6962_v38 = vpop.f32.mrf.mxu0  ;;  %v6964_v42 = vpop.f32.mrf.mxu1  ;;  %v743_v11 = vsel %vm366_vm0, %v363_v3, 0 }
 0x28c   :  { %8897 = vst [vmem:[#allocation338_spill] sm:$0xff] %v6962_v38  ;;  %v8502_v38 = vand.u32 4294901760, %v6979_v16  ;;  %v6995_v44 = vand.u32 4294901760, %v743_v11 }
 0x28d   :  { %8898 = vst [vmem:[#allocation339_spill] sm:$0xff] %v6964_v42  ;;  %1756 = vmatmul.f32.gmra.mxu2 %v1755_v20  ;;  %v6986_v20 = vand.u32 4294901760, %v551_v1  ;;  %v364_v57 = vpop.trf.xlu0 }
 0x28e   :  { %1244 = vmatmul.f32.gmra.mxu0 %v1243_v30  ;;  %2063 = vmatmul.f32.gmra.mxu1 %v6930_v61  ;;  %8902 = vst [vmem:[#allocation342_spill] sm:$0xff] %v6979_v16  ;;  %v8495_v30 = vand.u32 4294901760, %v6970_v40  ;;  %v1770_v50 = vsub.f32 %v6979_v16, %v8502_v38 }
 0x28f   :  { %2319 = vmatmul.f32.gmra.mxu3 %v6939_v18  ;;  %8906 = vst [vmem:[#allocation346_spill] sm:$0xff] %v6995_v44  ;;  %v6998_v3 = vsub.f32 %v551_v1, %v6986_v20 }
 0x290   :  { %v1629_v4 = vpop.f32.mrf.mxu2  ;;  %v1771_v38 = vand.u32 4294901760, %v1770_v50 }
 0x291   :  { %v6988_v42 = vadd.f32 %v2252_v28, %v1629_v4  ;;  %8907 = vst [vmem:[#allocation347_spill] sm:$0xff] %v6998_v3  ;;  %v1258_v28 = vsub.f32 %v6970_v40, %v8495_v30  ;;  %v7007_v4 = vsub.f32 %v743_v11, %v6995_v44  ;;  %v237_v11 = vpop.trf.xlu1 }
 0x292   :  { %v2256_v10 = vpop.f32.mrf.mxu3 }
 0x293   :  { %8903 = vst [vmem:[#allocation343_spill] sm:$0xff] %v6988_v42  ;;  %v6990_v18 = vpop.f32.mrf.mxu0  ;;  %v6992_v26 = vpop.f32.mrf.mxu1  ;;  %v746_v42 = vsel %vm366_vm0, %v364_v57, 0  ;;  %v1259_v30 = vand.u32 4294901760, %v1258_v28  ;;  %v8913_v57 = vand.u32 4294901760, %v6998_v3 }
 0x294   :  { %8904 = vst [vmem:[#allocation344_spill] sm:$0xff] %v6990_v18 }
 0x295   :  { %8905 = vst [vmem:[#allocation345_spill] sm:$0xff] %v6992_v26  ;;  %1764 = vmatmul.f32.gmra.mxu2 %v1763_v5  ;;  %v7014_v5 = vand.u32 4294901760, %v554_v58  ;;  %v365_v28 = vpop.trf.xlu0 }
 0x296   :  { %1252 = vmatmul.f32.gmra.mxu0 %v1251_v36  ;;  %2067 = vmatmul.f32.gmra.mxu1 %v6958_v46  ;;  %8908 = vst [vmem:[#allocation348_spill] sm:$0xff] %v7007_v4  ;;  %v7023_v46 = vand.u32 4294901760, %v746_v42 }
 0x297   :  { %2323 = vmatmul.f32.gmra.mxu3 %v6967_v12  ;;  %v7026_v36 = vsub.f32 %v554_v58, %v7014_v5 }
 0x298   :  { %v1637_v1 = vpop.f32.mrf.mxu2  ;;  %8912 = vst [vmem:[#allocation352_spill] sm:$0xff] %v7023_v46  ;;  %v7035_v40 = vsub.f32 %v746_v42, %v7023_v46 }
 0x299   :  { %v7016_v26 = vadd.f32 %v2256_v10, %v1637_v1  ;;  %v1266_v10 = vsub.f32 %v6998_v3, %v8913_v57  ;;  %v557_v1 = vsel %vm366_vm0, %v237_v11, 0  ;;  %v749_v57 = vsel %vm366_vm0, %v365_v28, 0 }
 0x29a   :  { %v2260_v48 = vpop.f32.mrf.mxu3  ;;  %8914 = vst [vmem:[#allocation353_spill] sm:$0xff] %v7035_v40  ;;  %v7042_v16 = vand.u32 4294901760, %v557_v1  ;;  %v8513_v42 = vand.u32 4294901760, %v7035_v40  ;;  %v7051_v3 = vand.u32 4294901760, %v749_v57 }
 0x29b   :  { %8909 = vst [vmem:[#allocation349_spill] sm:$0xff] %v7016_v26  ;;  %v7018_v18 = vpop.f32.mrf.mxu0  ;;  %v7020_v12 = vpop.f32.mrf.mxu1 }
 0x29c   :  { %8910 = vst [vmem:[#allocation350_spill] sm:$0xff] %v7018_v18  ;;  %v7054_v26 = vsub.f32 %v557_v1, %v7042_v16 }
 0x29d   :  { %8911 = vst [vmem:[#allocation351_spill] sm:$0xff] %v7020_v12  ;;  %1772 = vmatmul.f32.gmra.mxu2 %v1771_v38  ;;  %v1267_v38 = vand.u32 4294901760, %v1266_v10  ;;  %v8919_v10 = vand.u32 4294901760, %v7026_v36 }
 0x29e   :  { %1260 = vmatmul.f32.gmra.mxu0 %v1259_v30  ;;  %2071 = vmatmul.f32.gmra.mxu1 %v6986_v20  ;;  %v8915_v30 = vand.u32 4294901760, %v7007_v4  ;;  %8918 = vst [vmem:[#allocation356_spill] sm:$0xff] %v7051_v3  ;;  %v8516_v1 = vand.u32 4294901760, %v7054_v26 }
 0x29f   :  { %2327 = vmatmul.f32.gmra.mxu3 %v6995_v44  ;;  %v1274_v28 = vsub.f32 %v7026_v36, %v8919_v10 }
 0x2a0   :  { %v1778_v58 = vsub.f32 %v7007_v4, %v8915_v30  ;;  %v1645_v50 = vpop.f32.mrf.mxu2 }
 0x2a1   :  { %v7044_v12 = vadd.f32 %v2260_v48, %v1645_v50  ;;  %v7062_v48 = vsub.f32 %v749_v57, %v7051_v3  ;;  %v1282_v57 = vsub.f32 %v7054_v26, %v8516_v1 }
 0x2a2   :  { %v2264_v11 = vpop.f32.mrf.mxu3  ;;  %v1779_v30 = vand.u32 4294901760, %v1778_v58  ;;  %v1786_v58 = vsub.f32 %v7035_v40, %v8513_v42 }
 0x2a3   :  { %8916 = vst [vmem:[#allocation354_spill] sm:$0xff] %v7044_v12  ;;  %v7046_v18 = vpop.f32.mrf.mxu0  ;;  %v7048_v44 = vpop.f32.mrf.mxu1 }
 0x2a4   :  { %8917 = vst [vmem:[#allocation355_spill] sm:$0xff] %v7048_v44  ;;  %v1787_v44 = vand.u32 4294901760, %v1786_v58 }
 0x2a5   :  { %1780 = vmatmul.f32.gmra.mxu2 %v1779_v30  ;;  %8920 = vst [vmem:[#allocation357_spill] sm:$0xff] %v7062_v48 }
 0x2a6   :  { %1268 = vmatmul.f32.gmra.mxu0 %v1267_v38  ;;  %2075 = vmatmul.f32.gmra.mxu1 %v7014_v5  ;;  %v1275_v38 = vand.u32 4294901760, %v1274_v28 }
 0x2a7   :  { %2331 = vmatmul.f32.gmra.mxu3 %v7023_v46  ;;  %v8519_v46 = vand.u32 4294901760, %v7062_v48 }
 0x2a8   :  { %v1653_v50 = vpop.f32.mrf.mxu2 }
 0x2a9   :  { %v7068_v12 = vadd.f32 %v2264_v11, %v1653_v50  ;;  %v1794_v11 = vsub.f32 %v7062_v48, %v8519_v46  ;;  %v1283_v50 = vand.u32 4294901760, %v1282_v57 }
 0x2aa   :  { %v2268_v4 = vpop.f32.mrf.mxu3 }
 0x2ab   :  { %8921 = vst [vmem:[#allocation358_spill] sm:$0xff] %v7068_v12  ;;  %v7070_v10 = vpop.f32.mrf.mxu0  ;;  %v7072_v30 = vpop.f32.mrf.mxu1  ;;  %v1795_v40 = vand.u32 4294901760, %v1794_v11 }
 0x2ad   :  { %1788 = vmatmul.f32.gmra.mxu2 %v1787_v44  ;;  %v8923_v44 = vand.u32 4294901760, %v5277_v51 }
 0x2ae   :  { %1276 = vmatmul.f32.gmra.mxu0 %v1275_v38  ;;  %2079 = vmatmul.f32.gmra.mxu1 %v7042_v16 }
 0x2af   :  { %2335 = vmatmul.f32.gmra.mxu3 %v7051_v3 }
 0x2b0   :  { %v1661_v28 = vpop.f32.mrf.mxu2 }
 0x2b1   :  { %v7083_v42 = vadd.f32 %v2268_v4, %v1661_v28 }
 0x2b2   :  { %v2272_v12 = vpop.f32.mrf.mxu3 }
 0x2b3   :  { %8922 = vst [vmem:[#allocation359_spill] sm:$0xff] %v7083_v42  ;;  %v7085_v58 = vpop.f32.mrf.mxu0  ;;  %v7087_v38 = vpop.f32.mrf.mxu1 }
 0x2b5   :  { %1796 = vmatmul.f32.gmra.mxu2 %v1795_v40  ;;  %v8925_v40 = vand.u32 4294901760, %v5299_v2 }
 0x2b6   :  { %1284 = vmatmul.f32.gmra.mxu0 %v1283_v50  ;;  %4341 = vmatmul.f32.vlgmr.msrb.gmra.mxu1 %v5271_v49 }
 0x2b7   :  { %3021 = vmatmul.f32.vlgmr.msrb.gmra.mxu3 %v8923_v44 }
 0x2b8   :  { %v1669_v1 = vpop.f32.mrf.mxu2 }
 0x2b9   :  { %v7092_v3 = vadd.f32 %v2272_v12, %v1669_v1 }
 0x2ba   :  { %v2276_v46 = vpop.f32.mrf.mxu3 }
 0x2bb   :  { %8924 = vst [vmem:[#allocation360_spill] sm:$0xff] %v7092_v3  ;;  %v7094_v57 = vpop.f32.mrf.mxu0  ;;  %v7096_v4 = vpop.f32.mrf.mxu1 }
 0x2bd   :  { %2361 = vmatmul.f32.vlgmr.msrb.gmra.mxu2 %v5277_v51 }
 0x2be   :  { %3810 = vmatmul.f32.vlgmr.msrb.gmra.mxu0 %v5271_v49  ;;  %4345 = vmatmul.f32.gmra.mxu1 %v5293_v62  ;;  %v8927_v49 = vand.u32 4294901760, %v5321_v17 }
 0x2bf   :  { %3027 = vmatmul.f32.gmra.mxu3 %v8925_v40 }
 0x2c0   :  { %v1677_v11 = vpop.f32.mrf.mxu2 }
 0x2c1   :  { %v7103_v28 = vadd.f32 %v2276_v46, %v1677_v11 }
 0x2c2   :  { %v2280_v50 = vpop.f32.mrf.mxu3 }
 0x2c3   :  { %8926 = vst [vmem:[#allocation361_spill] sm:$0xff] %v7103_v28  ;;  %v7105_v12 = vpop.f32.mrf.mxu0  ;;  %v7107_v1 = vpop.f32.mrf.mxu1 }
 0x2c5   :  { %2366 = vmatmul.f32.gmra.mxu2 %v5299_v2 }
 0x2c6   :  { %3814 = vmatmul.f32.gmra.mxu0 %v5293_v62  ;;  %4349 = vmatmul.f32.gmra.mxu1 %v5315_v13  ;;  %v8929_v62 = vand.u32 4294901760, %v5343_v31 }
 0x2c7   :  { %3033 = vmatmul.f32.gmra.mxu3 %v8927_v49 }
 0x2c8   :  { %v1685_v51 = vpop.f32.mrf.mxu2 }
 0x2c9   :  { %v7114_v44 = vadd.f32 %v2280_v50, %v1685_v51 }
 0x2ca   :  { %v2284_v40 = vpop.f32.mrf.mxu3 }
 0x2cb   :  { %8928 = vst [vmem:[#allocation362_spill] sm:$0xff] %v7114_v44  ;;  %v7116_v46 = vpop.f32.mrf.mxu0  ;;  %v7118_v11 = vpop.f32.mrf.mxu1 }
 0x2cd   :  { %2371 = vmatmul.f32.gmra.mxu2 %v5321_v17 }
 0x2ce   :  { %3818 = vmatmul.f32.gmra.mxu0 %v5315_v13  ;;  %4353 = vmatmul.f32.gmra.mxu1 %v5337_v27  ;;  %v8931_v13 = vand.u32 4294901760, %v5365_v45 }
 0x2cf   :  { %3039 = vmatmul.f32.gmra.mxu3 %v8929_v62 }
 0x2d0   :  { %v1693_v2 = vpop.f32.mrf.mxu2 }
 0x2d1   :  { %v7125_v28 = vadd.f32 %v2284_v40, %v1693_v2 }
 0x2d2   :  { %v2288_v49 = vpop.f32.mrf.mxu3 }
 0x2d3   :  { %8930 = vst [vmem:[#allocation363_spill] sm:$0xff] %v7125_v28  ;;  %v7127_v50 = vpop.f32.mrf.mxu0  ;;  %v7129_v51 = vpop.f32.mrf.mxu1 }
 0x2d5   :  { %2376 = vmatmul.f32.gmra.mxu2 %v5343_v31 }
 0x2d6   :  { %3822 = vmatmul.f32.gmra.mxu0 %v5337_v27  ;;  %4357 = vmatmul.f32.gmra.mxu1 %v5359_v41  ;;  %v8933_v27 = vand.u32 4294901760, %v5387_v7 }
 0x2d7   :  { %3045 = vmatmul.f32.gmra.mxu3 %v8931_v13 }
 0x2d8   :  { %v1701_v17 = vpop.f32.mrf.mxu2 }
 0x2d9   :  { %v7136_v44 = vadd.f32 %v2288_v49, %v1701_v17 }
 0x2da   :  { %v2292_v62 = vpop.f32.mrf.mxu3 }
 0x2db   :  { %8932 = vst [vmem:[#allocation364_spill] sm:$0xff] %v7136_v44  ;;  %v7138_v40 = vpop.f32.mrf.mxu0  ;;  %v7140_v2 = vpop.f32.mrf.mxu1 }
 0x2dd   :  { %2381 = vmatmul.f32.gmra.mxu2 %v5365_v45 }
 0x2de   :  { %3826 = vmatmul.f32.gmra.mxu0 %v5359_v41  ;;  %4361 = vmatmul.f32.gmra.mxu1 %v5381_v63  ;;  %v8935_v41 = vand.u32 4294901760, %v5409_v29 }
 0x2df   :  { %3051 = vmatmul.f32.gmra.mxu3 %v8933_v27 }
 0x2e0   :  { %v1709_v31 = vpop.f32.mrf.mxu2 }
 0x2e1   :  { %v7147_v28 = vadd.f32 %v2292_v62, %v1709_v31 }
 0x2e2   :  { %v2296_v13 = vpop.f32.mrf.mxu3 }
 0x2e3   :  { %8934 = vst [vmem:[#allocation365_spill] sm:$0xff] %v7147_v28  ;;  %v7149_v49 = vpop.f32.mrf.mxu0  ;;  %v7151_v17 = vpop.f32.mrf.mxu1 }
 0x2e5   :  { %2386 = vmatmul.f32.gmra.mxu2 %v5387_v7 }
 0x2e6   :  { %3830 = vmatmul.f32.gmra.mxu0 %v5381_v63  ;;  %4365 = vmatmul.f32.gmra.mxu1 %v5403_v23  ;;  %v8937_v63 = vand.u32 4294901760, %v5431_v0 }
 0x2e7   :  { %3057 = vmatmul.f32.gmra.mxu3 %v8935_v41 }
 0x2e8   :  { %v1717_v45 = vpop.f32.mrf.mxu2 }
 0x2e9   :  { %v7158_v44 = vadd.f32 %v2296_v13, %v1717_v45 }
 0x2ea   :  { %v2300_v27 = vpop.f32.mrf.mxu3 }
 0x2eb   :  { %8936 = vst [vmem:[#allocation366_spill] sm:$0xff] %v7158_v44  ;;  %v7160_v62 = vpop.f32.mrf.mxu0  ;;  %v7162_v31 = vpop.f32.mrf.mxu1 }
 0x2ed   :  { %2391 = vmatmul.f32.gmra.mxu2 %v5409_v29 }
 0x2ee   :  { %3834 = vmatmul.f32.gmra.mxu0 %v5403_v23  ;;  %4369 = vmatmul.f32.gmra.mxu1 %v5425_v56  ;;  %v8939_v23 = vand.u32 4294901760, %v5453_v43 }
 0x2ef   :  { %3063 = vmatmul.f32.gmra.mxu3 %v8937_v63 }
 0x2f0   :  { %v1725_v7 = vpop.f32.mrf.mxu2 }
 0x2f1   :  { %v7169_v28 = vadd.f32 %v2300_v27, %v1725_v7 }
 0x2f2   :  { %v2304_v41 = vpop.f32.mrf.mxu3 }
 0x2f3   :  { %8938 = vst [vmem:[#allocation367_spill] sm:$0xff] %v7169_v28  ;;  %v7171_v13 = vpop.f32.mrf.mxu0  ;;  %v7173_v45 = vpop.f32.mrf.mxu1 }
 0x2f5   :  { %2396 = vmatmul.f32.gmra.mxu2 %v5431_v0 }
 0x2f6   :  { %3838 = vmatmul.f32.gmra.mxu0 %v5425_v56  ;;  %4373 = vmatmul.f32.gmra.mxu1 %v5447_v37  ;;  %v8941_v56 = vand.u32 4294901760, %v5475_v9 }
 0x2f7   :  { %3069 = vmatmul.f32.gmra.mxu3 %v8939_v23 }
 0x2f8   :  { %v1733_v29 = vpop.f32.mrf.mxu2 }
 0x2f9   :  { %v7180_v44 = vadd.f32 %v2304_v41, %v1733_v29 }
 0x2fa   :  { %v2308_v63 = vpop.f32.mrf.mxu3 }
 0x2fb   :  { %8940 = vst [vmem:[#allocation368_spill] sm:$0xff] %v7180_v44  ;;  %v7182_v27 = vpop.f32.mrf.mxu0  ;;  %v7184_v7 = vpop.f32.mrf.mxu1 }
 0x2fd   :  { %2401 = vmatmul.f32.gmra.mxu2 %v5453_v43 }
 0x2fe   :  { %3842 = vmatmul.f32.gmra.mxu0 %v5447_v37  ;;  %4377 = vmatmul.f32.gmra.mxu1 %v5469_v39  ;;  %v8943_v37 = vand.u32 4294901760, %v5497_v53 }
 0x2ff   :  { %3075 = vmatmul.f32.gmra.mxu3 %v8941_v56 }
 0x300   :  { %v1741_v0 = vpop.f32.mrf.mxu2 }
 0x301   :  { %v7191_v28 = vadd.f32 %v2308_v63, %v1741_v0 }
 0x302   :  { %v2312_v23 = vpop.f32.mrf.mxu3 }
 0x303   :  { %8942 = vst [vmem:[#allocation369_spill] sm:$0xff] %v7191_v28  ;;  %v7193_v41 = vpop.f32.mrf.mxu0  ;;  %v7195_v29 = vpop.f32.mrf.mxu1 }
 0x305   :  { %2406 = vmatmul.f32.gmra.mxu2 %v5475_v9  ;;  %v8945_v9 = vand.u32 4294901760, %v5519_v15 }
 0x306   :  { %3846 = vmatmul.f32.gmra.mxu0 %v5469_v39  ;;  %4381 = vmatmul.f32.gmra.mxu1 %v5491_v33 }
 0x307   :  { %3081 = vmatmul.f32.gmra.mxu3 %v8943_v37 }
 0x308   :  { %v1749_v43 = vpop.f32.mrf.mxu2 }
 0x309   :  { %v7202_v44 = vadd.f32 %v2312_v23, %v1749_v43 }
 0x30a   :  { %v2316_v56 = vpop.f32.mrf.mxu3 }
 0x30b   :  { %8944 = vst [vmem:[#allocation370_spill] sm:$0xff] %v7202_v44  ;;  %v7204_v63 = vpop.f32.mrf.mxu0  ;;  %v7206_v0 = vpop.f32.mrf.mxu1 }
 0x30d   :  { %2411 = vmatmul.f32.gmra.mxu2 %v5497_v53  ;;  %v8947_v53 = vand.u32 4294901760, %v5543_v21 }
 0x30e   :  { %3850 = vmatmul.f32.gmra.mxu0 %v5491_v33  ;;  %4385 = vmatmul.f32.gmra.mxu1 %v5513_v54 }
 0x30f   :  { %3087 = vmatmul.f32.gmra.mxu3 %v8945_v9 }
 0x310   :  { %v1757_v39 = vpop.f32.mrf.mxu2 }
 0x311   :  { %v7213_v28 = vadd.f32 %v2316_v56, %v1757_v39 }
 0x312   :  { %v2320_v37 = vpop.f32.mrf.mxu3 }
 0x313   :  { %8946 = vst [vmem:[#allocation371_spill] sm:$0xff] %v7213_v28  ;;  %v7215_v23 = vpop.f32.mrf.mxu0  ;;  %v7217_v43 = vpop.f32.mrf.mxu1 }
 0x315   :  { %2416 = vmatmul.f32.gmra.mxu2 %v5519_v15 }
 0x316   :  { %3854 = vmatmul.f32.gmra.mxu0 %v5513_v54  ;;  %4389 = vmatmul.f32.gmra.mxu1 %v5537_v32  ;;  %v8950_v54 = vand.u32 4294901760, %v5567_v19 }
 0x317   :  { %3093 = vmatmul.f32.gmra.mxu3 %v8947_v53 }
 0x318   :  { %v1765_v33 = vpop.f32.mrf.mxu2 }
 0x319   :  { %v7224_v44 = vadd.f32 %v2320_v37, %v1765_v33 }
 0x31a   :  { %v2324_v9 = vpop.f32.mrf.mxu3 }
 0x31b   :  { %8948 = vst [vmem:[#allocation372_spill] sm:$0xff] %v7224_v44  ;;  %v7226_v56 = vpop.f32.mrf.mxu0  ;;  %v7228_v39 = vpop.f32.mrf.mxu1 }
 0x31c   :  { %8949 = vst [vmem:[#allocation373_spill] sm:$0xff] %v7228_v39 }
 0x31d   :  { %2421 = vmatmul.f32.gmra.mxu2 %v5543_v21 }
 0x31e   :  { %3858 = vmatmul.f32.gmra.mxu0 %v5537_v32  ;;  %4393 = vmatmul.f32.gmra.mxu1 %v5561_v34  ;;  %v8953_v32 = vand.u32 4294901760, %v5591_v8 }
 0x31f   :  { %3099 = vmatmul.f32.gmra.mxu3 %v8950_v54 }
 0x320   :  { %v1773_v15 = vpop.f32.mrf.mxu2 }
 0x321   :  { %v7235_v28 = vadd.f32 %v2324_v9, %v1773_v15 }
 0x322   :  { %v2328_v53 = vpop.f32.mrf.mxu3 }
 0x323   :  { %8951 = vst [vmem:[#allocation374_spill] sm:$0xff] %v7235_v28  ;;  %v7237_v37 = vpop.f32.mrf.mxu0  ;;  %v7239_v33 = vpop.f32.mrf.mxu1 }
 0x324   :  { %8952 = vst [vmem:[#allocation375_spill] sm:$0xff] %v7239_v33  ;;  %v8969_v33 = vld [vmem:[#allocation49_spill] sm:$0xff] }
 0x325   :  { %2426 = vmatmul.f32.gmra.mxu2 %v5567_v19 }
 0x326   :  { %3862 = vmatmul.f32.gmra.mxu0 %v5561_v34  ;;  %4397 = vmatmul.f32.gmra.mxu1 %v5585_v47  ;;  %v8957_v34 = vand.u32 4294901760, %v5619_v52 }
 0x327   :  { %3105 = vmatmul.f32.gmra.mxu3 %v8953_v32 }
 0x328   :  { %v1781_v21 = vpop.f32.mrf.mxu2 }
 0x329   :  { %v7246_v44 = vadd.f32 %v2328_v53, %v1781_v21 }
 0x32a   :  { %v2332_v54 = vpop.f32.mrf.mxu3 }
 0x32b   :  { %8954 = vst [vmem:[#allocation376_spill] sm:$0xff] %v7246_v44  ;;  %v7248_v9 = vpop.f32.mrf.mxu0  ;;  %v7250_v15 = vpop.f32.mrf.mxu1 }
 0x32c   :  { %8955 = vst [vmem:[#allocation377_spill] sm:$0xff] %v7248_v9 }
 0x32d   :  { %8956 = vst [vmem:[#allocation378_spill] sm:$0xff] %v7250_v15  ;;  %2431 = vmatmul.f32.gmra.mxu2 %v5591_v8  ;;  %v8966_v15 = vld [vmem:[#allocation57_spill] sm:$0xff] }
 0x32e   :  { %3866 = vmatmul.f32.gmra.mxu0 %v5585_v47  ;;  %4401 = vmatmul.f32.gmra.mxu1 %v5611_v14  ;;  %v8960_v47 = vand.u32 4294901760, %v5647_v22 }
 0x32f   :  { %3111 = vmatmul.f32.gmra.mxu3 %v8957_v34 }
 0x330   :  { %v1789_v19 = vpop.f32.mrf.mxu2 }
 0x331   :  { %v7257_v28 = vadd.f32 %v2332_v54, %v1789_v19  ;;  %v8964_v19 = vld [vmem:[#allocation45_spill] sm:$0xff] }
 0x332   :  { %v2336_v32 = vpop.f32.mrf.mxu3 }
 0x333   :  { %8958 = vst [vmem:[#allocation379_spill] sm:$0xff] %v7257_v28  ;;  %v7259_v53 = vpop.f32.mrf.mxu0  ;;  %v4342_v21 = vpop.f32.mrf.mxu1 }
 0x334   :  { %8959 = vst [vmem:[#allocation380_spill] sm:$0xff] %v7259_v53  ;;  %v8967_v53 = vand.u32 4294901760, %v8966_v15 }
 0x335   :  { %2436 = vmatmul.f32.gmra.mxu2 %v5619_v52  ;;  %v8963_v52 = vld [vmem:[#allocation48_spill] sm:$0xff] }
 0x336   :  { %3870 = vmatmul.f32.gmra.mxu0 %v5611_v14  ;;  %4405 = vmatmul.f32.gmra.mxu1 %v5641_v55  ;;  %v8962_v14 = vand.u32 4294901760, %v5676_v25  ;;  %v1829_v28 = vadd.f32 %v8964_v19, %v8963_v52 }
 0x337   :  { %3117 = vmatmul.f32.gmra.mxu3 %v8960_v47 }
 0x338   :  { %v1797_v8 = vpop.f32.mrf.mxu2 }
 0x339   :  { %v7266_v44 = vadd.f32 %v2336_v32, %v1797_v8 }
 0x33a   :  { %v3022_v34 = vpop.f32.mrf.mxu3 }
 0x33b   :  { %8961 = vst [vmem:[#allocation381_spill] sm:$0xff] %v7266_v44  ;;  %v3811_v3 = vpop.f32.mrf.mxu0  ;;  %v4346_v54 = vpop.f32.mrf.mxu1 }
 0x33d   :  { %2441 = vmatmul.f32.gmra.mxu2 %v5647_v22 }
 0x33e   :  { %3874 = vmatmul.f32.gmra.mxu0 %v5641_v55  ;;  %4409 = vmatmul.f32.gmra.mxu1 %v5668_v6  ;;  %v8965_v55 = vld [vmem:[#allocation54_spill] sm:$0xff] }
 0x33f   :  { %3123 = vmatmul.f32.gmra.mxu3 %v8962_v14  ;;  %v8968_v14 = vld [vmem:[#allocation53_spill] sm:$0xff] }
 0x340   :  { %v2362_v42 = vpop.f32.mrf.mxu2  ;;  %v1833_v9 = vadd.f32 %v8969_v33, %v8968_v14  ;;  %v8974_v33 = vld [vmem:[#allocation55_spill] sm:$0xff] }
 0x341   :  { %v2363_v47 = vadd.f32 %v2362_v42, %v1829_v28 }
 0x342   :  { %v3028_v48 = vpop.f32.mrf.mxu3 }
 0x343   :  { %v3815_v32 = vpop.f32.mrf.mxu0  ;;  %v4350_v8 = vpop.f32.mrf.mxu1  ;;  %v3023_v44 = vadd.f32 %v3022_v34, %v2363_v47 }
 0x345   :  { %2446 = vmatmul.f32.gmra.mxu2 %v5676_v25  ;;  %v3812_v22 = vadd.f32 %v3811_v3, %v3023_v44  ;;  %v8970_v25 = vld [vmem:[#allocation61_spill] sm:$0xff]  ;;  %v8971_v3 = vld [vmem:[#allocation64_spill] sm:$0xff] }
 0x346   :  { %3878 = vmatmul.f32.gmra.mxu0 %v5668_v6  ;;  %4413 = vmatmul.f32.gmra.mxu1 %v8965_v55  ;;  %v8972_v44 = vand.u32 4294901760, %v8971_v3 }
 0x347   :  { %3129 = vmatmul.f32.gmra.mxu3 %v8967_v53  ;;  %v4343_v52 = vadd.f32 %v4342_v21, %v3812_v22  ;;  %v8973_v53 = vld [vmem:[#allocation60_spill] sm:$0xff] }
 0x348   :  { %v2367_v19 = vpop.f32.mrf.mxu2  ;;  %v1837_v21 = vadd.f32 %v8974_v33, %v8973_v53  ;;  %v8979_v53 = vld [vmem:[#allocation62_spill] sm:$0xff] }
 0x349   :  { %v2368_v42 = vadd.f32 %v2367_v19, %v1833_v9  ;;  %4853 = vxpose.xlu2.b32.start [1/16] (narrow) %v4343_v52, 16 }
 0x34a   :  { %v3034_v28 = vpop.f32.mrf.mxu3 }
 0x34b   :  { %v3819_v39 = vpop.f32.mrf.mxu0  ;;  %v4354_v34 = vpop.f32.mrf.mxu1  ;;  %v3029_v47 = vadd.f32 %v3028_v48, %v2368_v42 }
 0x34d   :  { %v3816_v6 = vadd.f32 %v3815_v32, %v3029_v47  ;;  %2451 = vmatmul.f32.gmra.mxu2 %v8966_v15  ;;  %v8975_v15 = vld [vmem:[#allocation68_spill] sm:$0xff] }
 0x34e   :  { %3882 = vmatmul.f32.gmra.mxu0 %v8965_v55  ;;  %4417 = vmatmul.f32.gmra.mxu1 %v8970_v25  ;;  %v8976_v55 = vld [vmem:[#allocation71_spill] sm:$0xff] }
 0x34f   :  { %3135 = vmatmul.f32.gmra.mxu3 %v8972_v44  ;;  %v4347_v22 = vadd.f32 %v4346_v54, %v3816_v6  ;;  %v8977_v47 = vand.u32 4294901760, %v8976_v55  ;;  %v8978_v44 = vld [vmem:[#allocation67_spill] sm:$0xff] }
 0x350   :  { %v2372_v9 = vpop.f32.mrf.mxu2  ;;  %v1841_v54 = vadd.f32 %v8979_v53, %v8978_v44  ;;  %v8984_v44 = vld [vmem:[#allocation69_spill] sm:$0xff] }
 0x351   :  { %v2373_v14 = vadd.f32 %v2372_v9, %v1837_v21  ;;  %4854 = vxpose.xlu2.b32.cont [2/16] (narrow) %v4347_v22, 16 }
 0x352   :  { %v3040_v52 = vpop.f32.mrf.mxu3 }
 0x353   :  { %v3823_v19 = vpop.f32.mrf.mxu0  ;;  %v4358_v48 = vpop.f32.mrf.mxu1  ;;  %v3035_v42 = vadd.f32 %v3034_v28, %v2373_v14 }
 0x355   :  { %v3820_v32 = vadd.f32 %v3819_v39, %v3035_v42  ;;  %2456 = vmatmul.f32.gmra.mxu2 %v8971_v3  ;;  %v8981_v3 = vld [vmem:[#allocation78_spill] sm:$0xff] }
 0x356   :  { %3886 = vmatmul.f32.gmra.mxu0 %v8970_v25  ;;  %4421 = vmatmul.f32.gmra.mxu1 %v8975_v15  ;;  %v8980_v25 = vld [vmem:[#allocation75_spill] sm:$0xff]  ;;  %v8982_v42 = vand.u32 4294901760, %v8981_v3 }
 0x357   :  { %3141 = vmatmul.f32.gmra.mxu3 %v8977_v47  ;;  %v4351_v6 = vadd.f32 %v4350_v8, %v3820_v32  ;;  %v8983_v47 = vld [vmem:[#allocation74_spill] sm:$0xff] }
 0x358   :  { %v2377_v33 = vpop.f32.mrf.mxu2  ;;  %v1845_v8 = vadd.f32 %v8984_v44, %v8983_v47  ;;  %v8989_v47 = vld [vmem:[#allocation76_spill] sm:$0xff] }
 0x359   :  { %v2378_v21 = vadd.f32 %v2377_v33, %v1841_v54  ;;  %4855 = vxpose.xlu2.b32.cont [3/16] (narrow) %v4351_v6, 16 }
 0x35a   :  { %v3046_v22 = vpop.f32.mrf.mxu3 }
 0x35b   :  { %v3827_v9 = vpop.f32.mrf.mxu0  ;;  %v4362_v28 = vpop.f32.mrf.mxu1  ;;  %v3041_v14 = vadd.f32 %v3040_v52, %v2378_v21 }
 0x35d   :  { %v3824_v39 = vadd.f32 %v3823_v19, %v3041_v14  ;;  %2461 = vmatmul.f32.gmra.mxu2 %v8976_v55  ;;  %v8986_v55 = vld [vmem:[#allocation85_spill] sm:$0xff] }
 0x35e   :  { %3890 = vmatmul.f32.gmra.mxu0 %v8975_v15  ;;  %4425 = vmatmul.f32.gmra.mxu1 %v8980_v25  ;;  %v8985_v15 = vld [vmem:[#allocation82_spill] sm:$0xff]  ;;  %v8987_v14 = vand.u32 4294901760, %v8986_v55 }
 0x35f   :  { %3147 = vmatmul.f32.gmra.mxu3 %v8982_v42  ;;  %v4355_v32 = vadd.f32 %v4354_v34, %v3824_v39  ;;  %v8988_v42 = vld [vmem:[#allocation81_spill] sm:$0xff] }
 0x360   :  { %v2382_v53 = vpop.f32.mrf.mxu2  ;;  %v1849_v34 = vadd.f32 %v8989_v47, %v8988_v42  ;;  %v8994_v42 = vld [vmem:[#allocation83_spill] sm:$0xff] }
 0x361   :  { %v2383_v54 = vadd.f32 %v2382_v53, %v1845_v8  ;;  %4856 = vxpose.xlu2.b32.cont [4/16] (narrow) %v4355_v32, 16 }
 0x362   :  { %v3052_v6 = vpop.f32.mrf.mxu3 }
 0x363   :  { %v3831_v33 = vpop.f32.mrf.mxu0  ;;  %v4366_v52 = vpop.f32.mrf.mxu1  ;;  %v3047_v21 = vadd.f32 %v3046_v22, %v2383_v54 }
 0x365   :  { %v3828_v19 = vadd.f32 %v3827_v9, %v3047_v21  ;;  %2466 = vmatmul.f32.gmra.mxu2 %v8981_v3  ;;  %v8991_v3 = vld [vmem:[#allocation92_spill] sm:$0xff] }
 0x366   :  { %3894 = vmatmul.f32.gmra.mxu0 %v8980_v25  ;;  %4429 = vmatmul.f32.gmra.mxu1 %v8985_v15  ;;  %v8990_v25 = vld [vmem:[#allocation89_spill] sm:$0xff]  ;;  %v8992_v21 = vand.u32 4294901760, %v8991_v3 }
 0x367   :  { %3153 = vmatmul.f32.gmra.mxu3 %v8987_v14  ;;  %v4359_v39 = vadd.f32 %v4358_v48, %v3828_v19  ;;  %v8993_v14 = vld [vmem:[#allocation88_spill] sm:$0xff] }
 0x368   :  { %v2387_v44 = vpop.f32.mrf.mxu2  ;;  %v1853_v48 = vadd.f32 %v8994_v42, %v8993_v14  ;;  %v8999_v14 = vld [vmem:[#allocation90_spill] sm:$0xff] }
 0x369   :  { %v2388_v8 = vadd.f32 %v2387_v44, %v1849_v34  ;;  %4857 = vxpose.xlu2.b32.cont [5/16] (narrow) %v4359_v39, 16 }
 0x36a   :  { %v3058_v32 = vpop.f32.mrf.mxu3 }
 0x36b   :  { %v3835_v53 = vpop.f32.mrf.mxu0  ;;  %v4370_v22 = vpop.f32.mrf.mxu1  ;;  %v3053_v54 = vadd.f32 %v3052_v6, %v2388_v8 }
 0x36d   :  { %v3832_v9 = vadd.f32 %v3831_v33, %v3053_v54  ;;  %2471 = vmatmul.f32.gmra.mxu2 %v8986_v55  ;;  %v8996_v55 = vld [vmem:[#allocation99_spill] sm:$0xff] }
 0x36e   :  { %3898 = vmatmul.f32.gmra.mxu0 %v8985_v15  ;;  %4433 = vmatmul.f32.gmra.mxu1 %v8990_v25  ;;  %v8995_v15 = vld [vmem:[#allocation96_spill] sm:$0xff]  ;;  %v8997_v54 = vand.u32 4294901760, %v8996_v55 }
 0x36f   :  { %3159 = vmatmul.f32.gmra.mxu3 %v8992_v21  ;;  %v4363_v19 = vadd.f32 %v4362_v28, %v3832_v9  ;;  %v8998_v21 = vld [vmem:[#allocation95_spill] sm:$0xff] }
 0x370   :  { %v2392_v47 = vpop.f32.mrf.mxu2  ;;  %v1857_v28 = vadd.f32 %v8999_v14, %v8998_v21  ;;  %v9004_v21 = vld [vmem:[#allocation97_spill] sm:$0xff] }
 0x371   :  { %v2393_v34 = vadd.f32 %v2392_v47, %v1853_v48  ;;  %4858 = vxpose.xlu2.b32.cont [6/16] (narrow) %v4363_v19, 16 }
 0x372   :  { %v3064_v39 = vpop.f32.mrf.mxu3 }
 0x373   :  { %v3839_v44 = vpop.f32.mrf.mxu0  ;;  %v4374_v6 = vpop.f32.mrf.mxu1  ;;  %v3059_v8 = vadd.f32 %v3058_v32, %v2393_v34 }
 0x375   :  { %v3836_v33 = vadd.f32 %v3835_v53, %v3059_v8  ;;  %2476 = vmatmul.f32.gmra.mxu2 %v8991_v3  ;;  %v9001_v3 = vld [vmem:[#allocation106_spill] sm:$0xff] }
 0x376   :  { %3902 = vmatmul.f32.gmra.mxu0 %v8990_v25  ;;  %4437 = vmatmul.f32.gmra.mxu1 %v8995_v15  ;;  %v9000_v25 = vld [vmem:[#allocation103_spill] sm:$0xff]  ;;  %v9002_v8 = vand.u32 4294901760, %v9001_v3 }
 0x377   :  { %3165 = vmatmul.f32.gmra.mxu3 %v8997_v54  ;;  %v4367_v9 = vadd.f32 %v4366_v52, %v3836_v33  ;;  %v9003_v54 = vld [vmem:[#allocation102_spill] sm:$0xff] }
 0x378   :  { %v2397_v42 = vpop.f32.mrf.mxu2  ;;  %v1861_v52 = vadd.f32 %v9004_v21, %v9003_v54  ;;  %v9009_v54 = vld [vmem:[#allocation104_spill] sm:$0xff] }
 0x379   :  { %v2398_v48 = vadd.f32 %v2397_v42, %v1857_v28  ;;  %4859 = vxpose.xlu2.b32.cont [7/16] (narrow) %v4367_v9, 16 }
 0x37a   :  { %v3070_v19 = vpop.f32.mrf.mxu3 }
 0x37b   :  { %v3843_v47 = vpop.f32.mrf.mxu0  ;;  %v4378_v32 = vpop.f32.mrf.mxu1  ;;  %v3065_v34 = vadd.f32 %v3064_v39, %v2398_v48 }
 0x37d   :  { %v3840_v53 = vadd.f32 %v3839_v44, %v3065_v34  ;;  %2481 = vmatmul.f32.gmra.mxu2 %v8996_v55  ;;  %v9006_v55 = vld [vmem:[#allocation113_spill] sm:$0xff] }
 0x37e   :  { %3906 = vmatmul.f32.gmra.mxu0 %v8995_v15  ;;  %4441 = vmatmul.f32.gmra.mxu1 %v9000_v25  ;;  %v9005_v15 = vld [vmem:[#allocation110_spill] sm:$0xff]  ;;  %v9007_v34 = vand.u32 4294901760, %v9006_v55 }
 0x37f   :  { %3171 = vmatmul.f32.gmra.mxu3 %v9002_v8  ;;  %v4371_v33 = vadd.f32 %v4370_v22, %v3840_v53  ;;  %v9008_v8 = vld [vmem:[#allocation109_spill] sm:$0xff] }
 0x380   :  { %v2402_v14 = vpop.f32.mrf.mxu2  ;;  %v1865_v22 = vadd.f32 %v9009_v54, %v9008_v8  ;;  %v9014_v8 = vld [vmem:[#allocation111_spill] sm:$0xff] }
 0x381   :  { %v2403_v28 = vadd.f32 %v2402_v14, %v1861_v52  ;;  %4860 = vxpose.xlu2.b32.cont [8/16] (narrow) %v4371_v33, 16 }
 0x382   :  { %v3076_v9 = vpop.f32.mrf.mxu3 }
 0x383   :  { %v3847_v42 = vpop.f32.mrf.mxu0  ;;  %v4382_v39 = vpop.f32.mrf.mxu1  ;;  %v3071_v48 = vadd.f32 %v3070_v19, %v2403_v28 }
 0x385   :  { %v3844_v44 = vadd.f32 %v3843_v47, %v3071_v48  ;;  %2486 = vmatmul.f32.gmra.mxu2 %v9001_v3  ;;  %v9011_v3 = vld [vmem:[#allocation120_spill] sm:$0xff] }
 0x386   :  { %3910 = vmatmul.f32.gmra.mxu0 %v9000_v25  ;;  %4445 = vmatmul.f32.gmra.mxu1 %v9005_v15  ;;  %v9010_v25 = vld [vmem:[#allocation117_spill] sm:$0xff]  ;;  %v9012_v48 = vand.u32 4294901760, %v9011_v3 }
 0x387   :  { %3177 = vmatmul.f32.gmra.mxu3 %v9007_v34  ;;  %v4375_v53 = vadd.f32 %v4374_v6, %v3844_v44  ;;  %v9013_v34 = vld [vmem:[#allocation116_spill] sm:$0xff] }
 0x388   :  { %v2407_v21 = vpop.f32.mrf.mxu2  ;;  %v1869_v6 = vadd.f32 %v9014_v8, %v9013_v34  ;;  %v9019_v34 = vld [vmem:[#allocation118_spill] sm:$0xff] }
 0x389   :  { %v2408_v52 = vadd.f32 %v2407_v21, %v1865_v22  ;;  %4861 = vxpose.xlu2.b32.cont [9/16] (narrow) %v4375_v53, 16 }
 0x38a   :  { %v3082_v33 = vpop.f32.mrf.mxu3 }
 0x38b   :  { %v3851_v14 = vpop.f32.mrf.mxu0  ;;  %v4386_v19 = vpop.f32.mrf.mxu1  ;;  %v3077_v28 = vadd.f32 %v3076_v9, %v2408_v52 }
 0x38d   :  { %v3848_v47 = vadd.f32 %v3847_v42, %v3077_v28  ;;  %2491 = vmatmul.f32.gmra.mxu2 %v9006_v55  ;;  %v9016_v55 = vld [vmem:[#allocation127_spill] sm:$0xff] }
 0x38e   :  { %3914 = vmatmul.f32.gmra.mxu0 %v9005_v15  ;;  %4449 = vmatmul.f32.gmra.mxu1 %v9010_v25  ;;  %v9015_v15 = vld [vmem:[#allocation124_spill] sm:$0xff]  ;;  %v9017_v28 = vand.u32 4294901760, %v9016_v55 }
 0x38f   :  { %3183 = vmatmul.f32.gmra.mxu3 %v9012_v48  ;;  %v4379_v44 = vadd.f32 %v4378_v32, %v3848_v47  ;;  %v9018_v48 = vld [vmem:[#allocation123_spill] sm:$0xff] }
 0x390   :  { %v2412_v54 = vpop.f32.mrf.mxu2  ;;  %v1873_v32 = vadd.f32 %v9019_v34, %v9018_v48  ;;  %v9024_v48 = vld [vmem:[#allocation125_spill] sm:$0xff] }
 0x391   :  { %v2413_v22 = vadd.f32 %v2412_v54, %v1869_v6  ;;  %4862 = vxpose.xlu2.b32.cont [10/16] (narrow) %v4379_v44, 16 }
 0x392   :  { %v3088_v53 = vpop.f32.mrf.mxu3 }
 0x393   :  { %v3855_v21 = vpop.f32.mrf.mxu0  ;;  %v4390_v9 = vpop.f32.mrf.mxu1  ;;  %v3083_v52 = vadd.f32 %v3082_v33, %v2413_v22 }
 0x395   :  { %v3852_v42 = vadd.f32 %v3851_v14, %v3083_v52  ;;  %2496 = vmatmul.f32.gmra.mxu2 %v9011_v3  ;;  %v9021_v3 = vld [vmem:[#allocation134_spill] sm:$0xff] }
 0x396   :  { %3918 = vmatmul.f32.gmra.mxu0 %v9010_v25  ;;  %4453 = vmatmul.f32.gmra.mxu1 %v9015_v15  ;;  %v9020_v25 = vld [vmem:[#allocation131_spill] sm:$0xff]  ;;  %v9022_v52 = vand.u32 4294901760, %v9021_v3 }
 0x397   :  { %3189 = vmatmul.f32.gmra.mxu3 %v9017_v28  ;;  %v4383_v47 = vadd.f32 %v4382_v39, %v3852_v42  ;;  %v9023_v28 = vld [vmem:[#allocation130_spill] sm:$0xff] }
 0x398   :  { %v2417_v8 = vpop.f32.mrf.mxu2  ;;  %v1877_v39 = vadd.f32 %v9024_v48, %v9023_v28  ;;  %v9029_v28 = vld [vmem:[#allocation132_spill] sm:$0xff] }
 0x399   :  { %v2418_v6 = vadd.f32 %v2417_v8, %v1873_v32  ;;  %4863 = vxpose.xlu2.b32.cont [11/16] (narrow) %v4383_v47, 16 }
 0x39a   :  { %v3094_v44 = vpop.f32.mrf.mxu3 }
 0x39b   :  { %v3859_v54 = vpop.f32.mrf.mxu0  ;;  %v4394_v33 = vpop.f32.mrf.mxu1  ;;  %v3089_v22 = vadd.f32 %v3088_v53, %v2418_v6 }
 0x39d   :  { %v3856_v14 = vadd.f32 %v3855_v21, %v3089_v22  ;;  %2501 = vmatmul.f32.gmra.mxu2 %v9016_v55  ;;  %v9026_v55 = vld [vmem:[#allocation141_spill] sm:$0xff] }
 0x39e   :  { %3922 = vmatmul.f32.gmra.mxu0 %v9015_v15  ;;  %4457 = vmatmul.f32.gmra.mxu1 %v9020_v25  ;;  %v9025_v15 = vld [vmem:[#allocation138_spill] sm:$0xff]  ;;  %v9027_v22 = vand.u32 4294901760, %v9026_v55 }
 0x39f   :  { %3195 = vmatmul.f32.gmra.mxu3 %v9022_v52  ;;  %v4387_v42 = vadd.f32 %v4386_v19, %v3856_v14  ;;  %v9028_v52 = vld [vmem:[#allocation137_spill] sm:$0xff] }
 0x3a0   :  { %v2422_v34 = vpop.f32.mrf.mxu2  ;;  %v1881_v19 = vadd.f32 %v9029_v28, %v9028_v52 }
 0x3a1   :  { %v2423_v32 = vadd.f32 %v2422_v34, %v1877_v39  ;;  %4864 = vxpose.xlu2.b32.cont [12/16] (narrow) %v4387_v42, 16 }
 0x3a2   :  { %v3100_v47 = vpop.f32.mrf.mxu3 }
 0x3a3   :  { %v3863_v8 = vpop.f32.mrf.mxu0  ;;  %v4398_v53 = vpop.f32.mrf.mxu1  ;;  %v3095_v6 = vadd.f32 %v3094_v44, %v2423_v32 }
 0x3a5   :  { %v3860_v21 = vadd.f32 %v3859_v54, %v3095_v6  ;;  %2506 = vmatmul.f32.gmra.mxu2 %v9021_v3  ;;  %v9031_v3 = vand.u32 4294901760, %v6120_v60  ;;  %v9032_v6 = vld [vmem:[#allocation145_spill] sm:$0xff] }
 0x3a6   :  { %3926 = vmatmul.f32.gmra.mxu0 %v9020_v25  ;;  %4461 = vmatmul.f32.gmra.mxu1 %v9025_v15  ;;  %v9030_v25 = vld [vmem:[#allocation146_spill] sm:$0xff] }
 0x3a7   :  { %3201 = vmatmul.f32.gmra.mxu3 %v9027_v22  ;;  %v4391_v14 = vadd.f32 %v4390_v9, %v3860_v21  ;;  %v9033_v22 = vld [vmem:[#allocation139_spill] sm:$0xff] }
 0x3a8   :  { %v2427_v48 = vpop.f32.mrf.mxu2  ;;  %v1885_v9 = vadd.f32 %v9033_v22, %v9032_v6 }
 0x3a9   :  { %v2428_v39 = vadd.f32 %v2427_v48, %v1881_v19  ;;  %4865 = vxpose.xlu2.b32.cont [13/16] (narrow) %v4391_v14, 16 }
 0x3aa   :  { %v3106_v42 = vpop.f32.mrf.mxu3 }
 0x3ab   :  { %v3867_v34 = vpop.f32.mrf.mxu0  ;;  %v4402_v44 = vpop.f32.mrf.mxu1  ;;  %v3101_v32 = vadd.f32 %v3100_v47, %v2428_v39 }
 0x3ad   :  { %v3864_v54 = vadd.f32 %v3863_v8, %v3101_v32  ;;  %2511 = vmatmul.f32.gmra.mxu2 %v9026_v55  ;;  %v9035_v55 = vld [vmem:[#allocation149_spill] sm:$0xff] }
 0x3ae   :  { %3930 = vmatmul.f32.gmra.mxu0 %v9025_v15  ;;  %4465 = vmatmul.f32.gmra.mxu1 %v9030_v25  ;;  %v9034_v15 = vld [vmem:[#allocation143_spill] sm:$0xff]  ;;  %v9036_v39 = vand.u32 4294901760, %v9035_v55  ;;  %v9037_v32 = vld [vmem:[#allocation153_spill] sm:$0xff] }
 0x3af   :  { %3207 = vmatmul.f32.gmra.mxu3 %v9031_v3  ;;  %v4395_v21 = vadd.f32 %v4394_v33, %v3864_v54  ;;  %v9038_v3 = vld [vmem:[#allocation147_spill] sm:$0xff] }
 0x3b0   :  { %v2432_v52 = vpop.f32.mrf.mxu2  ;;  %v1889_v33 = vadd.f32 %v9038_v3, %v9037_v32 }
 0x3b1   :  { %v2433_v28 = vadd.f32 %v2432_v52, %v1885_v9  ;;  %4866 = vxpose.xlu2.b32.cont [14/16] (narrow) %v4395_v21, 16 }
 0x3b2   :  { %v3112_v19 = vpop.f32.mrf.mxu3 }
 0x3b3   :  { %v3871_v14 = vpop.f32.mrf.mxu0  ;;  %v4406_v47 = vpop.f32.mrf.mxu1  ;;  %v3107_v48 = vadd.f32 %v3106_v42, %v2433_v28 }
 0x3b5   :  { %v3868_v8 = vadd.f32 %v3867_v34, %v3107_v48  ;;  %2516 = vmatmul.f32.gmra.mxu2 %v6120_v60  ;;  %v9039_v60 = vld [vmem:[#allocation151_spill] sm:$0xff]  ;;  %v9042_v48 = vld [vmem:[#allocation160_spill] sm:$0xff] }
 0x3b6   :  { %3934 = vmatmul.f32.gmra.mxu0 %v9030_v25  ;;  %4469 = vmatmul.f32.gmra.mxu1 %v9034_v15  ;;  %v9040_v25 = vld [vmem:[#allocation156_spill] sm:$0xff] }
 0x3b7   :  { %3213 = vmatmul.f32.gmra.mxu3 %v9036_v39  ;;  %v4399_v54 = vadd.f32 %v4398_v53, %v3868_v8  ;;  %v9041_v28 = vand.u32 4294901760, %v9040_v25  ;;  %v9043_v39 = vld [vmem:[#allocation154_spill] sm:$0xff] }
 0x3b8   :  { %v2437_v6 = vpop.f32.mrf.mxu2  ;;  %v1893_v53 = vadd.f32 %v9043_v39, %v9042_v48 }
 0x3b9   :  { %v2438_v22 = vadd.f32 %v2437_v6, %v1889_v33  ;;  %4867 = vxpose.xlu2.b32.cont [15/16] (narrow) %v4399_v54, 16 }
 0x3ba   :  { %v3118_v9 = vpop.f32.mrf.mxu3 }
 0x3bb   :  { %v3875_v21 = vpop.f32.mrf.mxu0  ;;  %v4410_v42 = vpop.f32.mrf.mxu1  ;;  %v3113_v52 = vadd.f32 %v3112_v19, %v2438_v22 }
 0x3bd   :  { %v3872_v34 = vadd.f32 %v3871_v14, %v3113_v52  ;;  %2521 = vmatmul.f32.gmra.mxu2 %v9035_v55  ;;  %v9045_v55 = vld [vmem:[#allocation163_spill] sm:$0xff] }
 0x3be   :  { %3938 = vmatmul.f32.gmra.mxu0 %v9034_v15  ;;  %4473 = vmatmul.f32.gmra.mxu1 %v9039_v60  ;;  %v9044_v15 = vld [vmem:[#allocation158_spill] sm:$0xff]  ;;  %v9046_v22 = vand.u32 4294901760, %v9045_v55  ;;  %v9047_v52 = vld [vmem:[#allocation167_spill] sm:$0xff] }
 0x3bf   :  { %3219 = vmatmul.f32.gmra.mxu3 %v9041_v28  ;;  %v4403_v8 = vadd.f32 %v4402_v44, %v3872_v34  ;;  %v9048_v28 = vld [vmem:[#allocation161_spill] sm:$0xff] }
 0x3c0   :  { %v2442_v32 = vpop.f32.mrf.mxu2  ;;  %v1897_v44 = vadd.f32 %v9048_v28, %v9047_v52 }
 0x3c1   :  { %v2443_v3 = vadd.f32 %v2442_v32, %v1893_v53  ;;  %4868 = vxpose.xlu2.b32.end [16/16] (narrow) %v4403_v8, 16 }
 0x3c2   :  { %v3124_v33 = vpop.f32.mrf.mxu3 }
 0x3c3   :  { %v3879_v54 = vpop.f32.mrf.mxu0  ;;  %v4414_v19 = vpop.f32.mrf.mxu1  ;;  %v3119_v6 = vadd.f32 %v3118_v9, %v2443_v3 }
 0x3c5   :  { %v3876_v14 = vadd.f32 %v3875_v21, %v3119_v6  ;;  %2526 = vmatmul.f32.gmra.mxu2 %v9040_v25  ;;  %v9050_v25 = vld [vmem:[#allocation170_spill] sm:$0xff] }
 0x3c6   :  { %3942 = vmatmul.f32.gmra.mxu0 %v9039_v60  ;;  %4477 = vmatmul.f32.gmra.mxu1 %v9044_v15  ;;  %v9049_v60 = vld [vmem:[#allocation165_spill] sm:$0xff]  ;;  %v9051_v3 = vand.u32 4294901760, %v9050_v25  ;;  %v9052_v6 = vld [vmem:[#allocation174_spill] sm:$0xff] }
 0x3c7   :  { %3225 = vmatmul.f32.gmra.mxu3 %v9046_v22  ;;  %v4407_v34 = vadd.f32 %v4406_v47, %v3876_v14  ;;  %v9053_v22 = vld [vmem:[#allocation168_spill] sm:$0xff] }
 0x3c8   :  { %v2447_v48 = vpop.f32.mrf.mxu2  ;;  %v1901_v47 = vadd.f32 %v9053_v22, %v9052_v6 }
 0x3c9   :  { %v2448_v39 = vadd.f32 %v2447_v48, %v1897_v44  ;;  %4885 = vxpose.xlu0.b32.start [1/16] (narrow) %v4407_v34, 16 }
 0x3ca   :  { %v3130_v53 = vpop.f32.mrf.mxu3 }
 0x3cb   :  { %v3883_v8 = vpop.f32.mrf.mxu0  ;;  %v4418_v9 = vpop.f32.mrf.mxu1  ;;  %v3125_v32 = vadd.f32 %v3124_v33, %v2448_v39 }
 0x3cd   :  { %v3880_v21 = vadd.f32 %v3879_v54, %v3125_v32  ;;  %2531 = vmatmul.f32.gmra.mxu2 %v9045_v55  ;;  %v9055_v55 = vld [vmem:[#allocation177_spill] sm:$0xff] }
 0x3ce   :  { %3946 = vmatmul.f32.gmra.mxu0 %v9044_v15  ;;  %4481 = vmatmul.f32.gmra.mxu1 %v9049_v60  ;;  %v9054_v15 = vld [vmem:[#allocation172_spill] sm:$0xff]  ;;  %v9056_v39 = vand.u32 4294901760, %v9055_v55  ;;  %v9057_v32 = vld [vmem:[#allocation181_spill] sm:$0xff] }
 0x3cf   :  { %3231 = vmatmul.f32.gmra.mxu3 %v9051_v3  ;;  %v4411_v14 = vadd.f32 %v4410_v42, %v3880_v21  ;;  %v9058_v3 = vld [vmem:[#allocation175_spill] sm:$0xff] }
 0x3d0   :  { %v2452_v52 = vpop.f32.mrf.mxu2  ;;  %v1905_v42 = vadd.f32 %v9058_v3, %v9057_v32 }
 0x3d1   :  { %v2453_v28 = vadd.f32 %v2452_v52, %v1901_v47  ;;  %4886 = vxpose.xlu0.b32.cont [2/16] (narrow) %v4411_v14, 16 }
 0x3d2   :  { %v3136_v44 = vpop.f32.mrf.mxu3 }
 0x3d3   :  { %v3887_v34 = vpop.f32.mrf.mxu0  ;;  %v4422_v33 = vpop.f32.mrf.mxu1  ;;  %v3131_v48 = vadd.f32 %v3130_v53, %v2453_v28 }
 0x3d5   :  { %v3884_v54 = vadd.f32 %v3883_v8, %v3131_v48  ;;  %2536 = vmatmul.f32.gmra.mxu2 %v9050_v25  ;;  %v9060_v25 = vld [vmem:[#allocation184_spill] sm:$0xff] }
 0x3d6   :  { %3950 = vmatmul.f32.gmra.mxu0 %v9049_v60  ;;  %4485 = vmatmul.f32.gmra.mxu1 %v9054_v15  ;;  %v9059_v60 = vld [vmem:[#allocation179_spill] sm:$0xff]  ;;  %v9061_v28 = vand.u32 4294901760, %v9060_v25  ;;  %v9062_v48 = vld [vmem:[#allocation188_spill] sm:$0xff] }
 0x3d7   :  { %3237 = vmatmul.f32.gmra.mxu3 %v9056_v39  ;;  %v4415_v21 = vadd.f32 %v4414_v19, %v3884_v54  ;;  %v9063_v39 = vld [vmem:[#allocation182_spill] sm:$0xff] }
 0x3d8   :  { %v2457_v6 = vpop.f32.mrf.mxu2  ;;  %v1909_v19 = vadd.f32 %v9063_v39, %v9062_v48 }
 0x3d9   :  { %v2458_v22 = vadd.f32 %v2457_v6, %v1905_v42  ;;  %4887 = vxpose.xlu0.b32.cont [3/16] (narrow) %v4415_v21, 16 }
 0x3da   :  { %v3142_v47 = vpop.f32.mrf.mxu3 }
 0x3db   :  { %v3891_v14 = vpop.f32.mrf.mxu0  ;;  %v4426_v53 = vpop.f32.mrf.mxu1  ;;  %v3137_v52 = vadd.f32 %v3136_v44, %v2458_v22 }
 0x3dd   :  { %v3888_v8 = vadd.f32 %v3887_v34, %v3137_v52  ;;  %2541 = vmatmul.f32.gmra.mxu2 %v9055_v55  ;;  %v9065_v55 = vld [vmem:[#allocation191_spill] sm:$0xff] }
 0x3de   :  { %3954 = vmatmul.f32.gmra.mxu0 %v9054_v15  ;;  %4489 = vmatmul.f32.gmra.mxu1 %v9059_v60  ;;  %v9064_v15 = vld [vmem:[#allocation186_spill] sm:$0xff]  ;;  %v9066_v22 = vand.u32 4294901760, %v9065_v55  ;;  %v9067_v52 = vld [vmem:[#allocation195_spill] sm:$0xff] }
 0x3df   :  { %3243 = vmatmul.f32.gmra.mxu3 %v9061_v28  ;;  %v4419_v54 = vadd.f32 %v4418_v9, %v3888_v8  ;;  %v9068_v28 = vld [vmem:[#allocation189_spill] sm:$0xff] }
 0x3e0   :  { %v2462_v32 = vpop.f32.mrf.mxu2  ;;  %v1913_v9 = vadd.f32 %v9068_v28, %v9067_v52 }
 0x3e1   :  { %v2463_v3 = vadd.f32 %v2462_v32, %v1909_v19  ;;  %4888 = vxpose.xlu0.b32.cont [4/16] (narrow) %v4419_v54, 16 }
 0x3e2   :  { %v3148_v42 = vpop.f32.mrf.mxu3 }
 0x3e3   :  { %v3895_v21 = vpop.f32.mrf.mxu0  ;;  %v4430_v44 = vpop.f32.mrf.mxu1  ;;  %v3143_v6 = vadd.f32 %v3142_v47, %v2463_v3 }
 0x3e5   :  { %v3892_v34 = vadd.f32 %v3891_v14, %v3143_v6  ;;  %2546 = vmatmul.f32.gmra.mxu2 %v9060_v25  ;;  %v9070_v25 = vld [vmem:[#allocation198_spill] sm:$0xff] }
 0x3e6   :  { %3958 = vmatmul.f32.gmra.mxu0 %v9059_v60  ;;  %4493 = vmatmul.f32.gmra.mxu1 %v9064_v15  ;;  %v9069_v60 = vld [vmem:[#allocation193_spill] sm:$0xff]  ;;  %v9071_v3 = vand.u32 4294901760, %v9070_v25  ;;  %v9072_v6 = vld [vmem:[#allocation202_spill] sm:$0xff] }
 0x3e7   :  { %3249 = vmatmul.f32.gmra.mxu3 %v9066_v22  ;;  %v4423_v8 = vadd.f32 %v4422_v33, %v3892_v34  ;;  %v9073_v22 = vld [vmem:[#allocation196_spill] sm:$0xff] }
 0x3e8   :  { %v2467_v48 = vpop.f32.mrf.mxu2  ;;  %v1917_v33 = vadd.f32 %v9073_v22, %v9072_v6 }
 0x3e9   :  { %v2468_v39 = vadd.f32 %v2467_v48, %v1913_v9  ;;  %4889 = vxpose.xlu0.b32.cont [5/16] (narrow) %v4423_v8, 16 }
 0x3ea   :  { %v3154_v19 = vpop.f32.mrf.mxu3 }
 0x3eb   :  { %v3899_v54 = vpop.f32.mrf.mxu0  ;;  %v4434_v47 = vpop.f32.mrf.mxu1  ;;  %v3149_v32 = vadd.f32 %v3148_v42, %v2468_v39 }
 0x3ed   :  { %v3896_v14 = vadd.f32 %v3895_v21, %v3149_v32  ;;  %2551 = vmatmul.f32.gmra.mxu2 %v9065_v55  ;;  %v9075_v55 = vld [vmem:[#allocation205_spill] sm:$0xff] }
 0x3ee   :  { %3962 = vmatmul.f32.gmra.mxu0 %v9064_v15  ;;  %4497 = vmatmul.f32.gmra.mxu1 %v9069_v60  ;;  %v9074_v15 = vld [vmem:[#allocation200_spill] sm:$0xff]  ;;  %v9076_v39 = vand.u32 4294901760, %v9075_v55  ;;  %v9077_v32 = vld [vmem:[#allocation209_spill] sm:$0xff] }
 0x3ef   :  { %3255 = vmatmul.f32.gmra.mxu3 %v9071_v3  ;;  %v4427_v34 = vadd.f32 %v4426_v53, %v3896_v14  ;;  %v9078_v3 = vld [vmem:[#allocation203_spill] sm:$0xff] }
 0x3f0   :  { %v2472_v52 = vpop.f32.mrf.mxu2  ;;  %v1921_v53 = vadd.f32 %v9078_v3, %v9077_v32 }
 0x3f1   :  { %v2473_v28 = vadd.f32 %v2472_v52, %v1917_v33  ;;  %4890 = vxpose.xlu0.b32.cont [6/16] (narrow) %v4427_v34, 16 }
 0x3f2   :  { %v3160_v9 = vpop.f32.mrf.mxu3 }
 0x3f3   :  { %v3903_v8 = vpop.f32.mrf.mxu0  ;;  %v4438_v42 = vpop.f32.mrf.mxu1  ;;  %v3155_v48 = vadd.f32 %v3154_v19, %v2473_v28 }
 0x3f5   :  { %v3900_v21 = vadd.f32 %v3899_v54, %v3155_v48  ;;  %2556 = vmatmul.f32.gmra.mxu2 %v9070_v25  ;;  %v9080_v25 = vld [vmem:[#allocation212_spill] sm:$0xff] }
 0x3f6   :  { %3966 = vmatmul.f32.gmra.mxu0 %v9069_v60  ;;  %4501 = vmatmul.f32.gmra.mxu1 %v9074_v15  ;;  %v9079_v60 = vld [vmem:[#allocation207_spill] sm:$0xff]  ;;  %v9081_v28 = vand.u32 4294901760, %v9080_v25  ;;  %v9082_v48 = vld [vmem:[#allocation216_spill] sm:$0xff] }
 0x3f7   :  { %3261 = vmatmul.f32.gmra.mxu3 %v9076_v39  ;;  %v4431_v14 = vadd.f32 %v4430_v44, %v3900_v21  ;;  %v9083_v39 = vld [vmem:[#allocation210_spill] sm:$0xff] }
 0x3f8   :  { %v2477_v6 = vpop.f32.mrf.mxu2  ;;  %v1925_v44 = vadd.f32 %v9083_v39, %v9082_v48 }
 0x3f9   :  { %v2478_v22 = vadd.f32 %v2477_v6, %v1921_v53  ;;  %4891 = vxpose.xlu0.b32.cont [7/16] (narrow) %v4431_v14, 16 }
 0x3fa   :  { %v3166_v33 = vpop.f32.mrf.mxu3 }
 0x3fb   :  { %v3907_v34 = vpop.f32.mrf.mxu0  ;;  %v4442_v19 = vpop.f32.mrf.mxu1  ;;  %v3161_v52 = vadd.f32 %v3160_v9, %v2478_v22 }
 0x3fd   :  { %v3904_v54 = vadd.f32 %v3903_v8, %v3161_v52  ;;  %2561 = vmatmul.f32.gmra.mxu2 %v9075_v55  ;;  %v9085_v55 = vld [vmem:[#allocation219_spill] sm:$0xff] }
 0x3fe   :  { %3970 = vmatmul.f32.gmra.mxu0 %v9074_v15  ;;  %4505 = vmatmul.f32.gmra.mxu1 %v9079_v60  ;;  %v9084_v15 = vld [vmem:[#allocation214_spill] sm:$0xff]  ;;  %v9086_v22 = vand.u32 4294901760, %v9085_v55  ;;  %v9087_v52 = vld [vmem:[#allocation223_spill] sm:$0xff] }
 0x3ff   :  { %3267 = vmatmul.f32.gmra.mxu3 %v9081_v28  ;;  %v4435_v21 = vadd.f32 %v4434_v47, %v3904_v54  ;;  %v9088_v28 = vld [vmem:[#allocation217_spill] sm:$0xff] }
 0x400   :  { %v2482_v32 = vpop.f32.mrf.mxu2  ;;  %v1929_v47 = vadd.f32 %v9088_v28, %v9087_v52 }
 0x401   :  { %v2483_v3 = vadd.f32 %v2482_v32, %v1925_v44  ;;  %4892 = vxpose.xlu0.b32.cont [8/16] (narrow) %v4435_v21, 16 }
 0x402   :  { %v3172_v53 = vpop.f32.mrf.mxu3 }
 0x403   :  { %v3911_v14 = vpop.f32.mrf.mxu0  ;;  %v4446_v9 = vpop.f32.mrf.mxu1  ;;  %v3167_v6 = vadd.f32 %v3166_v33, %v2483_v3 }
 0x405   :  { %v3908_v8 = vadd.f32 %v3907_v34, %v3167_v6  ;;  %2566 = vmatmul.f32.gmra.mxu2 %v9080_v25  ;;  %v9090_v25 = vld [vmem:[#allocation226_spill] sm:$0xff] }
 0x406   :  { %3974 = vmatmul.f32.gmra.mxu0 %v9079_v60  ;;  %4509 = vmatmul.f32.gmra.mxu1 %v9084_v15  ;;  %v9089_v60 = vld [vmem:[#allocation221_spill] sm:$0xff]  ;;  %v9091_v3 = vand.u32 4294901760, %v9090_v25  ;;  %v9092_v6 = vld [vmem:[#allocation230_spill] sm:$0xff] }
 0x407   :  { %3273 = vmatmul.f32.gmra.mxu3 %v9086_v22  ;;  %v4439_v54 = vadd.f32 %v4438_v42, %v3908_v8  ;;  %v9093_v22 = vld [vmem:[#allocation224_spill] sm:$0xff] }
 0x408   :  { %v2487_v48 = vpop.f32.mrf.mxu2  ;;  %v1933_v42 = vadd.f32 %v9093_v22, %v9092_v6 }
 0x409   :  { %v2488_v39 = vadd.f32 %v2487_v48, %v1929_v47  ;;  %4893 = vxpose.xlu0.b32.cont [9/16] (narrow) %v4439_v54, 16 }
 0x40a   :  { %v3178_v44 = vpop.f32.mrf.mxu3 }
 0x40b   :  { %v3915_v21 = vpop.f32.mrf.mxu0  ;;  %v4450_v33 = vpop.f32.mrf.mxu1  ;;  %v3173_v32 = vadd.f32 %v3172_v53, %v2488_v39 }
 0x40d   :  { %v3912_v34 = vadd.f32 %v3911_v14, %v3173_v32  ;;  %2571 = vmatmul.f32.gmra.mxu2 %v9085_v55  ;;  %v9095_v55 = vld [vmem:[#allocation233_spill] sm:$0xff] }
 0x40e   :  { %3978 = vmatmul.f32.gmra.mxu0 %v9084_v15  ;;  %4513 = vmatmul.f32.gmra.mxu1 %v9089_v60  ;;  %v9094_v15 = vld [vmem:[#allocation228_spill] sm:$0xff]  ;;  %v9096_v39 = vand.u32 4294901760, %v9095_v55  ;;  %v9097_v32 = vld [vmem:[#allocation237_spill] sm:$0xff] }
 0x40f   :  { %3279 = vmatmul.f32.gmra.mxu3 %v9091_v3  ;;  %v4443_v8 = vadd.f32 %v4442_v19, %v3912_v34  ;;  %v9098_v3 = vld [vmem:[#allocation231_spill] sm:$0xff] }
 0x410   :  { %v2492_v52 = vpop.f32.mrf.mxu2  ;;  %v1937_v19 = vadd.f32 %v9098_v3, %v9097_v32 }
 0x411   :  { %v2493_v28 = vadd.f32 %v2492_v52, %v1933_v42  ;;  %4894 = vxpose.xlu0.b32.cont [10/16] (narrow) %v4443_v8, 16 }
 0x412   :  { %v3184_v47 = vpop.f32.mrf.mxu3 }
 0x413   :  { %v3919_v54 = vpop.f32.mrf.mxu0  ;;  %v4454_v53 = vpop.f32.mrf.mxu1  ;;  %v3179_v48 = vadd.f32 %v3178_v44, %v2493_v28 }
 0x415   :  { %v3916_v14 = vadd.f32 %v3915_v21, %v3179_v48  ;;  %2576 = vmatmul.f32.gmra.mxu2 %v9090_v25  ;;  %v9100_v25 = vld [vmem:[#allocation240_spill] sm:$0xff] }
 0x416   :  { %3982 = vmatmul.f32.gmra.mxu0 %v9089_v60  ;;  %4517 = vmatmul.f32.gmra.mxu1 %v9094_v15  ;;  %v9099_v60 = vld [vmem:[#allocation235_spill] sm:$0xff]  ;;  %v9101_v28 = vand.u32 4294901760, %v9100_v25  ;;  %v9102_v48 = vld [vmem:[#allocation244_spill] sm:$0xff] }
 0x417   :  { %3285 = vmatmul.f32.gmra.mxu3 %v9096_v39  ;;  %v4447_v34 = vadd.f32 %v4446_v9, %v3916_v14  ;;  %v9103_v39 = vld [vmem:[#allocation238_spill] sm:$0xff] }
 0x418   :  { %v2497_v6 = vpop.f32.mrf.mxu2  ;;  %v1941_v9 = vadd.f32 %v9103_v39, %v9102_v48 }
 0x419   :  { %v2498_v22 = vadd.f32 %v2497_v6, %v1937_v19  ;;  %4895 = vxpose.xlu0.b32.cont [11/16] (narrow) %v4447_v34, 16 }
 0x41a   :  { %v3190_v42 = vpop.f32.mrf.mxu3 }
 0x41b   :  { %v3923_v8 = vpop.f32.mrf.mxu0  ;;  %v4458_v44 = vpop.f32.mrf.mxu1  ;;  %v3185_v52 = vadd.f32 %v3184_v47, %v2498_v22 }
 0x41d   :  { %v3920_v21 = vadd.f32 %v3919_v54, %v3185_v52  ;;  %2581 = vmatmul.f32.gmra.mxu2 %v9095_v55  ;;  %v9105_v55 = vld [vmem:[#allocation247_spill] sm:$0xff] }
 0x41e   :  { %3986 = vmatmul.f32.gmra.mxu0 %v9094_v15  ;;  %4521 = vmatmul.f32.gmra.mxu1 %v9099_v60  ;;  %v9104_v15 = vld [vmem:[#allocation242_spill] sm:$0xff]  ;;  %v9106_v22 = vand.u32 4294901760, %v9105_v55  ;;  %v9107_v52 = vld [vmem:[#allocation251_spill] sm:$0xff] }
 0x41f   :  { %3291 = vmatmul.f32.gmra.mxu3 %v9101_v28  ;;  %v4451_v14 = vadd.f32 %v4450_v33, %v3920_v21  ;;  %v9108_v28 = vld [vmem:[#allocation245_spill] sm:$0xff] }
 0x420   :  { %v2502_v32 = vpop.f32.mrf.mxu2  ;;  %v1945_v33 = vadd.f32 %v9108_v28, %v9107_v52 }
 0x421   :  { %v2503_v3 = vadd.f32 %v2502_v32, %v1941_v9  ;;  %4896 = vxpose.xlu0.b32.cont [12/16] (narrow) %v4451_v14, 16 }
 0x422   :  { %v3196_v19 = vpop.f32.mrf.mxu3 }
 0x423   :  { %v3927_v34 = vpop.f32.mrf.mxu0  ;;  %v4462_v47 = vpop.f32.mrf.mxu1  ;;  %v3191_v6 = vadd.f32 %v3190_v42, %v2503_v3 }
 0x425   :  { %v3924_v54 = vadd.f32 %v3923_v8, %v3191_v6  ;;  %2586 = vmatmul.f32.gmra.mxu2 %v9100_v25  ;;  %v9110_v25 = vld [vmem:[#allocation254_spill] sm:$0xff] }
 0x426   :  { %3990 = vmatmul.f32.gmra.mxu0 %v9099_v60  ;;  %4525 = vmatmul.f32.gmra.mxu1 %v9104_v15  ;;  %v9109_v60 = vld [vmem:[#allocation249_spill] sm:$0xff]  ;;  %v9111_v3 = vand.u32 4294901760, %v9110_v25  ;;  %v9112_v6 = vld [vmem:[#allocation258_spill] sm:$0xff] }
 0x427   :  { %3297 = vmatmul.f32.gmra.mxu3 %v9106_v22  ;;  %v4455_v21 = vadd.f32 %v4454_v53, %v3924_v54  ;;  %v9113_v22 = vld [vmem:[#allocation252_spill] sm:$0xff] }
 0x428   :  { %v2507_v48 = vpop.f32.mrf.mxu2  ;;  %v1949_v53 = vadd.f32 %v9113_v22, %v9112_v6 }
 0x429   :  { %v2508_v39 = vadd.f32 %v2507_v48, %v1945_v33  ;;  %4897 = vxpose.xlu0.b32.cont [13/16] (narrow) %v4455_v21, 16 }
 0x42a   :  { %v3202_v9 = vpop.f32.mrf.mxu3 }
 0x42b   :  { %v3931_v14 = vpop.f32.mrf.mxu0  ;;  %v4466_v42 = vpop.f32.mrf.mxu1  ;;  %v3197_v32 = vadd.f32 %v3196_v19, %v2508_v39 }
 0x42d   :  { %v3928_v8 = vadd.f32 %v3927_v34, %v3197_v32  ;;  %2591 = vmatmul.f32.gmra.mxu2 %v9105_v55  ;;  %v9115_v55 = vld [vmem:[#allocation261_spill] sm:$0xff]  ;;  %v9117_v32 = vld [vmem:[#allocation264_spill] sm:$0xff] }
 0x42e   :  { %3994 = vmatmul.f32.gmra.mxu0 %v9104_v15  ;;  %4529 = vmatmul.f32.gmra.mxu1 %v9109_v60  ;;  %v9114_v15 = vld [vmem:[#allocation256_spill] sm:$0xff]  ;;  %v9116_v39 = vand.u32 4294901760, %v9115_v55 }
 0x42f   :  { %3303 = vmatmul.f32.gmra.mxu3 %v9111_v3  ;;  %v4459_v54 = vadd.f32 %v4458_v44, %v3928_v8  ;;  %v9118_v3 = vld [vmem:[#allocation259_spill] sm:$0xff] }
 0x430   :  { %v2512_v52 = vpop.f32.mrf.mxu2  ;;  %v1953_v44 = vadd.f32 %v9118_v3, %v9117_v32 }
 0x431   :  { %v2513_v28 = vadd.f32 %v2512_v52, %v1949_v53  ;;  %4898 = vxpose.xlu0.b32.cont [14/16] (narrow) %v4459_v54, 16 }
 0x432   :  { %v3208_v33 = vpop.f32.mrf.mxu3 }
 0x433   :  { %v3935_v21 = vpop.f32.mrf.mxu0  ;;  %v4470_v19 = vpop.f32.mrf.mxu1  ;;  %v3203_v48 = vadd.f32 %v3202_v9, %v2513_v28  ;;  %v9121_v28 = vld [vmem:[#allocation271_spill] sm:$0xff] }
 0x435   :  { %v3932_v34 = vadd.f32 %v3931_v14, %v3203_v48  ;;  %2596 = vmatmul.f32.gmra.mxu2 %v9110_v25  ;;  %v9122_v48 = vld [vmem:[#allocation265_spill] sm:$0xff] }
 0x436   :  { %3998 = vmatmul.f32.gmra.mxu0 %v9109_v60  ;;  %4533 = vmatmul.f32.gmra.mxu1 %v9114_v15  ;;  %v9119_v60 = vld [vmem:[#allocation267_spill] sm:$0xff] }
 0x437   :  { %3309 = vmatmul.f32.gmra.mxu3 %v9116_v39  ;;  %v4463_v8 = vadd.f32 %v4462_v47, %v3932_v34  ;;  %v9120_v25 = vand.u32 4294901760, %v9119_v60  ;;  %v1957_v47 = vadd.f32 %v9122_v48, %v9121_v28 }
 0x438   :  { %v2517_v6 = vpop.f32.mrf.mxu2 }
 0x439   :  { %v2518_v22 = vadd.f32 %v2517_v6, %v1953_v44  ;;  %4899 = vxpose.xlu0.b32.cont [15/16] (narrow) %v4463_v8, 16 }
 0x43a   :  { %v3214_v53 = vpop.f32.mrf.mxu3 }
 0x43b   :  { %v3939_v54 = vpop.f32.mrf.mxu0  ;;  %v4474_v9 = vpop.f32.mrf.mxu1  ;;  %v3209_v52 = vadd.f32 %v3208_v33, %v2518_v22  ;;  %v9126_v22 = vld [vmem:[#allocation278_spill] sm:$0xff] }
 0x43d   :  { %v3936_v14 = vadd.f32 %v3935_v21, %v3209_v52  ;;  %2601 = vmatmul.f32.gmra.mxu2 %v9115_v55  ;;  %v9124_v55 = vld [vmem:[#allocation274_spill] sm:$0xff]  ;;  %v9127_v52 = vld [vmem:[#allocation272_spill] sm:$0xff] }
 0x43e   :  { %4002 = vmatmul.f32.gmra.mxu0 %v9114_v15  ;;  %4537 = vmatmul.f32.gmra.mxu1 %v6641_v59  ;;  %v9123_v15 = vld [vmem:[#allocation269_spill] sm:$0xff]  ;;  %v9125_v6 = vand.u32 4294901760, %v9124_v55 }
 0x43f   :  { %3315 = vmatmul.f32.gmra.mxu3 %v9120_v25  ;;  %v4467_v34 = vadd.f32 %v4466_v42, %v3936_v14  ;;  %v1961_v42 = vadd.f32 %v9127_v52, %v9126_v22 }
 0x440   :  { %v2522_v39 = vpop.f32.mrf.mxu2 }
 0x441   :  { %v2523_v32 = vadd.f32 %v2522_v39, %v1957_v47  ;;  %4900 = vxpose.xlu0.b32.end [16/16] (narrow) %v4467_v34, 16 }
 0x442   :  { %v3220_v3 = vpop.f32.mrf.mxu3 }
 0x443   :  { %v3943_v44 = vpop.f32.mrf.mxu0  ;;  %v4478_v33 = vpop.f32.mrf.mxu1  ;;  %v3215_v8 = vadd.f32 %v3214_v53, %v2523_v32  ;;  %v9131_v32 = vld [vmem:[#allocation285_spill] sm:$0xff] }
 0x445   :  { %v3940_v21 = vadd.f32 %v3939_v54, %v3215_v8  ;;  %2606 = vmatmul.f32.gmra.mxu2 %v9119_v60  ;;  %v9128_v54 = vld [vmem:[#allocation276_spill] sm:$0xff]  ;;  %v9129_v60 = vld [vmem:[#allocation281_spill] sm:$0xff]  ;;  %v9132_v8 = vld [vmem:[#allocation279_spill] sm:$0xff] }
 0x446   :  { %4006 = vmatmul.f32.gmra.mxu0 %v6641_v59  ;;  %4541 = vmatmul.f32.gmra.mxu1 %v9123_v15  ;;  %v9130_v39 = vand.u32 4294901760, %v9129_v60 }
 0x447   :  { %3321 = vmatmul.f32.gmra.mxu3 %v9125_v6  ;;  %v4471_v14 = vadd.f32 %v4470_v19, %v3940_v21  ;;  %v1965_v19 = vadd.f32 %v9132_v8, %v9131_v32 }
 0x448   :  { %v2527_v25 = vpop.f32.mrf.mxu2 }
 0x449   :  { %v2528_v28 = vadd.f32 %v2527_v25, %v1961_v42  ;;  %4917 = vxpose.xlu1.b32.start [1/16] (narrow) %v4471_v14, 16 }
 0x44a   :  { %v3226_v48 = vpop.f32.mrf.mxu3 }
 0x44b   :  { %v3947_v47 = vpop.f32.mrf.mxu0  ;;  %v4482_v53 = vpop.f32.mrf.mxu1  ;;  %v3221_v34 = vadd.f32 %v3220_v3, %v2528_v28  ;;  %v9136_v28 = vld [vmem:[#allocation292_spill] sm:$0xff] }
 0x44d   :  { %v3944_v59 = vadd.f32 %v3943_v44, %v3221_v34  ;;  %2611 = vmatmul.f32.gmra.mxu2 %v9124_v55  ;;  %v9134_v55 = vld [vmem:[#allocation288_spill] sm:$0xff]  ;;  %v9137_v34 = vld [vmem:[#allocation286_spill] sm:$0xff] }
 0x44e   :  { %4010 = vmatmul.f32.gmra.mxu0 %v9123_v15  ;;  %4545 = vmatmul.f32.gmra.mxu1 %v9128_v54  ;;  %v9133_v15 = vld [vmem:[#allocation283_spill] sm:$0xff]  ;;  %v9135_v25 = vand.u32 4294901760, %v9134_v55 }
 0x44f   :  { %3327 = vmatmul.f32.gmra.mxu3 %v9130_v39  ;;  %v4475_v21 = vadd.f32 %v4474_v9, %v3944_v59  ;;  %v1969_v9 = vadd.f32 %v9137_v34, %v9136_v28 }
 0x450   :  { %v2532_v6 = vpop.f32.mrf.mxu2 }
 0x451   :  { %v2533_v22 = vadd.f32 %v2532_v6, %v1965_v19  ;;  %4918 = vxpose.xlu1.b32.cont [2/16] (narrow) %v4475_v21, 16 }
 0x452   :  { %v3232_v52 = vpop.f32.mrf.mxu3 }
 0x453   :  { %v3951_v42 = vpop.f32.mrf.mxu0  ;;  %v4486_v3 = vpop.f32.mrf.mxu1  ;;  %v3227_v14 = vadd.f32 %v3226_v48, %v2533_v22  ;;  %v9141_v22 = vld [vmem:[#allocation298_spill] sm:$0xff] }
 0x455   :  { %v3948_v44 = vadd.f32 %v3947_v47, %v3227_v14  ;;  %2616 = vmatmul.f32.gmra.mxu2 %v9129_v60  ;;  %v9139_v60 = vld [vmem:[#allocation295_spill] sm:$0xff]  ;;  %v9142_v14 = vld [vmem:[#allocation293_spill] sm:$0xff] }
 0x456   :  { %4014 = vmatmul.f32.gmra.mxu0 %v9128_v54  ;;  %4549 = vmatmul.f32.gmra.mxu1 %v9133_v15  ;;  %v9138_v54 = vld [vmem:[#allocation290_spill] sm:$0xff]  ;;  %v9140_v6 = vand.u32 4294901760, %v9139_v60 }
 0x457   :  { %3333 = vmatmul.f32.gmra.mxu3 %v9135_v25  ;;  %v4479_v59 = vadd.f32 %v4478_v33, %v3948_v44  ;;  %v1973_v33 = vadd.f32 %v9142_v14, %v9141_v22 }
 0x458   :  { %v2537_v39 = vpop.f32.mrf.mxu2 }
 0x459   :  { %v2538_v32 = vadd.f32 %v2537_v39, %v1969_v9  ;;  %4919 = vxpose.xlu1.b32.cont [3/16] (narrow) %v4479_v59, 16  ;;  %v9145_v39 = vld [vmem:[#allocation305_spill] sm:$0xff] }
 0x45a   :  { %v3238_v8 = vpop.f32.mrf.mxu3 }
 0x45b   :  { %v3955_v19 = vpop.f32.mrf.mxu0  ;;  %v4490_v48 = vpop.f32.mrf.mxu1  ;;  %v3233_v21 = vadd.f32 %v3232_v52, %v2538_v32  ;;  %v9146_v32 = vld [vmem:[#allocation299_spill] sm:$0xff] }
 0x45d   :  { %v3952_v47 = vadd.f32 %v3951_v42, %v3233_v21  ;;  %2621 = vmatmul.f32.gmra.mxu2 %v9134_v55 }
 0x45e   :  { %4018 = vmatmul.f32.gmra.mxu0 %v9133_v15  ;;  %4553 = vmatmul.f32.gmra.mxu1 %v9138_v54  ;;  %v9143_v15 = vld [vmem:[#allocation301_spill] sm:$0xff] }
 0x45f   :  { %3339 = vmatmul.f32.gmra.mxu3 %v9140_v6  ;;  %v4483_v44 = vadd.f32 %v4482_v53, %v3952_v47  ;;  %v9144_v55 = vand.u32 4294901760, %v9143_v15  ;;  %v1977_v53 = vadd.f32 %v9146_v32, %v9145_v39 }
 0x460   :  { %v2542_v25 = vpop.f32.mrf.mxu2 }
 0x461   :  { %v2543_v28 = vadd.f32 %v2542_v25, %v1973_v33  ;;  %4920 = vxpose.xlu1.b32.cont [4/16] (narrow) %v4483_v44, 16  ;;  %v9150_v25 = vld [vmem:[#allocation311_spill] sm:$0xff] }
 0x462   :  { %v3244_v34 = vpop.f32.mrf.mxu3 }
 0x463   :  { %v3959_v9 = vpop.f32.mrf.mxu0  ;;  %v4494_v52 = vpop.f32.mrf.mxu1  ;;  %v3239_v59 = vadd.f32 %v3238_v8, %v2543_v28  ;;  %v9151_v28 = vld [vmem:[#allocation306_spill] sm:$0xff] }
 0x465   :  { %v3956_v42 = vadd.f32 %v3955_v19, %v3239_v59  ;;  %2626 = vmatmul.f32.gmra.mxu2 %v9139_v60  ;;  %v9148_v60 = vld [vmem:[#allocation308_spill] sm:$0xff] }
 0x466   :  { %4022 = vmatmul.f32.gmra.mxu0 %v9138_v54  ;;  %4557 = vmatmul.f32.gmra.mxu1 %v6790_v35  ;;  %v9147_v54 = vld [vmem:[#allocation303_spill] sm:$0xff]  ;;  %v9149_v44 = vand.u32 4294901760, %v9148_v60 }
 0x467   :  { %3345 = vmatmul.f32.gmra.mxu3 %v9144_v55  ;;  %v4487_v21 = vadd.f32 %v4486_v3, %v3956_v42  ;;  %v1981_v3 = vadd.f32 %v9151_v28, %v9150_v25 }
 0x468   :  { %v2547_v47 = vpop.f32.mrf.mxu2 }
 0x469   :  { %v2548_v6 = vadd.f32 %v2547_v47, %v1977_v53  ;;  %4921 = vxpose.xlu1.b32.cont [5/16] (narrow) %v4487_v21, 16  ;;  %v9154_v21 = vld [vmem:[#allocation318_spill] sm:$0xff]  ;;  %v9155_v47 = vld [vmem:[#allocation312_spill] sm:$0xff] }
 0x46a   :  { %v3250_v22 = vpop.f32.mrf.mxu3 }
 0x46b   :  { %v3963_v14 = vpop.f32.mrf.mxu0  ;;  %v4498_v8 = vpop.f32.mrf.mxu1  ;;  %v3245_v33 = vadd.f32 %v3244_v34, %v2548_v6 }
 0x46d   :  { %v3960_v19 = vadd.f32 %v3959_v9, %v3245_v33  ;;  %2631 = vmatmul.f32.gmra.mxu2 %v9143_v15  ;;  %v9152_v9 = vld [vmem:[#allocation314_spill] sm:$0xff] }
 0x46e   :  { %4026 = vmatmul.f32.gmra.mxu0 %v6790_v35  ;;  %4561 = vmatmul.f32.gmra.mxu1 %v9147_v54  ;;  %v9153_v15 = vand.u32 4294901760, %v9152_v9 }
 0x46f   :  { %3351 = vmatmul.f32.gmra.mxu3 %v9149_v44  ;;  %v4491_v59 = vadd.f32 %v4490_v48, %v3960_v19  ;;  %v1985_v48 = vadd.f32 %v9155_v47, %v9154_v21 }
 0x470   :  { %v2552_v42 = vpop.f32.mrf.mxu2 }
 0x471   :  { %v2553_v55 = vadd.f32 %v2552_v42, %v1981_v3  ;;  %4922 = vxpose.xlu1.b32.cont [6/16] (narrow) %v4491_v59, 16  ;;  %v9159_v59 = vld [vmem:[#allocation325_spill] sm:$0xff]  ;;  %v9160_v42 = vld [vmem:[#allocation319_spill] sm:$0xff] }
 0x472   :  { %v3256_v39 = vpop.f32.mrf.mxu3 }
 0x473   :  { %v3967_v32 = vpop.f32.mrf.mxu0  ;;  %v4502_v34 = vpop.f32.mrf.mxu1  ;;  %v3251_v53 = vadd.f32 %v3250_v22, %v2553_v55 }
 0x475   :  { %v3964_v35 = vadd.f32 %v3963_v14, %v3251_v53  ;;  %2636 = vmatmul.f32.gmra.mxu2 %v9148_v60  ;;  %v9157_v60 = vld [vmem:[#allocation321_spill] sm:$0xff] }
 0x476   :  { %4030 = vmatmul.f32.gmra.mxu0 %v9147_v54  ;;  %4565 = vmatmul.f32.gmra.mxu1 %v6846_v24  ;;  %v9156_v54 = vld [vmem:[#allocation316_spill] sm:$0xff]  ;;  %v9158_v3 = vand.u32 4294901760, %v9157_v60 }
 0x477   :  { %3357 = vmatmul.f32.gmra.mxu3 %v9153_v15  ;;  %v4495_v6 = vadd.f32 %v4494_v52, %v3964_v35  ;;  %v1989_v52 = vadd.f32 %v9160_v42, %v9159_v59 }
 0x478   :  { %v2557_v33 = vpop.f32.mrf.mxu2 }
 0x479   :  { %v2558_v19 = vadd.f32 %v2557_v33, %v1985_v48  ;;  %4923 = vxpose.xlu1.b32.cont [7/16] (narrow) %v4495_v6, 16  ;;  %v9164_v6 = vld [vmem:[#allocation331_spill] sm:$0xff]  ;;  %v9165_v33 = vld [vmem:[#allocation326_spill] sm:$0xff] }
 0x47a   :  { %v3262_v44 = vpop.f32.mrf.mxu3 }
 0x47b   :  { %v3971_v25 = vpop.f32.mrf.mxu0  ;;  %v4506_v22 = vpop.f32.mrf.mxu1  ;;  %v3257_v28 = vadd.f32 %v3256_v39, %v2558_v19 }
 0x47d   :  { %v3968_v14 = vadd.f32 %v3967_v32, %v3257_v28  ;;  %2641 = vmatmul.f32.gmra.mxu2 %v9152_v9  ;;  %v9161_v32 = vld [vmem:[#allocation323_spill] sm:$0xff]  ;;  %v9162_v9 = vld [vmem:[#allocation328_spill] sm:$0xff] }
 0x47e   :  { %4034 = vmatmul.f32.gmra.mxu0 %v6846_v24  ;;  %4569 = vmatmul.f32.gmra.mxu1 %v9156_v54  ;;  %v9163_v48 = vand.u32 4294901760, %v9162_v9 }
 0x47f   :  { %3363 = vmatmul.f32.gmra.mxu3 %v9158_v3  ;;  %v4499_v55 = vadd.f32 %v4498_v8, %v3968_v14  ;;  %v1993_v8 = vadd.f32 %v9165_v33, %v9164_v6 }
 0x480   :  { %v2562_v53 = vpop.f32.mrf.mxu2 }
 0x481   :  { %v2563_v35 = vadd.f32 %v2562_v53, %v1989_v52  ;;  %4924 = vxpose.xlu1.b32.cont [8/16] (narrow) %v4499_v55, 16  ;;  %v9168_v52 = vld [vmem:[#allocation338_spill] sm:$0xff]  ;;  %v9169_v55 = vld [vmem:[#allocation332_spill] sm:$0xff] }
 0x482   :  { %v3268_v15 = vpop.f32.mrf.mxu3 }
 0x483   :  { %v3975_v21 = vpop.f32.mrf.mxu0  ;;  %v4510_v39 = vpop.f32.mrf.mxu1  ;;  %v3263_v47 = vadd.f32 %v3262_v44, %v2563_v35 }
 0x485   :  { %v3972_v24 = vadd.f32 %v3971_v25, %v3263_v47  ;;  %2646 = vmatmul.f32.gmra.mxu2 %v9157_v60 }
 0x486   :  { %4038 = vmatmul.f32.gmra.mxu0 %v9156_v54  ;;  %4573 = vmatmul.f32.gmra.mxu1 %v9161_v32  ;;  %v9166_v54 = vld [vmem:[#allocation334_spill] sm:$0xff] }
 0x487   :  { %3369 = vmatmul.f32.gmra.mxu3 %v9163_v48  ;;  %v4503_v19 = vadd.f32 %v4502_v34, %v3972_v24  ;;  %v9167_v60 = vand.u32 4294901760, %v9166_v54  ;;  %v1997_v34 = vadd.f32 %v9169_v55, %v9168_v52  ;;  %v9177_v55 = vld [vmem:[#allocation350_spill] sm:$0xff] }
 0x488   :  { %v2567_v28 = vpop.f32.mrf.mxu2 }
 0x489   :  { %v2568_v14 = vadd.f32 %v2567_v28, %v1993_v8  ;;  %4925 = vxpose.xlu1.b32.cont [9/16] (narrow) %v4503_v19, 16  ;;  %v9173_v8 = vld [vmem:[#allocation344_spill] sm:$0xff]  ;;  %v9174_v19 = vld [vmem:[#allocation339_spill] sm:$0xff] }
 0x48a   :  { %v3274_v3 = vpop.f32.mrf.mxu3 }
 0x48b   :  { %v3979_v59 = vpop.f32.mrf.mxu0  ;;  %v4514_v44 = vpop.f32.mrf.mxu1  ;;  %v3269_v42 = vadd.f32 %v3268_v15, %v2568_v14 }
 0x48d   :  { %v3976_v25 = vadd.f32 %v3975_v21, %v3269_v42  ;;  %2651 = vmatmul.f32.gmra.mxu2 %v9162_v9  ;;  %v9171_v9 = vld [vmem:[#allocation341_spill] sm:$0xff] }
 0x48e   :  { %4042 = vmatmul.f32.gmra.mxu0 %v9161_v32  ;;  %4577 = vmatmul.f32.gmra.mxu1 %v6930_v61  ;;  %v9170_v32 = vld [vmem:[#allocation336_spill] sm:$0xff]  ;;  %v9172_v33 = vand.u32 4294901760, %v9171_v9 }
 0x48f   :  { %3375 = vmatmul.f32.gmra.mxu3 %v9167_v60  ;;  %v4507_v53 = vadd.f32 %v4506_v22, %v3976_v25  ;;  %v2001_v22 = vadd.f32 %v9174_v19, %v9173_v8 }
 0x490   :  { %v2572_v35 = vpop.f32.mrf.mxu2 }
 0x491   :  { %v2573_v47 = vadd.f32 %v2572_v35, %v1997_v34  ;;  %4926 = vxpose.xlu1.b32.cont [10/16] (narrow) %v4507_v53, 16  ;;  %v9178_v34 = vld [vmem:[#allocation345_spill] sm:$0xff] }
 0x492   :  { %v3280_v24 = vpop.f32.mrf.mxu3 }
 0x493   :  { %v3983_v48 = vpop.f32.mrf.mxu0  ;;  %v4518_v15 = vpop.f32.mrf.mxu1  ;;  %v3275_v6 = vadd.f32 %v3274_v3, %v2573_v47 }
 0x495   :  { %v3980_v21 = vadd.f32 %v3979_v59, %v3275_v6  ;;  %2656 = vmatmul.f32.gmra.mxu2 %v9166_v54  ;;  %v9175_v59 = vld [vmem:[#allocation347_spill] sm:$0xff] }
 0x496   :  { %4046 = vmatmul.f32.gmra.mxu0 %v6930_v61  ;;  %4581 = vmatmul.f32.gmra.mxu1 %v9170_v32  ;;  %v9176_v54 = vand.u32 4294901760, %v9175_v59 }
 0x497   :  { %3381 = vmatmul.f32.gmra.mxu3 %v9172_v33  ;;  %v4511_v28 = vadd.f32 %v4510_v39, %v3980_v21  ;;  %v2005_v39 = vadd.f32 %v9178_v34, %v9177_v55 }
 0x498   :  { %v2577_v14 = vpop.f32.mrf.mxu2 }
 0x499   :  { %v2578_v42 = vadd.f32 %v2577_v14, %v2001_v22  ;;  %4927 = vxpose.xlu1.b32.cont [11/16] (narrow) %v4511_v28, 16 }
 0x49a   :  { %v3286_v25 = vpop.f32.mrf.mxu3 }
 0x49b   :  { %v3987_v60 = vpop.f32.mrf.mxu0  ;;  %v4522_v3 = vpop.f32.mrf.mxu1  ;;  %v3281_v52 = vadd.f32 %v3280_v24, %v2578_v42 }
 0x49d   :  { %v3984_v61 = vadd.f32 %v3983_v48, %v3281_v52  ;;  %2661 = vmatmul.f32.gmra.mxu2 %v9171_v9  ;;  %v9180_v9 = vld [vmem:[#allocation351_spill] sm:$0xff] }
 0x49e   :  { %4050 = vmatmul.f32.gmra.mxu0 %v9170_v32  ;;  %4585 = vmatmul.f32.gmra.mxu1 %v6986_v20  ;;  %v9179_v32 = vand.u32 4294901760, %v7026_v36 }
 0x49f   :  { %3387 = vmatmul.f32.gmra.mxu3 %v9176_v54  ;;  %v4515_v53 = vadd.f32 %v4514_v44, %v3984_v61  ;;  %v2009_v44 = vadd.f32 %v9180_v9, %v7046_v18  ;;  %v9182_v18 = vld [vmem:[#allocation355_spill] sm:$0xff]  ;;  %v9187_v9 = vld [vmem:[#allocation14_spill] sm:$0xff] }
 0x4a0   :  { %v2582_v35 = vpop.f32.mrf.mxu2 }
 0x4a1   :  { %v2583_v47 = vadd.f32 %v2582_v35, %v2005_v39  ;;  %4928 = vxpose.xlu1.b32.cont [12/16] (narrow) %v4515_v53, 16  ;;  %v9184_v53 = vld [vmem:[#allocation12_spill] sm:$0xff] }
 0x4a2   :  { %v3292_v6 = vpop.f32.mrf.mxu3  ;;  %v9185_v35 = vand.u32 4294901760, %v9184_v53 }
 0x4a3   :  { %v3991_v21 = vpop.f32.mrf.mxu0  ;;  %v4526_v24 = vpop.f32.mrf.mxu1  ;;  %v3287_v33 = vadd.f32 %v3286_v25, %v2583_v47 }
 0x4a5   :  { %v3988_v48 = vadd.f32 %v3987_v60, %v3287_v33  ;;  %2666 = vmatmul.f32.gmra.mxu2 %v9175_v59  ;;  %v9181_v60 = vand.u32 4294901760, %v7054_v26 }
 0x4a6   :  { %4054 = vmatmul.f32.gmra.mxu0 %v6986_v20  ;;  %4589 = vmatmul.f32.gmra.mxu1 %v7014_v5 }
 0x4a7   :  { %3393 = vmatmul.f32.gmra.mxu3 %v9179_v32  ;;  %v4519_v8 = vadd.f32 %v4518_v15, %v3988_v48  ;;  %v2013_v15 = vadd.f32 %v9182_v18, %v7070_v10  ;;  %v2017_v10 = vadd.f32 %v7072_v30, %v7085_v58  ;;  %v2021_v30 = vadd.f32 %v7087_v38, %v7094_v57 }
 0x4a8   :  { %v2587_v19 = vpop.f32.mrf.mxu2  ;;  %v2025_v38 = vadd.f32 %v7096_v4, %v7105_v12  ;;  %v2029_v4 = vadd.f32 %v7107_v1, %v7116_v46  ;;  %v2033_v1 = vadd.f32 %v7118_v11, %v7127_v50  ;;  %v2037_v11 = vadd.f32 %v7129_v51, %v7138_v40 }
 0x4a9   :  { %v2588_v22 = vadd.f32 %v2587_v19, %v2009_v44  ;;  %4929 = vxpose.xlu1.b32.cont [13/16] (narrow) %v4519_v8, 16  ;;  %v9188_v44 = vand.u32 4294901760, %v9187_v9  ;;  %v2041_v51 = vadd.f32 %v7140_v2, %v7149_v49  ;;  %v2045_v2 = vadd.f32 %v7151_v17, %v7160_v62 }
 0x4aa   :  { %v3298_v28 = vpop.f32.mrf.mxu3  ;;  %v2049_v17 = vadd.f32 %v7162_v31, %v7171_v13  ;;  %v2053_v31 = vadd.f32 %v7173_v45, %v7182_v27  ;;  %v2057_v45 = vadd.f32 %v7184_v7, %v7193_v41  ;;  %v2061_v7 = vadd.f32 %v7195_v29, %v7204_v63 }
 0x4ab   :  { %v3995_v14 = vpop.f32.mrf.mxu0  ;;  %v4530_v42 = vpop.f32.mrf.mxu1  ;;  %v3293_v25 = vadd.f32 %v3292_v6, %v2588_v22  ;;  %v2065_v29 = vadd.f32 %v7206_v0, %v7215_v23  ;;  %v2069_v0 = vadd.f32 %v7217_v43, %v7226_v56  ;;  %v9228_v43 = vld [vmem:[#allocation373_spill] sm:$0xff] }
 0x4ac   :  { %v2073_v56 = vadd.f32 %v9228_v43, %v7237_v37  ;;  %v9233_v37 = vld [vmem:[#allocation375_spill] sm:$0xff] }
 0x4ad   :  { %v3992_v20 = vadd.f32 %v3991_v21, %v3293_v25  ;;  %2671 = vmatmul.f32.gmra.mxu2 %v7026_v36  ;;  %v9183_v36 = vld [vmem:[#allocation11_spill] sm:$0xff] }
 0x4ae   :  { %4058 = vmatmul.f32.gmra.mxu0 %v7014_v5  ;;  %4593 = vmatmul.f32.gmra.mxu1 %v7042_v16  ;;  %v9189_v25 = vld [vmem:[#allocation15_spill] sm:$0xff] }
 0x4af   :  { %3399 = vmatmul.f32.gmra.mxu3 %v9181_v60  ;;  %v4523_v52 = vadd.f32 %v4522_v3, %v3992_v20  ;;  %v9190_v60 = vld [vmem:[#allocation16_spill] sm:$0xff] }
 0x4b0   :  { %v2592_v61 = vpop.f32.mrf.mxu2  ;;  %v9191_v18 = vand.u32 4294901760, %v9190_v60 }
 0x4b1   :  { %v2593_v59 = vadd.f32 %v2592_v61, %v2013_v15  ;;  %4930 = vxpose.xlu1.b32.cont [14/16] (narrow) %v4523_v52, 16 }
 0x4b2   :  { %v3304_v54 = vpop.f32.mrf.mxu3 }
 0x4b3   :  { %v3999_v55 = vpop.f32.mrf.mxu0  ;;  %v4534_v34 = vpop.f32.mrf.mxu1  ;;  %v3299_v39 = vadd.f32 %v3298_v28, %v2593_v59 }
 0x4b5   :  { %v3996_v5 = vadd.f32 %v3995_v14, %v3299_v39  ;;  %2676 = vmatmul.f32.gmra.mxu2 %v7054_v26  ;;  %v9186_v26 = vld [vmem:[#allocation13_spill] sm:$0xff] }
 0x4b6   :  { %4062 = vmatmul.f32.gmra.mxu0 %v7042_v16  ;;  %4597 = vmatmul.f32.gmra.mxu1 %v9183_v36  ;;  %v9192_v39 = vld [vmem:[#allocation17_spill] sm:$0xff] }
 0x4b7   :  { %3405 = vmatmul.f32.gmra.mxu3 %v9185_v35  ;;  %v4527_v3 = vadd.f32 %v4526_v24, %v3996_v5  ;;  %v9193_v5 = vld [vmem:[#allocation18_spill] sm:$0xff] }
 0x4b8   :  { %v2597_v47 = vpop.f32.mrf.mxu2 }
 0x4b9   :  { %v2598_v6 = vadd.f32 %v2597_v47, %v2017_v10  ;;  %4931 = vxpose.xlu1.b32.cont [15/16] (narrow) %v4527_v3, 16 }
 0x4ba   :  { %v3310_v21 = vpop.f32.mrf.mxu3 }
 0x4bb   :  { %v4003_v33 = vpop.f32.mrf.mxu0  ;;  %v4538_v48 = vpop.f32.mrf.mxu1  ;;  %v3305_v32 = vadd.f32 %v3304_v54, %v2598_v6 }
 0x4bd   :  { %v4000_v16 = vadd.f32 %v3999_v55, %v3305_v32  ;;  %2681 = vmatmul.f32.gmra.mxu2 %v9184_v53 }
 0x4be   :  { %4066 = vmatmul.f32.gmra.mxu0 %v9183_v36  ;;  %4601 = vmatmul.f32.gmra.mxu1 %v9186_v26  ;;  %v9194_v36 = vand.u32 4294901760, %v9193_v5 }
 0x4bf   :  { %3411 = vmatmul.f32.gmra.mxu3 %v9188_v44  ;;  %v4531_v58 = vadd.f32 %v4530_v42, %v4000_v16 }
 0x4c0   :  { %v2602_v24 = vpop.f32.mrf.mxu2 }
 0x4c1   :  { %v2603_v8 = vadd.f32 %v2602_v24, %v2021_v30  ;;  %4932 = vxpose.xlu1.b32.end [16/16] (narrow) %v4531_v58, 16  ;;  %v9198_v24 = vld [vmem:[#allocation21_spill] sm:$0xff] }
 0x4c2   :  { %v3316_v19 = vpop.f32.mrf.mxu3 }
 0x4c3   :  { %v4007_v22 = vpop.f32.mrf.mxu0  ;;  %v4542_v28 = vpop.f32.mrf.mxu1  ;;  %v3311_v14 = vadd.f32 %v3310_v21, %v2603_v8  ;;  %v9195_v21 = vld [vmem:[#allocation19_spill] sm:$0xff]  ;;  %v9199_v8 = vld [vmem:[#allocation22_spill] sm:$0xff] }
 0x4c5   :  { %2686 = vmatmul.f32.gmra.mxu2 %v9187_v9  ;;  %v4004_v20 = vadd.f32 %v4003_v33, %v3311_v14  ;;  %v9196_v33 = vld [vmem:[#allocation20_spill] sm:$0xff] }
 0x4c6   :  { %4070 = vmatmul.f32.gmra.mxu0 %v9186_v26  ;;  %4605 = vmatmul.f32.gmra.mxu1 %v9189_v25  ;;  %v9197_v32 = vand.u32 4294901760, %v9196_v33 }
 0x4c7   :  { %3417 = vmatmul.f32.gmra.mxu3 %v9191_v18  ;;  %v4535_v57 = vadd.f32 %v4534_v34, %v4004_v20 }
 0x4c8   :  { %v2607_v42 = vpop.f32.mrf.mxu2 }
 0x4c9   :  { %v2608_v15 = vadd.f32 %v2607_v42, %v2025_v38  ;;  %4949 = vxpose.xlu2.b32.start [1/16] (narrow) %v4535_v57, 16  ;;  %v9201_v38 = vld [vmem:[#allocation23_spill] sm:$0xff]  ;;  %v9202_v57 = vld [vmem:[#allocation24_spill] sm:$0xff] }
 0x4ca   :  { %v3322_v52 = vpop.f32.mrf.mxu3  ;;  %v9203_v42 = vand.u32 4294901760, %v9202_v57 }
 0x4cb   :  { %v4011_v61 = vpop.f32.mrf.mxu0  ;;  %v4546_v59 = vpop.f32.mrf.mxu1  ;;  %v3317_v54 = vadd.f32 %v3316_v19, %v2608_v15  ;;  %v9200_v19 = vand.u32 4294901760, %v9199_v8 }
 0x4cd   :  { %v4008_v55 = vadd.f32 %v4007_v22, %v3317_v54  ;;  %2691 = vmatmul.f32.gmra.mxu2 %v9190_v60 }
 0x4ce   :  { %4074 = vmatmul.f32.gmra.mxu0 %v9189_v25  ;;  %4609 = vmatmul.f32.gmra.mxu1 %v9192_v39 }
 0x4cf   :  { %3423 = vmatmul.f32.gmra.mxu3 %v9194_v36  ;;  %v4539_v12 = vadd.f32 %v4538_v48, %v4008_v55  ;;  %v9205_v36 = vld [vmem:[#allocation26_spill] sm:$0xff] }
 0x4d0   :  { %v2612_v34 = vpop.f32.mrf.mxu2 }
 0x4d1   :  { %v2613_v53 = vadd.f32 %v2612_v34, %v2029_v4  ;;  %4950 = vxpose.xlu2.b32.cont [2/16] (narrow) %v4539_v12, 16  ;;  %v9206_v4 = vand.u32 4294901760, %v9205_v36 }
 0x4d2   :  { %v3328_v35 = vpop.f32.mrf.mxu3 }
 0x4d3   :  { %v4015_v10 = vpop.f32.mrf.mxu0  ;;  %v4550_v3 = vpop.f32.mrf.mxu1  ;;  %v3323_v47 = vadd.f32 %v3322_v52, %v2613_v53 }
 0x4d5   :  { %v4012_v6 = vadd.f32 %v4011_v61, %v3323_v47  ;;  %2696 = vmatmul.f32.gmra.mxu2 %v9193_v5  ;;  %v9204_v5 = vld [vmem:[#allocation25_spill] sm:$0xff] }
 0x4d6   :  { %4078 = vmatmul.f32.gmra.mxu0 %v9192_v39  ;;  %4613 = vmatmul.f32.gmra.mxu1 %v9195_v21 }
 0x4d7   :  { %3429 = vmatmul.f32.gmra.mxu3 %v9197_v32  ;;  %v4543_v46 = vadd.f32 %v4542_v28, %v4012_v6  ;;  %v9207_v6 = vld [vmem:[#allocation27_spill] sm:$0xff] }
 0x4d8   :  { %v2617_v48 = vpop.f32.mrf.mxu2 }
 0x4d9   :  { %v2618_v16 = vadd.f32 %v2617_v48, %v2033_v1  ;;  %4951 = vxpose.xlu2.b32.cont [3/16] (narrow) %v4543_v46, 16 }
 0x4da   :  { %v3334_v26 = vpop.f32.mrf.mxu3 }
 0x4db   :  { %v4019_v9 = vpop.f32.mrf.mxu0  ;;  %v4554_v44 = vpop.f32.mrf.mxu1  ;;  %v3329_v30 = vadd.f32 %v3328_v35, %v2618_v16 }
 0x4dd   :  { %v4016_v58 = vadd.f32 %v4015_v10, %v3329_v30  ;;  %2701 = vmatmul.f32.gmra.mxu2 %v9196_v33  ;;  %v9211_v30 = vld [vmem:[#allocation30_spill] sm:$0xff] }
 0x4de   :  { %4082 = vmatmul.f32.gmra.mxu0 %v9195_v21  ;;  %4617 = vmatmul.f32.gmra.mxu1 %v9198_v24  ;;  %v9208_v21 = vld [vmem:[#allocation28_spill] sm:$0xff] }
 0x4df   :  { %3435 = vmatmul.f32.gmra.mxu3 %v9200_v19  ;;  %v4547_v50 = vadd.f32 %v4546_v59, %v4016_v58  ;;  %v9209_v33 = vand.u32 4294901760, %v9208_v21  ;;  %v9212_v58 = vand.u32 4294901760, %v9211_v30 }
 0x4e0   :  { %v2622_v22 = vpop.f32.mrf.mxu2 }
 0x4e1   :  { %v2623_v28 = vadd.f32 %v2622_v22, %v2037_v11  ;;  %4952 = vxpose.xlu2.b32.cont [4/16] (narrow) %v4547_v50, 16 }
 0x4e2   :  { %v3340_v14 = vpop.f32.mrf.mxu3 }
 0x4e3   :  { %v4023_v25 = vpop.f32.mrf.mxu0  ;;  %v4558_v20 = vpop.f32.mrf.mxu1  ;;  %v3335_v60 = vadd.f32 %v3334_v26, %v2623_v28 }
 0x4e5   :  { %v4020_v18 = vadd.f32 %v4019_v9, %v3335_v60  ;;  %2706 = vmatmul.f32.gmra.mxu2 %v9199_v8 }
 0x4e6   :  { %4086 = vmatmul.f32.gmra.mxu0 %v9198_v24  ;;  %4621 = vmatmul.f32.gmra.mxu1 %v9201_v38 }
 0x4e7   :  { %3441 = vmatmul.f32.gmra.mxu3 %v9203_v42  ;;  %v4551_v40 = vadd.f32 %v4550_v3, %v4020_v18 }
 0x4e8   :  { %v2627_v15 = vpop.f32.mrf.mxu2 }
 0x4e9   :  { %v2628_v52 = vadd.f32 %v2627_v15, %v2041_v51  ;;  %4953 = vxpose.xlu2.b32.cont [5/16] (narrow) %v4551_v40, 16  ;;  %v9216_v15 = vld [vmem:[#allocation33_spill] sm:$0xff] }
 0x4ea   :  { %v3346_v61 = vpop.f32.mrf.mxu3 }
 0x4eb   :  { %v4027_v59 = vpop.f32.mrf.mxu0  ;;  %v4562_v54 = vpop.f32.mrf.mxu1  ;;  %v3341_v55 = vadd.f32 %v3340_v14, %v2628_v52  ;;  %v9213_v14 = vld [vmem:[#allocation31_spill] sm:$0xff]  ;;  %v9217_v52 = vld [vmem:[#allocation34_spill] sm:$0xff] }
 0x4ed   :  { %v4024_v39 = vadd.f32 %v4023_v25, %v3341_v55  ;;  %2711 = vmatmul.f32.gmra.mxu2 %v9202_v57  ;;  %v9214_v25 = vld [vmem:[#allocation32_spill] sm:$0xff] }
 0x4ee   :  { %4090 = vmatmul.f32.gmra.mxu0 %v9201_v38  ;;  %4625 = vmatmul.f32.gmra.mxu1 %v9204_v5 }
 0x4ef   :  { %3447 = vmatmul.f32.gmra.mxu3 %v9206_v4  ;;  %v4555_v49 = vadd.f32 %v4554_v44, %v4024_v39  ;;  %v9210_v44 = vld [vmem:[#allocation29_spill] sm:$0xff] }
 0x4f0   :  { %v2632_v12 = vpop.f32.mrf.mxu2 }
 0x4f1   :  { %v2633_v34 = vadd.f32 %v2632_v12, %v2045_v2  ;;  %4954 = vxpose.xlu2.b32.cont [6/16] (narrow) %v4555_v49, 16  ;;  %v9219_v2 = vld [vmem:[#allocation35_spill] sm:$0xff]  ;;  %v9220_v49 = vld [vmem:[#allocation36_spill] sm:$0xff] }
 0x4f2   :  { %v3352_v53 = vpop.f32.mrf.mxu3  ;;  %v9221_v12 = vand.u32 4294901760, %v9220_v49 }
 0x4f3   :  { %v4031_v35 = vpop.f32.mrf.mxu0  ;;  %v4566_v10 = vpop.f32.mrf.mxu1  ;;  %v3347_v3 = vadd.f32 %v3346_v61, %v2633_v34  ;;  %v9218_v61 = vand.u32 4294901760, %v9217_v52 }
 0x4f5   :  { %v4028_v47 = vadd.f32 %v4027_v59, %v3347_v3  ;;  %2716 = vmatmul.f32.gmra.mxu2 %v9205_v36 }
 0x4f6   :  { %4094 = vmatmul.f32.gmra.mxu0 %v9204_v5  ;;  %4629 = vmatmul.f32.gmra.mxu1 %v9207_v6 }
 0x4f7   :  { %3453 = vmatmul.f32.gmra.mxu3 %v9209_v33  ;;  %v4559_v62 = vadd.f32 %v4558_v20, %v4028_v47  ;;  %v9215_v20 = vand.u32 4294901760, %v9214_v25  ;;  %v9223_v33 = vld [vmem:[#allocation38_spill] sm:$0xff] }
 0x4f8   :  { %v2637_v32 = vpop.f32.mrf.mxu2 }
 0x4f9   :  { %v2638_v1 = vadd.f32 %v2637_v32, %v2049_v17  ;;  %4955 = vxpose.xlu2.b32.cont [7/16] (narrow) %v4559_v62, 16  ;;  %v9224_v17 = vand.u32 4294901760, %v9223_v33 }
 0x4fa   :  { %v3358_v46 = vpop.f32.mrf.mxu3 }
 0x4fb   :  { %v4035_v48 = vpop.f32.mrf.mxu0  ;;  %v4570_v16 = vpop.f32.mrf.mxu1  ;;  %v3353_v26 = vadd.f32 %v3352_v53, %v2638_v1 }
 0x4fd   :  { %v4032_v9 = vadd.f32 %v4031_v35, %v3353_v26  ;;  %2721 = vmatmul.f32.gmra.mxu2 %v9208_v21  ;;  %v9222_v21 = vld [vmem:[#allocation37_spill] sm:$0xff] }
 0x4fe   :  { %4098 = vmatmul.f32.gmra.mxu0 %v9207_v6  ;;  %4633 = vmatmul.f32.gmra.mxu1 %v9210_v44 }
 0x4ff   :  { %3459 = vmatmul.f32.gmra.mxu3 %v9212_v58  ;;  %v4563_v13 = vadd.f32 %v4562_v54, %v4032_v9  ;;  %v9225_v9 = vld [vmem:[#allocation39_spill] sm:$0xff] }
 0x500   :  { %v2642_v24 = vpop.f32.mrf.mxu2 }
 0x501   :  { %v2643_v8 = vadd.f32 %v2642_v24, %v2053_v31  ;;  %4956 = vxpose.xlu2.b32.cont [8/16] (narrow) %v4563_v13, 16 }
 0x502   :  { %v3364_v19 = vpop.f32.mrf.mxu3 }
 0x503   :  { %v4039_v11 = vpop.f32.mrf.mxu0  ;;  %v4574_v50 = vpop.f32.mrf.mxu1  ;;  %v3359_v22 = vadd.f32 %v3358_v46, %v2643_v8 }
 0x505   :  { %v4036_v28 = vadd.f32 %v4035_v48, %v3359_v22  ;;  %2726 = vmatmul.f32.gmra.mxu2 %v9211_v30  ;;  %v9229_v22 = vld [vmem:[#allocation41_spill] sm:$0xff] }
 0x506   :  { %4102 = vmatmul.f32.gmra.mxu0 %v9210_v44  ;;  %4637 = vmatmul.f32.gmra.mxu1 %v9213_v14  ;;  %v9226_v44 = vld [vmem:[#allocation40_spill] sm:$0xff] }
 0x507   :  { %3465 = vmatmul.f32.gmra.mxu3 %v9215_v20  ;;  %v4567_v27 = vadd.f32 %v4566_v10, %v4036_v28  ;;  %v9227_v30 = vand.u32 4294901760, %v9226_v44  ;;  %v9230_v28 = vld [vmem:[#allocation43_spill] sm:$0xff] }
 0x508   :  { %v2647_v60 = vpop.f32.mrf.mxu2 }
 0x509   :  { %v2648_v18 = vadd.f32 %v2647_v60, %v2057_v45  ;;  %4957 = vxpose.xlu2.b32.cont [9/16] (narrow) %v4567_v27, 16 }
 0x50a   :  { %v3370_v38 = vpop.f32.mrf.mxu3 }
 0x50b   :  { %v4043_v57 = vpop.f32.mrf.mxu0  ;;  %v4578_v42 = vpop.f32.mrf.mxu1  ;;  %v3365_v51 = vadd.f32 %v3364_v19, %v2648_v18 }
 0x50d   :  { %v4040_v40 = vadd.f32 %v4039_v11, %v3365_v51  ;;  %2731 = vmatmul.f32.gmra.mxu2 %v9214_v25  ;;  %v9232_v25 = vld [vmem:[#allocation377_spill] sm:$0xff] }
 0x50e   :  { %4106 = vmatmul.f32.gmra.mxu0 %v9213_v14  ;;  %4641 = vmatmul.f32.gmra.mxu1 %v9216_v15  ;;  %v9231_v14 = vand.u32 4294901760, %v9230_v28  ;;  %v2077_v20 = vadd.f32 %v9233_v37, %v9232_v25 }
 0x50f   :  { %3471 = vmatmul.f32.gmra.mxu3 %v9218_v61  ;;  %v4571_v41 = vadd.f32 %v4570_v16, %v4040_v40  ;;  %v9234_v40 = vld [vmem:[#allocation42_spill] sm:$0xff]  ;;  %v9237_v61 = vld [vmem:[#allocation380_spill] sm:$0xff] }
 0x510   :  { %v2652_v59 = vpop.f32.mrf.mxu2 }
 0x511   :  { %v2653_v54 = vadd.f32 %v2652_v59, %v2061_v7  ;;  %4958 = vxpose.xlu2.b32.cont [10/16] (narrow) %v4571_v41, 16  ;;  %v9238_v7 = vld [vmem:[#allocation378_spill] sm:$0xff] }
 0x512   :  { %v3376_v55 = vpop.f32.mrf.mxu3  ;;  %v2081_v41 = vadd.f32 %v9238_v7, %v9237_v61  ;;  %v9258_v61 = vld [vmem:[#allocation80_spill] sm:$0xff] }
 0x513   :  { %v4047_v39 = vpop.f32.mrf.mxu0  ;;  %v4582_v5 = vpop.f32.mrf.mxu1  ;;  %v3371_v36 = vadd.f32 %v3370_v38, %v2653_v54 }
 0x515   :  { %v4044_v4 = vadd.f32 %v4043_v57, %v3371_v36  ;;  %2736 = vmatmul.f32.gmra.mxu2 %v9217_v52 }
 0x516   :  { %4110 = vmatmul.f32.gmra.mxu0 %v9216_v15  ;;  %4645 = vmatmul.f32.gmra.mxu1 %v9219_v2  ;;  %v9235_v15 = vld [vmem:[#allocation44_spill] sm:$0xff] }
 0x517   :  { %3477 = vmatmul.f32.gmra.mxu3 %v9221_v12  ;;  %v4575_v63 = vadd.f32 %v4574_v50, %v4044_v4  ;;  %v9236_v52 = vand.u32 4294901760, %v9235_v15  ;;  %v9240_v12 = vld [vmem:[#allocation47_spill] sm:$0xff] }
 0x518   :  { %v2657_v34 = vpop.f32.mrf.mxu2 }
 0x519   :  { %v2658_v53 = vadd.f32 %v2657_v34, %v2065_v29  ;;  %4959 = vxpose.xlu2.b32.cont [11/16] (narrow) %v4575_v63, 16  ;;  %v9241_v29 = vand.u32 4294901760, %v9240_v12 }
 0x51a   :  { %v3382_v35 = vpop.f32.mrf.mxu3 }
 0x51b   :  { %v4051_v10 = vpop.f32.mrf.mxu0  ;;  %v4586_v3 = vpop.f32.mrf.mxu1  ;;  %v3377_v47 = vadd.f32 %v3376_v55, %v2658_v53  ;;  %v9242_v53 = vld [vmem:[#allocation52_spill] sm:$0xff] }
 0x51d   :  { %v4048_v6 = vadd.f32 %v4047_v39, %v3377_v47  ;;  %2741 = vmatmul.f32.gmra.mxu2 %v9220_v49  ;;  %v9239_v49 = vld [vmem:[#allocation46_spill] sm:$0xff] }
 0x51e   :  { %4114 = vmatmul.f32.gmra.mxu0 %v9219_v2  ;;  %4649 = vmatmul.f32.gmra.mxu1 %v9222_v21 }
 0x51f   :  { %3483 = vmatmul.f32.gmra.mxu3 %v9224_v17  ;;  %v4579_v23 = vadd.f32 %v4578_v42, %v4048_v6  ;;  %v9244_v17 = vld [vmem:[#allocation51_spill] sm:$0xff] }
 0x520   :  { %v2662_v62 = vpop.f32.mrf.mxu2 }
 0x521   :  { %v2663_v32 = vadd.f32 %v2662_v62, %v2069_v0  ;;  %4960 = vxpose.xlu2.b32.cont [12/16] (narrow) %v4579_v23, 16  ;;  %v9245_v0 = vand.u32 4294901760, %v9244_v17 }
 0x522   :  { %v3388_v1 = vpop.f32.mrf.mxu3 }
 0x523   :  { %v4055_v46 = vpop.f32.mrf.mxu0  ;;  %v4590_v48 = vpop.f32.mrf.mxu1  ;;  %v3383_v16 = vadd.f32 %v3382_v35, %v2663_v32  ;;  %v9246_v32 = vld [vmem:[#allocation59_spill] sm:$0xff] }
 0x525   :  { %v4052_v26 = vadd.f32 %v4051_v10, %v3383_v16  ;;  %2746 = vmatmul.f32.gmra.mxu2 %v9223_v33  ;;  %v9243_v33 = vld [vmem:[#allocation50_spill] sm:$0xff] }
 0x526   :  { %4118 = vmatmul.f32.gmra.mxu0 %v9222_v21  ;;  %4653 = vmatmul.f32.gmra.mxu1 %v9225_v9 }
 0x527   :  { %3489 = vmatmul.f32.gmra.mxu3 %v9227_v30  ;;  %v4583_v58 = vadd.f32 %v4582_v5, %v4052_v26  ;;  %v9248_v30 = vld [vmem:[#allocation58_spill] sm:$0xff] }
 0x528   :  { %v2667_v31 = vpop.f32.mrf.mxu2  ;;  %v9249_v43 = vand.u32 4294901760, %v9248_v30 }
 0x529   :  { %v2668_v13 = vadd.f32 %v2667_v31, %v2073_v56  ;;  %4961 = vxpose.xlu2.b32.cont [13/16] (narrow) %v4583_v58, 16  ;;  %v9250_v31 = vld [vmem:[#allocation66_spill] sm:$0xff] }
 0x52a   :  { %v3394_v24 = vpop.f32.mrf.mxu3 }
 0x52b   :  { %v4059_v8 = vpop.f32.mrf.mxu0  ;;  %v4594_v19 = vpop.f32.mrf.mxu1  ;;  %v3389_v11 = vadd.f32 %v3388_v1, %v2668_v13 }
 0x52d   :  { %v4056_v50 = vadd.f32 %v4055_v46, %v3389_v11  ;;  %2751 = vmatmul.f32.gmra.mxu2 %v9226_v44  ;;  %v9247_v44 = vld [vmem:[#allocation56_spill] sm:$0xff] }
 0x52e   :  { %4122 = vmatmul.f32.gmra.mxu0 %v9225_v9  ;;  %4657 = vmatmul.f32.gmra.mxu1 %v9229_v22 }
 0x52f   :  { %3495 = vmatmul.f32.gmra.mxu3 %v9231_v14  ;;  %v4587_v45 = vadd.f32 %v4586_v3, %v4056_v50 }
 0x530   :  { %v2672_v27 = vpop.f32.mrf.mxu2 }
 0x531   :  { %v2673_v60 = vadd.f32 %v2672_v27, %v2077_v20  ;;  %4962 = vxpose.xlu2.b32.cont [14/16] (narrow) %v4587_v45, 16  ;;  %v9254_v20 = vld [vmem:[#allocation73_spill] sm:$0xff] }
 0x532   :  { %v3400_v18 = vpop.f32.mrf.mxu3 }
 0x533   :  { %v4063_v38 = vpop.f32.mrf.mxu0  ;;  %v4598_v57 = vpop.f32.mrf.mxu1  ;;  %v3395_v42 = vadd.f32 %v3394_v24, %v2673_v60 }
 0x535   :  { %v4060_v51 = vadd.f32 %v4059_v8, %v3395_v42  ;;  %2756 = vmatmul.f32.gmra.mxu2 %v9230_v28  ;;  %v9252_v28 = vld [vmem:[#allocation65_spill] sm:$0xff]  ;;  %v9255_v42 = vld [vmem:[#allocation70_spill] sm:$0xff] }
 0x536   :  { %4126 = vmatmul.f32.gmra.mxu0 %v9229_v22  ;;  %4661 = vmatmul.f32.gmra.mxu1 %v9234_v40  ;;  %v9251_v22 = vld [vmem:[#allocation63_spill] sm:$0xff]  ;;  %v9253_v14 = vand.u32 4294901760, %v9252_v28 }
 0x537   :  { %3501 = vmatmul.f32.gmra.mxu3 %v9236_v52  ;;  %v4591_v59 = vadd.f32 %v4590_v48, %v4060_v51  ;;  %v9256_v51 = vld [vmem:[#allocation72_spill] sm:$0xff] }
 0x538   :  { %v2677_v54 = vpop.f32.mrf.mxu2 }
 0x539   :  { %v2678_v55 = vadd.f32 %v2677_v54, %v2081_v41  ;;  %4963 = vxpose.xlu2.b32.cont [15/16] (narrow) %v4591_v59, 16 }
 0x53a   :  { %v3406_v39 = vpop.f32.mrf.mxu3 }
 0x53b   :  { %v4067_v5 = vpop.f32.mrf.mxu0  ;;  %v4602_v36 = vpop.f32.mrf.mxu1  ;;  %v3401_v4 = vadd.f32 %v3400_v18, %v2678_v55 }
 0x53d   :  { %v4064_v2 = vadd.f32 %v4063_v38, %v3401_v4  ;;  %2761 = vmatmul.f32.gmra.mxu2 %v9235_v15 }
 0x53e   :  { %4130 = vmatmul.f32.gmra.mxu0 %v9234_v40  ;;  %4665 = vmatmul.f32.gmra.mxu1 %v9239_v49  ;;  %v9257_v40 = vand.u32 4294901760, %v9256_v51 }
 0x53f   :  { %3507 = vmatmul.f32.gmra.mxu3 %v9241_v29  ;;  %v4595_v63 = vadd.f32 %v4594_v19, %v4064_v2 }
 0x540   :  { %v2682_v34 = vpop.f32.mrf.mxu2 }
 0x541   :  { %v2683_v35 = vadd.f32 %v2682_v34, %v9242_v53  ;;  %4964 = vxpose.xlu2.b32.end [16/16] (narrow) %v4595_v63, 16 }
 0x542   :  { %v3412_v10 = vpop.f32.mrf.mxu3 }
 0x543   :  { %v4071_v3 = vpop.f32.mrf.mxu0  ;;  %v4606_v47 = vpop.f32.mrf.mxu1  ;;  %v3407_v6 = vadd.f32 %v3406_v39, %v2683_v35 }
 0x545   :  { %v4068_v21 = vadd.f32 %v4067_v5, %v3407_v6  ;;  %2766 = vmatmul.f32.gmra.mxu2 %v9240_v12  ;;  %v9259_v5 = vld [vmem:[#allocation77_spill] sm:$0xff]  ;;  %v9262_v12 = vld [vmem:[#allocation87_spill] sm:$0xff] }
 0x546   :  { %4134 = vmatmul.f32.gmra.mxu0 %v9239_v49  ;;  %4669 = vmatmul.f32.gmra.mxu1 %v9243_v33 }
 0x547   :  { %3513 = vmatmul.f32.gmra.mxu3 %v9245_v0  ;;  %v4599_v23 = vadd.f32 %v4598_v57, %v4068_v21 }
 0x548   :  { %v2687_v62 = vpop.f32.mrf.mxu2 }
 0x549   :  { %v2688_v1 = vadd.f32 %v2687_v62, %v9246_v32  ;;  %4981 = vxpose.xlu0.b32.start [1/16] (narrow) %v4599_v23, 16 }
 0x54a   :  { %v3418_v46 = vpop.f32.mrf.mxu3 }
 0x54b   :  { %v4075_v48 = vpop.f32.mrf.mxu0  ;;  %v4610_v16 = vpop.f32.mrf.mxu1  ;;  %v3413_v26 = vadd.f32 %v3412_v10, %v2688_v1 }
 0x54d   :  { %v4072_v9 = vadd.f32 %v4071_v3, %v3413_v26  ;;  %2771 = vmatmul.f32.gmra.mxu2 %v9244_v17  ;;  %v9263_v3 = vld [vmem:[#allocation84_spill] sm:$0xff]  ;;  %v9266_v17 = vld [vmem:[#allocation94_spill] sm:$0xff] }
 0x54e   :  { %4138 = vmatmul.f32.gmra.mxu0 %v9243_v33  ;;  %4673 = vmatmul.f32.gmra.mxu1 %v9247_v44 }
 0x54f   :  { %3519 = vmatmul.f32.gmra.mxu3 %v9249_v43  ;;  %v4603_v56 = vadd.f32 %v4602_v36, %v4072_v9  ;;  %v9260_v36 = vld [vmem:[#allocation79_spill] sm:$0xff] }
 0x550   :  { %v2692_v58 = vpop.f32.mrf.mxu2  ;;  %v9261_v4 = vand.u32 4294901760, %v9260_v36 }
 0x551   :  { %v2693_v13 = vadd.f32 %v2692_v58, %v9250_v31  ;;  %4982 = vxpose.xlu0.b32.cont [2/16] (narrow) %v4603_v56, 16 }
 0x552   :  { %v3424_v24 = vpop.f32.mrf.mxu3 }
 0x553   :  { %v4079_v8 = vpop.f32.mrf.mxu0  ;;  %v4614_v19 = vpop.f32.mrf.mxu1  ;;  %v3419_v11 = vadd.f32 %v3418_v46, %v2693_v13 }
 0x555   :  { %v4076_v50 = vadd.f32 %v4075_v48, %v3419_v11  ;;  %2776 = vmatmul.f32.gmra.mxu2 %v9248_v30  ;;  %v9267_v48 = vld [vmem:[#allocation91_spill] sm:$0xff]  ;;  %v9270_v30 = vld [vmem:[#allocation101_spill] sm:$0xff] }
 0x556   :  { %4142 = vmatmul.f32.gmra.mxu0 %v9247_v44  ;;  %4677 = vmatmul.f32.gmra.mxu1 %v9251_v22 }
 0x557   :  { %3525 = vmatmul.f32.gmra.mxu3 %v9253_v14  ;;  %v4607_v25 = vadd.f32 %v4606_v47, %v4076_v50  ;;  %v9264_v47 = vld [vmem:[#allocation86_spill] sm:$0xff] }
 0x558   :  { %v2697_v37 = vpop.f32.mrf.mxu2  ;;  %v9265_v6 = vand.u32 4294901760, %v9264_v47 }
 0x559   :  { %v2698_v45 = vadd.f32 %v2697_v37, %v9254_v20  ;;  %4983 = vxpose.xlu0.b32.cont [3/16] (narrow) %v4607_v25, 16 }
 0x55a   :  { %v3430_v27 = vpop.f32.mrf.mxu3 }
 0x55b   :  { %v4083_v60 = vpop.f32.mrf.mxu0  ;;  %v4618_v18 = vpop.f32.mrf.mxu1  ;;  %v3425_v38 = vadd.f32 %v3424_v24, %v2698_v45 }
 0x55d   :  { %v4080_v57 = vadd.f32 %v4079_v8, %v3425_v38  ;;  %2781 = vmatmul.f32.gmra.mxu2 %v9252_v28  ;;  %v9271_v8 = vld [vmem:[#allocation98_spill] sm:$0xff]  ;;  %v9274_v28 = vld [vmem:[#allocation108_spill] sm:$0xff] }
 0x55e   :  { %4146 = vmatmul.f32.gmra.mxu0 %v9251_v22  ;;  %4681 = vmatmul.f32.gmra.mxu1 %v9255_v42 }
 0x55f   :  { %3531 = vmatmul.f32.gmra.mxu3 %v9257_v40  ;;  %v4611_v15 = vadd.f32 %v4610_v16, %v4080_v57  ;;  %v9268_v16 = vld [vmem:[#allocation93_spill] sm:$0xff] }
 0x560   :  { %v2702_v52 = vpop.f32.mrf.mxu2  ;;  %v9269_v26 = vand.u32 4294901760, %v9268_v16 }
 0x561   :  { %v2703_v7 = vadd.f32 %v2702_v52, %v9258_v61  ;;  %4984 = vxpose.xlu0.b32.cont [4/16] (narrow) %v4611_v15, 16 }
 0x562   :  { %v3436_v41 = vpop.f32.mrf.mxu3 }
 0x563   :  { %v4087_v59 = vpop.f32.mrf.mxu0  ;;  %v4622_v54 = vpop.f32.mrf.mxu1  ;;  %v3431_v55 = vadd.f32 %v3430_v27, %v2703_v7 }
 0x565   :  { %v4084_v39 = vadd.f32 %v4083_v60, %v3431_v55  ;;  %2786 = vmatmul.f32.gmra.mxu2 %v9256_v51  ;;  %v9275_v60 = vld [vmem:[#allocation105_spill] sm:$0xff]  ;;  %v9278_v51 = vld [vmem:[#allocation115_spill] sm:$0xff] }
 0x566   :  { %4150 = vmatmul.f32.gmra.mxu0 %v9255_v42  ;;  %4685 = vmatmul.f32.gmra.mxu1 %v9259_v5 }
 0x567   :  { %3537 = vmatmul.f32.gmra.mxu3 %v9261_v4  ;;  %v4615_v2 = vadd.f32 %v4614_v19, %v4084_v39  ;;  %v9272_v19 = vld [vmem:[#allocation100_spill] sm:$0xff] }
 0x568   :  { %v2707_v49 = vpop.f32.mrf.mxu2  ;;  %v9273_v11 = vand.u32 4294901760, %v9272_v19 }
 0x569   :  { %v2708_v29 = vadd.f32 %v2707_v49, %v9262_v12  ;;  %4985 = vxpose.xlu0.b32.cont [5/16] (narrow) %v4615_v2, 16 }
 0x56a   :  { %v3442_v63 = vpop.f32.mrf.mxu3 }
 0x56b   :  { %v4091_v34 = vpop.f32.mrf.mxu0  ;;  %v4626_v53 = vpop.f32.mrf.mxu1  ;;  %v3437_v35 = vadd.f32 %v3436_v41, %v2708_v29 }
 0x56d   :  { %v4088_v10 = vadd.f32 %v4087_v59, %v3437_v35  ;;  %2791 = vmatmul.f32.gmra.mxu2 %v9260_v36  ;;  %v9279_v59 = vld [vmem:[#allocation112_spill] sm:$0xff]  ;;  %v9282_v36 = vld [vmem:[#allocation122_spill] sm:$0xff] }
 0x56e   :  { %4154 = vmatmul.f32.gmra.mxu0 %v9259_v5  ;;  %4689 = vmatmul.f32.gmra.mxu1 %v9263_v3 }
 0x56f   :  { %3543 = vmatmul.f32.gmra.mxu3 %v9265_v6  ;;  %v4619_v21 = vadd.f32 %v4618_v18, %v4088_v10  ;;  %v9276_v18 = vld [vmem:[#allocation107_spill] sm:$0xff] }
 0x570   :  { %v2712_v33 = vpop.f32.mrf.mxu2  ;;  %v9277_v38 = vand.u32 4294901760, %v9276_v18 }
 0x571   :  { %v2713_v0 = vadd.f32 %v2712_v33, %v9266_v17  ;;  %4986 = vxpose.xlu0.b32.cont [6/16] (narrow) %v4619_v21, 16 }
 0x572   :  { %v3448_v23 = vpop.f32.mrf.mxu3 }
 0x573   :  { %v4095_v62 = vpop.f32.mrf.mxu0  ;;  %v4630_v32 = vpop.f32.mrf.mxu1  ;;  %v3443_v1 = vadd.f32 %v3442_v63, %v2713_v0 }
 0x575   :  { %v4092_v46 = vadd.f32 %v4091_v34, %v3443_v1  ;;  %2796 = vmatmul.f32.gmra.mxu2 %v9264_v47  ;;  %v9283_v34 = vld [vmem:[#allocation119_spill] sm:$0xff]  ;;  %v9286_v47 = vld [vmem:[#allocation129_spill] sm:$0xff] }
 0x576   :  { %4158 = vmatmul.f32.gmra.mxu0 %v9263_v3  ;;  %4693 = vmatmul.f32.gmra.mxu1 %v9267_v48 }
 0x577   :  { %3549 = vmatmul.f32.gmra.mxu3 %v9269_v26  ;;  %v4623_v9 = vadd.f32 %v4622_v54, %v4092_v46  ;;  %v9280_v54 = vld [vmem:[#allocation114_spill] sm:$0xff] }
 0x578   :  { %v2717_v44 = vpop.f32.mrf.mxu2  ;;  %v9281_v55 = vand.u32 4294901760, %v9280_v54 }
 0x579   :  { %v2718_v43 = vadd.f32 %v2717_v44, %v9270_v30  ;;  %4987 = vxpose.xlu0.b32.cont [7/16] (narrow) %v4623_v9, 16 }
 0x57a   :  { %v3454_v56 = vpop.f32.mrf.mxu3 }
 0x57b   :  { %v4099_v58 = vpop.f32.mrf.mxu0  ;;  %v4634_v31 = vpop.f32.mrf.mxu1  ;;  %v3449_v13 = vadd.f32 %v3448_v23, %v2718_v43 }
 0x57d   :  { %v4096_v24 = vadd.f32 %v4095_v62, %v3449_v13  ;;  %2801 = vmatmul.f32.gmra.mxu2 %v9268_v16  ;;  %v9287_v62 = vld [vmem:[#allocation126_spill] sm:$0xff]  ;;  %v9290_v16 = vld [vmem:[#allocation136_spill] sm:$0xff] }
 0x57e   :  { %4162 = vmatmul.f32.gmra.mxu0 %v9267_v48  ;;  %4697 = vmatmul.f32.gmra.mxu1 %v9271_v8 }
 0x57f   :  { %3555 = vmatmul.f32.gmra.mxu3 %v9273_v11  ;;  %v4627_v50 = vadd.f32 %v4626_v53, %v4096_v24  ;;  %v9284_v53 = vld [vmem:[#allocation121_spill] sm:$0xff] }
 0x580   :  { %v2722_v22 = vpop.f32.mrf.mxu2  ;;  %v9285_v35 = vand.u32 4294901760, %v9284_v53 }
 0x581   :  { %v2723_v14 = vadd.f32 %v2722_v22, %v9274_v28  ;;  %4988 = vxpose.xlu0.b32.cont [8/16] (narrow) %v4627_v50, 16 }
 0x582   :  { %v3460_v25 = vpop.f32.mrf.mxu3 }
 0x583   :  { %v4103_v37 = vpop.f32.mrf.mxu0  ;;  %v4638_v20 = vpop.f32.mrf.mxu1  ;;  %v3455_v45 = vadd.f32 %v3454_v56, %v2723_v14 }
 0x585   :  { %v4100_v27 = vadd.f32 %v4099_v58, %v3455_v45  ;;  %2806 = vmatmul.f32.gmra.mxu2 %v9272_v19  ;;  %v9291_v58 = vld [vmem:[#allocation133_spill] sm:$0xff]  ;;  %v9294_v19 = vld [vmem:[#allocation144_spill] sm:$0xff] }
 0x586   :  { %4166 = vmatmul.f32.gmra.mxu0 %v9271_v8  ;;  %4701 = vmatmul.f32.gmra.mxu1 %v9275_v60 }
 0x587   :  { %3561 = vmatmul.f32.gmra.mxu3 %v9277_v38  ;;  %v4631_v57 = vadd.f32 %v4630_v32, %v4100_v27  ;;  %v9288_v32 = vld [vmem:[#allocation128_spill] sm:$0xff] }
 0x588   :  { %v2727_v42 = vpop.f32.mrf.mxu2  ;;  %v9289_v1 = vand.u32 4294901760, %v9288_v32 }
 0x589   :  { %v2728_v40 = vadd.f32 %v2727_v42, %v9278_v51  ;;  %4989 = vxpose.xlu0.b32.cont [9/16] (narrow) %v4631_v57, 16 }
 0x58a   :  { %v3466_v15 = vpop.f32.mrf.mxu3 }
 0x58b   :  { %v4107_v52 = vpop.f32.mrf.mxu0  ;;  %v4642_v61 = vpop.f32.mrf.mxu1  ;;  %v3461_v7 = vadd.f32 %v3460_v25, %v2728_v40 }
 0x58d   :  { %v4104_v41 = vadd.f32 %v4103_v37, %v3461_v7  ;;  %2811 = vmatmul.f32.gmra.mxu2 %v9276_v18  ;;  %v9295_v37 = vld [vmem:[#allocation140_spill] sm:$0xff] }
 0x58e   :  { %4170 = vmatmul.f32.gmra.mxu0 %v9275_v60  ;;  %4705 = vmatmul.f32.gmra.mxu1 %v9279_v59  ;;  %v9298_v18 = vld [vmem:[#allocation152_spill] sm:$0xff] }
 0x58f   :  { %3567 = vmatmul.f32.gmra.mxu3 %v9281_v55  ;;  %v4635_v39 = vadd.f32 %v4634_v31, %v4104_v41  ;;  %v9292_v31 = vld [vmem:[#allocation135_spill] sm:$0xff] }
 0x590   :  { %v2732_v5 = vpop.f32.mrf.mxu2  ;;  %v9293_v13 = vand.u32 4294901760, %v9292_v31 }
 0x591   :  { %v2733_v4 = vadd.f32 %v2732_v5, %v9282_v36  ;;  %4990 = vxpose.xlu0.b32.cont [10/16] (narrow) %v4635_v39, 16 }
 0x592   :  { %v3472_v2 = vpop.f32.mrf.mxu3 }
 0x593   :  { %v4111_v49 = vpop.f32.mrf.mxu0  ;;  %v4646_v12 = vpop.f32.mrf.mxu1  ;;  %v3467_v29 = vadd.f32 %v3466_v15, %v2733_v4 }
 0x595   :  { %v4108_v63 = vadd.f32 %v4107_v52, %v3467_v29  ;;  %2816 = vmatmul.f32.gmra.mxu2 %v9280_v54  ;;  %v9299_v52 = vld [vmem:[#allocation148_spill] sm:$0xff]  ;;  %v9302_v54 = vld [vmem:[#allocation159_spill] sm:$0xff] }
 0x596   :  { %4174 = vmatmul.f32.gmra.mxu0 %v9279_v59  ;;  %4709 = vmatmul.f32.gmra.mxu1 %v9283_v34 }
 0x597   :  { %3573 = vmatmul.f32.gmra.mxu3 %v9285_v35  ;;  %v4639_v10 = vadd.f32 %v4638_v20, %v4108_v63  ;;  %v9296_v20 = vld [vmem:[#allocation142_spill] sm:$0xff] }
 0x598   :  { %v2737_v3 = vpop.f32.mrf.mxu2  ;;  %v9297_v45 = vand.u32 4294901760, %v9296_v20 }
 0x599   :  { %v2738_v6 = vadd.f32 %v2737_v3, %v9286_v47  ;;  %4991 = vxpose.xlu0.b32.cont [11/16] (narrow) %v4639_v10, 16 }
 0x59a   :  { %v3478_v21 = vpop.f32.mrf.mxu3 }
 0x59b   :  { %v4115_v33 = vpop.f32.mrf.mxu0  ;;  %v4650_v17 = vpop.f32.mrf.mxu1  ;;  %v3473_v0 = vadd.f32 %v3472_v2, %v2738_v6 }
 0x59d   :  { %v4112_v23 = vadd.f32 %v4111_v49, %v3473_v0  ;;  %2821 = vmatmul.f32.gmra.mxu2 %v9284_v53  ;;  %v9303_v49 = vld [vmem:[#allocation155_spill] sm:$0xff]  ;;  %v9306_v53 = vld [vmem:[#allocation166_spill] sm:$0xff] }
 0x59e   :  { %4178 = vmatmul.f32.gmra.mxu0 %v9283_v34  ;;  %4713 = vmatmul.f32.gmra.mxu1 %v9287_v62 }
 0x59f   :  { %3579 = vmatmul.f32.gmra.mxu3 %v9289_v1  ;;  %v4643_v46 = vadd.f32 %v4642_v61, %v4112_v23  ;;  %v9300_v61 = vld [vmem:[#allocation150_spill] sm:$0xff] }
 0x5a0   :  { %v2742_v48 = vpop.f32.mrf.mxu2  ;;  %v9301_v7 = vand.u32 4294901760, %v9300_v61 }
 0x5a1   :  { %v2743_v26 = vadd.f32 %v2742_v48, %v9290_v16  ;;  %4992 = vxpose.xlu0.b32.cont [12/16] (narrow) %v4643_v46, 16 }
 0x5a2   :  { %v3484_v9 = vpop.f32.mrf.mxu3 }
 0x5a3   :  { %v4119_v44 = vpop.f32.mrf.mxu0  ;;  %v4654_v30 = vpop.f32.mrf.mxu1  ;;  %v3479_v43 = vadd.f32 %v3478_v21, %v2743_v26 }
 0x5a5   :  { %v4116_v56 = vadd.f32 %v4115_v33, %v3479_v43  ;;  %2826 = vmatmul.f32.gmra.mxu2 %v9288_v32  ;;  %v9307_v33 = vld [vmem:[#allocation162_spill] sm:$0xff]  ;;  %v9310_v32 = vld [vmem:[#allocation173_spill] sm:$0xff] }
 0x5a6   :  { %4182 = vmatmul.f32.gmra.mxu0 %v9287_v62  ;;  %4717 = vmatmul.f32.gmra.mxu1 %v9291_v58 }
 0x5a7   :  { %3585 = vmatmul.f32.gmra.mxu3 %v9293_v13  ;;  %v4647_v24 = vadd.f32 %v4646_v12, %v4116_v56  ;;  %v9304_v12 = vld [vmem:[#allocation157_spill] sm:$0xff] }
 0x5a8   :  { %v2747_v8 = vpop.f32.mrf.mxu2  ;;  %v9305_v29 = vand.u32 4294901760, %v9304_v12 }
 0x5a9   :  { %v2748_v11 = vadd.f32 %v2747_v8, %v9294_v19  ;;  %4993 = vxpose.xlu0.b32.cont [13/16] (narrow) %v4647_v24, 16 }
 0x5aa   :  { %v3490_v50 = vpop.f32.mrf.mxu3 }
 0x5ab   :  { %v4123_v22 = vpop.f32.mrf.mxu0  ;;  %v4658_v28 = vpop.f32.mrf.mxu1  ;;  %v3485_v14 = vadd.f32 %v3484_v9, %v2748_v11 }
 0x5ad   :  { %v4120_v25 = vadd.f32 %v4119_v44, %v3485_v14  ;;  %2831 = vmatmul.f32.gmra.mxu2 %v9292_v31  ;;  %v9311_v44 = vld [vmem:[#allocation169_spill] sm:$0xff]  ;;  %v9314_v31 = vld [vmem:[#allocation180_spill] sm:$0xff] }
 0x5ae   :  { %4186 = vmatmul.f32.gmra.mxu0 %v9291_v58  ;;  %4721 = vmatmul.f32.gmra.mxu1 %v9295_v37 }
 0x5af   :  { %3591 = vmatmul.f32.gmra.mxu3 %v9297_v45  ;;  %v4651_v27 = vadd.f32 %v4650_v17, %v4120_v25  ;;  %v9308_v17 = vld [vmem:[#allocation164_spill] sm:$0xff] }
 0x5b0   :  { %v2752_v60 = vpop.f32.mrf.mxu2  ;;  %v9309_v0 = vand.u32 4294901760, %v9308_v17 }
 0x5b1   :  { %v2753_v38 = vadd.f32 %v2752_v60, %v9298_v18  ;;  %4994 = vxpose.xlu0.b32.cont [14/16] (narrow) %v4651_v27, 16 }
 0x5b2   :  { %v3496_v57 = vpop.f32.mrf.mxu3 }
 0x5b3   :  { %v4127_v42 = vpop.f32.mrf.mxu0  ;;  %v4662_v51 = vpop.f32.mrf.mxu1  ;;  %v3491_v40 = vadd.f32 %v3490_v50, %v2753_v38 }
 0x5b5   :  { %v4124_v15 = vadd.f32 %v4123_v22, %v3491_v40  ;;  %2836 = vmatmul.f32.gmra.mxu2 %v9296_v20  ;;  %v9315_v22 = vld [vmem:[#allocation176_spill] sm:$0xff]  ;;  %v9318_v20 = vld [vmem:[#allocation187_spill] sm:$0xff] }
 0x5b6   :  { %4190 = vmatmul.f32.gmra.mxu0 %v9295_v37  ;;  %4725 = vmatmul.f32.gmra.mxu1 %v9299_v52 }
 0x5b7   :  { %3597 = vmatmul.f32.gmra.mxu3 %v9301_v7  ;;  %v4655_v41 = vadd.f32 %v4654_v30, %v4124_v15  ;;  %v9312_v30 = vld [vmem:[#allocation171_spill] sm:$0xff] }
 0x5b8   :  { %v2757_v59 = vpop.f32.mrf.mxu2  ;;  %v9313_v43 = vand.u32 4294901760, %v9312_v30 }
 0x5b9   :  { %v2758_v55 = vadd.f32 %v2757_v59, %v9302_v54  ;;  %4995 = vxpose.xlu0.b32.cont [15/16] (narrow) %v4655_v41, 16 }
 0x5ba   :  { %v3502_v39 = vpop.f32.mrf.mxu3 }
 0x5bb   :  { %v4131_v5 = vpop.f32.mrf.mxu0  ;;  %v4666_v36 = vpop.f32.mrf.mxu1  ;;  %v3497_v4 = vadd.f32 %v3496_v57, %v2758_v55 }
 0x5bd   :  { %v4128_v2 = vadd.f32 %v4127_v42, %v3497_v4  ;;  %2841 = vmatmul.f32.gmra.mxu2 %v9300_v61  ;;  %v9319_v42 = vld [vmem:[#allocation183_spill] sm:$0xff]  ;;  %v9322_v61 = vld [vmem:[#allocation194_spill] sm:$0xff] }
 0x5be   :  { %4194 = vmatmul.f32.gmra.mxu0 %v9299_v52  ;;  %4729 = vmatmul.f32.gmra.mxu1 %v9303_v49 }
 0x5bf   :  { %3603 = vmatmul.f32.gmra.mxu3 %v9305_v29  ;;  %v4659_v63 = vadd.f32 %v4658_v28, %v4128_v2  ;;  %v9316_v28 = vld [vmem:[#allocation178_spill] sm:$0xff] }
 0x5c0   :  { %v2762_v34 = vpop.f32.mrf.mxu2  ;;  %v9317_v14 = vand.u32 4294901760, %v9316_v28 }
 0x5c1   :  { %v2763_v35 = vadd.f32 %v2762_v34, %v9306_v53  ;;  %4996 = vxpose.xlu0.b32.end [16/16] (narrow) %v4659_v63, 16 }
 0x5c2   :  { %v3508_v10 = vpop.f32.mrf.mxu3 }
 0x5c3   :  { %v4135_v3 = vpop.f32.mrf.mxu0  ;;  %v4670_v47 = vpop.f32.mrf.mxu1  ;;  %v3503_v6 = vadd.f32 %v3502_v39, %v2763_v35 }
 0x5c5   :  { %v4132_v21 = vadd.f32 %v4131_v5, %v3503_v6  ;;  %2846 = vmatmul.f32.gmra.mxu2 %v9304_v12  ;;  %v9323_v5 = vld [vmem:[#allocation190_spill] sm:$0xff]  ;;  %v9326_v12 = vld [vmem:[#allocation201_spill] sm:$0xff] }
 0x5c6   :  { %4198 = vmatmul.f32.gmra.mxu0 %v9303_v49  ;;  %4733 = vmatmul.f32.gmra.mxu1 %v9307_v33 }
 0x5c7   :  { %3609 = vmatmul.f32.gmra.mxu3 %v9309_v0  ;;  %v4663_v23 = vadd.f32 %v4662_v51, %v4132_v21  ;;  %v9320_v51 = vld [vmem:[#allocation185_spill] sm:$0xff] }
 0x5c8   :  { %v2767_v62 = vpop.f32.mrf.mxu2  ;;  %v9321_v40 = vand.u32 4294901760, %v9320_v51 }
 0x5c9   :  { %v2768_v1 = vadd.f32 %v2767_v62, %v9310_v32  ;;  %5013 = vxpose.xlu1.b32.start [1/16] (narrow) %v4663_v23, 16 }
 0x5ca   :  { %v3514_v46 = vpop.f32.mrf.mxu3 }
 0x5cb   :  { %v4139_v48 = vpop.f32.mrf.mxu0  ;;  %v4674_v16 = vpop.f32.mrf.mxu1  ;;  %v3509_v26 = vadd.f32 %v3508_v10, %v2768_v1 }
 0x5cd   :  { %v4136_v9 = vadd.f32 %v4135_v3, %v3509_v26  ;;  %2851 = vmatmul.f32.gmra.mxu2 %v9308_v17  ;;  %v9327_v3 = vld [vmem:[#allocation197_spill] sm:$0xff]  ;;  %v9330_v17 = vld [vmem:[#allocation208_spill] sm:$0xff] }
 0x5ce   :  { %4202 = vmatmul.f32.gmra.mxu0 %v9307_v33  ;;  %4737 = vmatmul.f32.gmra.mxu1 %v9311_v44 }
 0x5cf   :  { %3615 = vmatmul.f32.gmra.mxu3 %v9313_v43  ;;  %v4667_v56 = vadd.f32 %v4666_v36, %v4136_v9  ;;  %v9324_v36 = vld [vmem:[#allocation192_spill] sm:$0xff] }
 0x5d0   :  { %v2772_v58 = vpop.f32.mrf.mxu2  ;;  %v9325_v4 = vand.u32 4294901760, %v9324_v36 }
 0x5d1   :  { %v2773_v13 = vadd.f32 %v2772_v58, %v9314_v31  ;;  %5014 = vxpose.xlu1.b32.cont [2/16] (narrow) %v4667_v56, 16 }
 0x5d2   :  { %v3520_v24 = vpop.f32.mrf.mxu3 }
 0x5d3   :  { %v4143_v8 = vpop.f32.mrf.mxu0  ;;  %v4678_v19 = vpop.f32.mrf.mxu1  ;;  %v3515_v11 = vadd.f32 %v3514_v46, %v2773_v13 }
 0x5d5   :  { %v4140_v50 = vadd.f32 %v4139_v48, %v3515_v11  ;;  %2856 = vmatmul.f32.gmra.mxu2 %v9312_v30  ;;  %v9331_v48 = vld [vmem:[#allocation204_spill] sm:$0xff]  ;;  %v9334_v30 = vld [vmem:[#allocation215_spill] sm:$0xff] }
 0x5d6   :  { %4206 = vmatmul.f32.gmra.mxu0 %v9311_v44  ;;  %4741 = vmatmul.f32.gmra.mxu1 %v9315_v22 }
 0x5d7   :  { %3621 = vmatmul.f32.gmra.mxu3 %v9317_v14  ;;  %v4671_v25 = vadd.f32 %v4670_v47, %v4140_v50  ;;  %v9328_v47 = vld [vmem:[#allocation199_spill] sm:$0xff] }
 0x5d8   :  { %v2777_v37 = vpop.f32.mrf.mxu2  ;;  %v9329_v6 = vand.u32 4294901760, %v9328_v47 }
 0x5d9   :  { %v2778_v45 = vadd.f32 %v2777_v37, %v9318_v20  ;;  %5015 = vxpose.xlu1.b32.cont [3/16] (narrow) %v4671_v25, 16 }
 0x5da   :  { %v3526_v27 = vpop.f32.mrf.mxu3 }
 0x5db   :  { %v4147_v60 = vpop.f32.mrf.mxu0  ;;  %v4682_v18 = vpop.f32.mrf.mxu1  ;;  %v3521_v38 = vadd.f32 %v3520_v24, %v2778_v45 }
 0x5dd   :  { %v4144_v57 = vadd.f32 %v4143_v8, %v3521_v38  ;;  %2861 = vmatmul.f32.gmra.mxu2 %v9316_v28  ;;  %v9335_v8 = vld [vmem:[#allocation211_spill] sm:$0xff]  ;;  %v9338_v28 = vld [vmem:[#allocation222_spill] sm:$0xff] }
 0x5de   :  { %4210 = vmatmul.f32.gmra.mxu0 %v9315_v22  ;;  %4745 = vmatmul.f32.gmra.mxu1 %v9319_v42 }
 0x5df   :  { %3627 = vmatmul.f32.gmra.mxu3 %v9321_v40  ;;  %v4675_v15 = vadd.f32 %v4674_v16, %v4144_v57  ;;  %v9332_v16 = vld [vmem:[#allocation206_spill] sm:$0xff] }
 0x5e0   :  { %v2782_v52 = vpop.f32.mrf.mxu2  ;;  %v9333_v26 = vand.u32 4294901760, %v9332_v16 }
 0x5e1   :  { %v2783_v7 = vadd.f32 %v2782_v52, %v9322_v61  ;;  %5016 = vxpose.xlu1.b32.cont [4/16] (narrow) %v4675_v15, 16 }
 0x5e2   :  { %v3532_v41 = vpop.f32.mrf.mxu3 }
 0x5e3   :  { %v4151_v59 = vpop.f32.mrf.mxu0  ;;  %v4686_v54 = vpop.f32.mrf.mxu1  ;;  %v3527_v55 = vadd.f32 %v3526_v27, %v2783_v7 }
 0x5e5   :  { %v4148_v39 = vadd.f32 %v4147_v60, %v3527_v55  ;;  %2866 = vmatmul.f32.gmra.mxu2 %v9320_v51  ;;  %v9339_v60 = vld [vmem:[#allocation218_spill] sm:$0xff]  ;;  %v9342_v51 = vld [vmem:[#allocation229_spill] sm:$0xff] }
 0x5e6   :  { %4214 = vmatmul.f32.gmra.mxu0 %v9319_v42  ;;  %4749 = vmatmul.f32.gmra.mxu1 %v9323_v5 }
 0x5e7   :  { %3633 = vmatmul.f32.gmra.mxu3 %v9325_v4  ;;  %v4679_v2 = vadd.f32 %v4678_v19, %v4148_v39  ;;  %v9336_v19 = vld [vmem:[#allocation213_spill] sm:$0xff] }
 0x5e8   :  { %v2787_v49 = vpop.f32.mrf.mxu2  ;;  %v9337_v11 = vand.u32 4294901760, %v9336_v19 }
 0x5e9   :  { %v2788_v29 = vadd.f32 %v2787_v49, %v9326_v12  ;;  %5017 = vxpose.xlu1.b32.cont [5/16] (narrow) %v4679_v2, 16 }
 0x5ea   :  { %v3538_v63 = vpop.f32.mrf.mxu3 }
 0x5eb   :  { %v4155_v34 = vpop.f32.mrf.mxu0  ;;  %v4690_v53 = vpop.f32.mrf.mxu1  ;;  %v3533_v35 = vadd.f32 %v3532_v41, %v2788_v29 }
 0x5ed   :  { %v4152_v10 = vadd.f32 %v4151_v59, %v3533_v35  ;;  %2871 = vmatmul.f32.gmra.mxu2 %v9324_v36  ;;  %v9343_v59 = vld [vmem:[#allocation225_spill] sm:$0xff]  ;;  %v9346_v36 = vld [vmem:[#allocation236_spill] sm:$0xff] }
 0x5ee   :  { %4218 = vmatmul.f32.gmra.mxu0 %v9323_v5  ;;  %4753 = vmatmul.f32.gmra.mxu1 %v9327_v3 }
 0x5ef   :  { %3639 = vmatmul.f32.gmra.mxu3 %v9329_v6  ;;  %v4683_v21 = vadd.f32 %v4682_v18, %v4152_v10  ;;  %v9340_v18 = vld [vmem:[#allocation220_spill] sm:$0xff] }
 0x5f0   :  { %v2792_v33 = vpop.f32.mrf.mxu2  ;;  %v9341_v38 = vand.u32 4294901760, %v9340_v18 }
 0x5f1   :  { %v2793_v0 = vadd.f32 %v2792_v33, %v9330_v17  ;;  %5018 = vxpose.xlu1.b32.cont [6/16] (narrow) %v4683_v21, 16 }
 0x5f2   :  { %v3544_v23 = vpop.f32.mrf.mxu3 }
 0x5f3   :  { %v4159_v62 = vpop.f32.mrf.mxu0  ;;  %v4694_v32 = vpop.f32.mrf.mxu1  ;;  %v3539_v1 = vadd.f32 %v3538_v63, %v2793_v0 }
 0x5f5   :  { %v4156_v46 = vadd.f32 %v4155_v34, %v3539_v1  ;;  %2876 = vmatmul.f32.gmra.mxu2 %v9328_v47  ;;  %v9347_v34 = vld [vmem:[#allocation232_spill] sm:$0xff]  ;;  %v9350_v47 = vld [vmem:[#allocation243_spill] sm:$0xff] }
 0x5f6   :  { %4222 = vmatmul.f32.gmra.mxu0 %v9327_v3  ;;  %4757 = vmatmul.f32.gmra.mxu1 %v9331_v48 }
 0x5f7   :  { %3645 = vmatmul.f32.gmra.mxu3 %v9333_v26  ;;  %v4687_v9 = vadd.f32 %v4686_v54, %v4156_v46  ;;  %v9344_v54 = vld [vmem:[#allocation227_spill] sm:$0xff] }
 0x5f8   :  { %v2797_v44 = vpop.f32.mrf.mxu2  ;;  %v9345_v55 = vand.u32 4294901760, %v9344_v54 }
 0x5f9   :  { %v2798_v43 = vadd.f32 %v2797_v44, %v9334_v30  ;;  %5019 = vxpose.xlu1.b32.cont [7/16] (narrow) %v4687_v9, 16 }
 0x5fa   :  { %v3550_v56 = vpop.f32.mrf.mxu3 }
 0x5fb   :  { %v4163_v58 = vpop.f32.mrf.mxu0  ;;  %v4698_v31 = vpop.f32.mrf.mxu1  ;;  %v3545_v13 = vadd.f32 %v3544_v23, %v2798_v43 }
 0x5fd   :  { %v4160_v24 = vadd.f32 %v4159_v62, %v3545_v13  ;;  %2881 = vmatmul.f32.gmra.mxu2 %v9332_v16  ;;  %v9351_v62 = vld [vmem:[#allocation239_spill] sm:$0xff]  ;;  %v9354_v16 = vld [vmem:[#allocation250_spill] sm:$0xff] }
 0x5fe   :  { %4226 = vmatmul.f32.gmra.mxu0 %v9331_v48  ;;  %4761 = vmatmul.f32.gmra.mxu1 %v9335_v8 }
 0x5ff   :  { %3651 = vmatmul.f32.gmra.mxu3 %v9337_v11  ;;  %v4691_v50 = vadd.f32 %v4690_v53, %v4160_v24  ;;  %v9348_v53 = vld [vmem:[#allocation234_spill] sm:$0xff] }
 0x600   :  { %v2802_v22 = vpop.f32.mrf.mxu2  ;;  %v9349_v35 = vand.u32 4294901760, %v9348_v53 }
 0x601   :  { %v2803_v14 = vadd.f32 %v2802_v22, %v9338_v28  ;;  %5020 = vxpose.xlu1.b32.cont [8/16] (narrow) %v4691_v50, 16 }
 0x602   :  { %v3556_v25 = vpop.f32.mrf.mxu3 }
 0x603   :  { %v4167_v37 = vpop.f32.mrf.mxu0  ;;  %v4702_v20 = vpop.f32.mrf.mxu1  ;;  %v3551_v45 = vadd.f32 %v3550_v56, %v2803_v14 }
 0x605   :  { %v4164_v27 = vadd.f32 %v4163_v58, %v3551_v45  ;;  %2886 = vmatmul.f32.gmra.mxu2 %v9336_v19  ;;  %v9355_v58 = vld [vmem:[#allocation246_spill] sm:$0xff]  ;;  %v9358_v19 = vld [vmem:[#allocation257_spill] sm:$0xff] }
 0x606   :  { %4230 = vmatmul.f32.gmra.mxu0 %v9335_v8  ;;  %4765 = vmatmul.f32.gmra.mxu1 %v9339_v60 }
 0x607   :  { %3657 = vmatmul.f32.gmra.mxu3 %v9341_v38  ;;  %v4695_v57 = vadd.f32 %v4694_v32, %v4164_v27  ;;  %v9352_v32 = vld [vmem:[#allocation241_spill] sm:$0xff] }
 0x608   :  { %v2807_v42 = vpop.f32.mrf.mxu2  ;;  %v9353_v1 = vand.u32 4294901760, %v9352_v32 }
 0x609   :  { %v2808_v40 = vadd.f32 %v2807_v42, %v9342_v51  ;;  %5021 = vxpose.xlu1.b32.cont [9/16] (narrow) %v4695_v57, 16 }
 0x60a   :  { %v3562_v15 = vpop.f32.mrf.mxu3 }
 0x60b   :  { %v4171_v52 = vpop.f32.mrf.mxu0  ;;  %v4706_v61 = vpop.f32.mrf.mxu1  ;;  %v3557_v7 = vadd.f32 %v3556_v25, %v2808_v40 }
 0x60d   :  { %v4168_v41 = vadd.f32 %v4167_v37, %v3557_v7  ;;  %2891 = vmatmul.f32.gmra.mxu2 %v9340_v18  ;;  %v9359_v37 = vld [vmem:[#allocation253_spill] sm:$0xff]  ;;  %v9362_v18 = vld [vmem:[#allocation263_spill] sm:$0xff] }
 0x60e   :  { %4234 = vmatmul.f32.gmra.mxu0 %v9339_v60  ;;  %4769 = vmatmul.f32.gmra.mxu1 %v9343_v59 }
 0x60f   :  { %3663 = vmatmul.f32.gmra.mxu3 %v9345_v55  ;;  %v4699_v39 = vadd.f32 %v4698_v31, %v4168_v41  ;;  %v9356_v31 = vld [vmem:[#allocation248_spill] sm:$0xff] }
 0x610   :  { %v2812_v5 = vpop.f32.mrf.mxu2  ;;  %v9357_v13 = vand.u32 4294901760, %v9356_v31 }
 0x611   :  { %v2813_v4 = vadd.f32 %v2812_v5, %v9346_v36  ;;  %5022 = vxpose.xlu1.b32.cont [10/16] (narrow) %v4699_v39, 16 }
 0x612   :  { %v3568_v2 = vpop.f32.mrf.mxu3 }
 0x613   :  { %v4175_v49 = vpop.f32.mrf.mxu0  ;;  %v4710_v12 = vpop.f32.mrf.mxu1  ;;  %v3563_v29 = vadd.f32 %v3562_v15, %v2813_v4 }
 0x615   :  { %v4172_v63 = vadd.f32 %v4171_v52, %v3563_v29  ;;  %2896 = vmatmul.f32.gmra.mxu2 %v9344_v54  ;;  %v9363_v52 = vld [vmem:[#allocation260_spill] sm:$0xff]  ;;  %v9366_v54 = vld [vmem:[#allocation270_spill] sm:$0xff] }
 0x616   :  { %4238 = vmatmul.f32.gmra.mxu0 %v9343_v59  ;;  %4773 = vmatmul.f32.gmra.mxu1 %v9347_v34 }
 0x617   :  { %3669 = vmatmul.f32.gmra.mxu3 %v9349_v35  ;;  %v4703_v10 = vadd.f32 %v4702_v20, %v4172_v63  ;;  %v9360_v20 = vld [vmem:[#allocation255_spill] sm:$0xff] }
 0x618   :  { %v2817_v3 = vpop.f32.mrf.mxu2  ;;  %v9361_v45 = vand.u32 4294901760, %v9360_v20 }
 0x619   :  { %v2818_v6 = vadd.f32 %v2817_v3, %v9350_v47  ;;  %5023 = vxpose.xlu1.b32.cont [11/16] (narrow) %v4703_v10, 16 }
 0x61a   :  { %v3574_v21 = vpop.f32.mrf.mxu3 }
 0x61b   :  { %v4179_v33 = vpop.f32.mrf.mxu0  ;;  %v4714_v17 = vpop.f32.mrf.mxu1  ;;  %v3569_v0 = vadd.f32 %v3568_v2, %v2818_v6 }
 0x61d   :  { %v4176_v23 = vadd.f32 %v4175_v49, %v3569_v0  ;;  %2901 = vmatmul.f32.gmra.mxu2 %v9348_v53  ;;  %v9367_v49 = vld [vmem:[#allocation266_spill] sm:$0xff]  ;;  %v9370_v53 = vld [vmem:[#allocation277_spill] sm:$0xff] }
 0x61e   :  { %4242 = vmatmul.f32.gmra.mxu0 %v9347_v34  ;;  %4777 = vmatmul.f32.gmra.mxu1 %v9351_v62 }
 0x61f   :  { %3675 = vmatmul.f32.gmra.mxu3 %v9353_v1  ;;  %v4707_v46 = vadd.f32 %v4706_v61, %v4176_v23  ;;  %v9364_v61 = vld [vmem:[#allocation262_spill] sm:$0xff] }
 0x620   :  { %v2822_v48 = vpop.f32.mrf.mxu2  ;;  %v9365_v7 = vand.u32 4294901760, %v9364_v61 }
 0x621   :  { %v2823_v26 = vadd.f32 %v2822_v48, %v9354_v16  ;;  %5024 = vxpose.xlu1.b32.cont [12/16] (narrow) %v4707_v46, 16 }
 0x622   :  { %v3580_v9 = vpop.f32.mrf.mxu3 }
 0x623   :  { %v4183_v44 = vpop.f32.mrf.mxu0  ;;  %v4718_v30 = vpop.f32.mrf.mxu1  ;;  %v3575_v43 = vadd.f32 %v3574_v21, %v2823_v26  ;;  %v9371_v21 = vld [vmem:[#allocation273_spill] sm:$0xff] }
 0x625   :  { %v4180_v56 = vadd.f32 %v4179_v33, %v3575_v43  ;;  %2906 = vmatmul.f32.gmra.mxu2 %v9352_v32  ;;  %v9374_v32 = vld [vmem:[#allocation284_spill] sm:$0xff] }
 0x626   :  { %4246 = vmatmul.f32.gmra.mxu0 %v9351_v62  ;;  %4781 = vmatmul.f32.gmra.mxu1 %v9355_v58 }
 0x627   :  { %3681 = vmatmul.f32.gmra.mxu3 %v9357_v13  ;;  %v4711_v24 = vadd.f32 %v4710_v12, %v4180_v56  ;;  %v9368_v12 = vld [vmem:[#allocation268_spill] sm:$0xff] }
 0x628   :  { %v2827_v8 = vpop.f32.mrf.mxu2  ;;  %v9369_v29 = vand.u32 4294901760, %v9368_v12 }
 0x629   :  { %v2828_v11 = vadd.f32 %v2827_v8, %v9358_v19  ;;  %5025 = vxpose.xlu1.b32.cont [13/16] (narrow) %v4711_v24, 16 }
 0x62a   :  { %v3586_v50 = vpop.f32.mrf.mxu3 }
 0x62b   :  { %v4187_v22 = vpop.f32.mrf.mxu0  ;;  %v4722_v28 = vpop.f32.mrf.mxu1  ;;  %v3581_v14 = vadd.f32 %v3580_v9, %v2828_v11 }
 0x62d   :  { %v4184_v25 = vadd.f32 %v4183_v44, %v3581_v14  ;;  %2911 = vmatmul.f32.gmra.mxu2 %v9356_v31  ;;  %v9375_v44 = vld [vmem:[#allocation280_spill] sm:$0xff]  ;;  %v9378_v31 = vld [vmem:[#allocation291_spill] sm:$0xff] }
 0x62e   :  { %4250 = vmatmul.f32.gmra.mxu0 %v9355_v58  ;;  %4785 = vmatmul.f32.gmra.mxu1 %v9359_v37 }
 0x62f   :  { %3687 = vmatmul.f32.gmra.mxu3 %v9361_v45  ;;  %v4715_v27 = vadd.f32 %v4714_v17, %v4184_v25  ;;  %v9372_v17 = vld [vmem:[#allocation275_spill] sm:$0xff] }
 0x630   :  { %v2832_v60 = vpop.f32.mrf.mxu2  ;;  %v9373_v0 = vand.u32 4294901760, %v9372_v17 }
 0x631   :  { %v2833_v38 = vadd.f32 %v2832_v60, %v9362_v18  ;;  %5026 = vxpose.xlu1.b32.cont [14/16] (narrow) %v4715_v27, 16 }
 0x632   :  { %v3592_v57 = vpop.f32.mrf.mxu3 }
 0x633   :  { %v4191_v42 = vpop.f32.mrf.mxu0  ;;  %v4726_v51 = vpop.f32.mrf.mxu1  ;;  %v3587_v40 = vadd.f32 %v3586_v50, %v2833_v38 }
 0x635   :  { %v4188_v15 = vadd.f32 %v4187_v22, %v3587_v40  ;;  %2916 = vmatmul.f32.gmra.mxu2 %v9360_v20  ;;  %v9379_v22 = vld [vmem:[#allocation287_spill] sm:$0xff]  ;;  %v9382_v20 = vld [vmem:[#allocation297_spill] sm:$0xff] }
 0x636   :  { %4254 = vmatmul.f32.gmra.mxu0 %v9359_v37  ;;  %4789 = vmatmul.f32.gmra.mxu1 %v9363_v52 }
 0x637   :  { %3693 = vmatmul.f32.gmra.mxu3 %v9365_v7  ;;  %v4719_v41 = vadd.f32 %v4718_v30, %v4188_v15  ;;  %v9376_v30 = vld [vmem:[#allocation282_spill] sm:$0xff] }
 0x638   :  { %v2837_v59 = vpop.f32.mrf.mxu2  ;;  %v9377_v43 = vand.u32 4294901760, %v9376_v30 }
 0x639   :  { %v2838_v55 = vadd.f32 %v2837_v59, %v9366_v54  ;;  %5027 = vxpose.xlu1.b32.cont [15/16] (narrow) %v4719_v41, 16 }
 0x63a   :  { %v3598_v39 = vpop.f32.mrf.mxu3 }
 0x63b   :  { %v4195_v5 = vpop.f32.mrf.mxu0  ;;  %v4730_v36 = vpop.f32.mrf.mxu1  ;;  %v3593_v4 = vadd.f32 %v3592_v57, %v2838_v55 }
 0x63d   :  { %v4192_v2 = vadd.f32 %v4191_v42, %v3593_v4  ;;  %2921 = vmatmul.f32.gmra.mxu2 %v9364_v61  ;;  %v9383_v42 = vld [vmem:[#allocation294_spill] sm:$0xff]  ;;  %v9386_v61 = vld [vmem:[#allocation304_spill] sm:$0xff] }
 0x63e   :  { %4258 = vmatmul.f32.gmra.mxu0 %v9363_v52  ;;  %4793 = vmatmul.f32.gmra.mxu1 %v9367_v49 }
 0x63f   :  { %3699 = vmatmul.f32.gmra.mxu3 %v9369_v29  ;;  %v4723_v63 = vadd.f32 %v4722_v28, %v4192_v2  ;;  %v9380_v28 = vld [vmem:[#allocation289_spill] sm:$0xff] }
 0x640   :  { %v2842_v34 = vpop.f32.mrf.mxu2  ;;  %v9381_v14 = vand.u32 4294901760, %v9380_v28 }
 0x641   :  { %v2843_v35 = vadd.f32 %v2842_v34, %v9370_v53  ;;  %5028 = vxpose.xlu1.b32.end [16/16] (narrow) %v4723_v63, 16 }
 0x642   :  { %v3604_v10 = vpop.f32.mrf.mxu3 }
 0x643   :  { %v4199_v3 = vpop.f32.mrf.mxu0  ;;  %v4734_v47 = vpop.f32.mrf.mxu1  ;;  %v3599_v6 = vadd.f32 %v3598_v39, %v2843_v35 }
 0x645   :  { %2926 = vmatmul.f32.gmra.mxu2 %v9368_v12  ;;  %v4196_v33 = vadd.f32 %v4195_v5, %v3599_v6  ;;  %v9387_v5 = vld [vmem:[#allocation300_spill] sm:$0xff]  ;;  %v9390_v12 = vld [vmem:[#allocation310_spill] sm:$0xff] }
 0x646   :  { %4262 = vmatmul.f32.gmra.mxu0 %v9367_v49  ;;  %4797 = vmatmul.f32.gmra.mxu1 %v9371_v21 }
 0x647   :  { %3705 = vmatmul.f32.gmra.mxu3 %v9373_v0  ;;  %v4727_v23 = vadd.f32 %v4726_v51, %v4196_v33  ;;  %v9384_v51 = vld [vmem:[#allocation296_spill] sm:$0xff] }
 0x648   :  { %v2847_v62 = vpop.f32.mrf.mxu2  ;;  %v9385_v40 = vand.u32 4294901760, %v9384_v51 }
 0x649   :  { %v2848_v1 = vadd.f32 %v2847_v62, %v9374_v32  ;;  %5045 = vxpose.xlu2.b32.start [1/16] (narrow) %v4727_v23, 16 }
 0x64a   :  { %v3610_v46 = vpop.f32.mrf.mxu3 }
 0x64b   :  { %v4203_v48 = vpop.f32.mrf.mxu0  ;;  %v4738_v16 = vpop.f32.mrf.mxu1  ;;  %v3605_v26 = vadd.f32 %v3604_v10, %v2848_v1 }
 0x64d   :  { %v4200_v9 = vadd.f32 %v4199_v3, %v3605_v26  ;;  %2931 = vmatmul.f32.gmra.mxu2 %v9372_v17  ;;  %v9391_v3 = vld [vmem:[#allocation307_spill] sm:$0xff]  ;;  %v9394_v17 = vld [vmem:[#allocation317_spill] sm:$0xff] }
 0x64e   :  { %4266 = vmatmul.f32.gmra.mxu0 %v9371_v21  ;;  %4801 = vmatmul.f32.gmra.mxu1 %v9375_v44 }
 0x64f   :  { %3711 = vmatmul.f32.gmra.mxu3 %v9377_v43  ;;  %v4731_v56 = vadd.f32 %v4730_v36, %v4200_v9  ;;  %v9388_v36 = vld [vmem:[#allocation302_spill] sm:$0xff] }
 0x650   :  { %v2852_v58 = vpop.f32.mrf.mxu2  ;;  %v9389_v4 = vand.u32 4294901760, %v9388_v36 }
 0x651   :  { %v2853_v13 = vadd.f32 %v2852_v58, %v9378_v31  ;;  %5046 = vxpose.xlu2.b32.cont [2/16] (narrow) %v4731_v56, 16 }
 0x652   :  { %v3616_v24 = vpop.f32.mrf.mxu3 }
 0x653   :  { %v4207_v8 = vpop.f32.mrf.mxu0  ;;  %v4742_v19 = vpop.f32.mrf.mxu1  ;;  %v3611_v11 = vadd.f32 %v3610_v46, %v2853_v13 }
 0x655   :  { %v4204_v50 = vadd.f32 %v4203_v48, %v3611_v11  ;;  %2936 = vmatmul.f32.gmra.mxu2 %v9376_v30  ;;  %v9395_v48 = vld [vmem:[#allocation313_spill] sm:$0xff]  ;;  %v9398_v30 = vld [vmem:[#allocation324_spill] sm:$0xff] }
 0x656   :  { %4270 = vmatmul.f32.gmra.mxu0 %v9375_v44  ;;  %4805 = vmatmul.f32.gmra.mxu1 %v9379_v22 }
 0x657   :  { %3717 = vmatmul.f32.gmra.mxu3 %v9381_v14  ;;  %v4735_v25 = vadd.f32 %v4734_v47, %v4204_v50  ;;  %v9392_v47 = vld [vmem:[#allocation309_spill] sm:$0xff] }
 0x658   :  { %v2857_v37 = vpop.f32.mrf.mxu2  ;;  %v9393_v6 = vand.u32 4294901760, %v9392_v47 }
 0x659   :  { %v2858_v45 = vadd.f32 %v2857_v37, %v9382_v20  ;;  %5047 = vxpose.xlu2.b32.cont [3/16] (narrow) %v4735_v25, 16 }
 0x65a   :  { %v3622_v27 = vpop.f32.mrf.mxu3 }
 0x65b   :  { %v4211_v60 = vpop.f32.mrf.mxu0  ;;  %v4746_v18 = vpop.f32.mrf.mxu1  ;;  %v3617_v38 = vadd.f32 %v3616_v24, %v2858_v45 }
 0x65d   :  { %v4208_v57 = vadd.f32 %v4207_v8, %v3617_v38  ;;  %2941 = vmatmul.f32.gmra.mxu2 %v9380_v28  ;;  %v9399_v8 = vld [vmem:[#allocation320_spill] sm:$0xff]  ;;  %v9402_v28 = vld [vmem:[#allocation330_spill] sm:$0xff] }
 0x65e   :  { %4274 = vmatmul.f32.gmra.mxu0 %v9379_v22  ;;  %4809 = vmatmul.f32.gmra.mxu1 %v9383_v42 }
 0x65f   :  { %3723 = vmatmul.f32.gmra.mxu3 %v9385_v40  ;;  %v4739_v15 = vadd.f32 %v4738_v16, %v4208_v57  ;;  %v9396_v16 = vld [vmem:[#allocation315_spill] sm:$0xff] }
 0x660   :  { %v2862_v52 = vpop.f32.mrf.mxu2  ;;  %v9397_v26 = vand.u32 4294901760, %v9396_v16 }
 0x661   :  { %v2863_v7 = vadd.f32 %v2862_v52, %v9386_v61  ;;  %5048 = vxpose.xlu2.b32.cont [4/16] (narrow) %v4739_v15, 16 }
 0x662   :  { %v3628_v41 = vpop.f32.mrf.mxu3 }
 0x663   :  { %v4215_v59 = vpop.f32.mrf.mxu0  ;;  %v4750_v54 = vpop.f32.mrf.mxu1  ;;  %v3623_v55 = vadd.f32 %v3622_v27, %v2863_v7 }
 0x665   :  { %v4212_v39 = vadd.f32 %v4211_v60, %v3623_v55  ;;  %2946 = vmatmul.f32.gmra.mxu2 %v9384_v51  ;;  %v9403_v60 = vld [vmem:[#allocation327_spill] sm:$0xff]  ;;  %v9406_v51 = vld [vmem:[#allocation337_spill] sm:$0xff] }
 0x666   :  { %4278 = vmatmul.f32.gmra.mxu0 %v9383_v42  ;;  %4813 = vmatmul.f32.gmra.mxu1 %v9387_v5 }
 0x667   :  { %3729 = vmatmul.f32.gmra.mxu3 %v9389_v4  ;;  %v4743_v2 = vadd.f32 %v4742_v19, %v4212_v39  ;;  %v9400_v19 = vld [vmem:[#allocation322_spill] sm:$0xff] }
 0x668   :  { %v2867_v49 = vpop.f32.mrf.mxu2  ;;  %v9401_v11 = vand.u32 4294901760, %v9400_v19 }
 0x669   :  { %v2868_v29 = vadd.f32 %v2867_v49, %v9390_v12  ;;  %5049 = vxpose.xlu2.b32.cont [5/16] (narrow) %v4743_v2, 16 }
 0x66a   :  { %v3634_v63 = vpop.f32.mrf.mxu3 }
 0x66b   :  { %v4219_v34 = vpop.f32.mrf.mxu0  ;;  %v4754_v53 = vpop.f32.mrf.mxu1  ;;  %v3629_v35 = vadd.f32 %v3628_v41, %v2868_v29 }
 0x66d   :  { %v4216_v10 = vadd.f32 %v4215_v59, %v3629_v35  ;;  %2951 = vmatmul.f32.gmra.mxu2 %v9388_v36  ;;  %v9407_v59 = vld [vmem:[#allocation333_spill] sm:$0xff]  ;;  %v9410_v36 = vld [vmem:[#allocation343_spill] sm:$0xff] }
 0x66e   :  { %4282 = vmatmul.f32.gmra.mxu0 %v9387_v5  ;;  %4817 = vmatmul.f32.gmra.mxu1 %v9391_v3 }
 0x66f   :  { %3735 = vmatmul.f32.gmra.mxu3 %v9393_v6  ;;  %v4747_v21 = vadd.f32 %v4746_v18, %v4216_v10  ;;  %v9404_v18 = vld [vmem:[#allocation329_spill] sm:$0xff] }
 0x670   :  { %v2872_v33 = vpop.f32.mrf.mxu2  ;;  %v9405_v38 = vand.u32 4294901760, %v9404_v18 }
 0x671   :  { %v2873_v0 = vadd.f32 %v2872_v33, %v9394_v17  ;;  %5050 = vxpose.xlu2.b32.cont [6/16] (narrow) %v4747_v21, 16 }
 0x672   :  { %v3640_v23 = vpop.f32.mrf.mxu3 }
 0x673   :  { %v4223_v62 = vpop.f32.mrf.mxu0  ;;  %v4758_v32 = vpop.f32.mrf.mxu1  ;;  %v3635_v1 = vadd.f32 %v3634_v63, %v2873_v0 }
 0x675   :  { %v4220_v46 = vadd.f32 %v4219_v34, %v3635_v1  ;;  %2956 = vmatmul.f32.gmra.mxu2 %v9392_v47  ;;  %v9411_v34 = vld [vmem:[#allocation340_spill] sm:$0xff]  ;;  %v9414_v47 = vld [vmem:[#allocation349_spill] sm:$0xff] }
 0x676   :  { %4286 = vmatmul.f32.gmra.mxu0 %v9391_v3  ;;  %4821 = vmatmul.f32.gmra.mxu1 %v9395_v48 }
 0x677   :  { %3741 = vmatmul.f32.gmra.mxu3 %v9397_v26  ;;  %v4751_v9 = vadd.f32 %v4750_v54, %v4220_v46  ;;  %v9408_v54 = vld [vmem:[#allocation335_spill] sm:$0xff] }
 0x678   :  { %v2877_v44 = vpop.f32.mrf.mxu2  ;;  %v9409_v55 = vand.u32 4294901760, %v9408_v54 }
 0x679   :  { %v2878_v43 = vadd.f32 %v2877_v44, %v9398_v30  ;;  %5051 = vxpose.xlu2.b32.cont [7/16] (narrow) %v4751_v9, 16 }
 0x67a   :  { %v3646_v56 = vpop.f32.mrf.mxu3 }
 0x67b   :  { %v4227_v58 = vpop.f32.mrf.mxu0  ;;  %v4762_v31 = vpop.f32.mrf.mxu1  ;;  %v3641_v13 = vadd.f32 %v3640_v23, %v2878_v43 }
 0x67d   :  { %v4224_v24 = vadd.f32 %v4223_v62, %v3641_v13  ;;  %2961 = vmatmul.f32.gmra.mxu2 %v9396_v16  ;;  %v9415_v62 = vld [vmem:[#allocation346_spill] sm:$0xff] }
 0x67e   :  { %4290 = vmatmul.f32.gmra.mxu0 %v9395_v48  ;;  %4825 = vmatmul.f32.gmra.mxu1 %v9399_v8  ;;  %v9418_v16 = vld [vmem:[#allocation354_spill] sm:$0xff] }
 0x67f   :  { %3747 = vmatmul.f32.gmra.mxu3 %v9401_v11  ;;  %v4755_v50 = vadd.f32 %v4754_v53, %v4224_v24  ;;  %v9412_v53 = vld [vmem:[#allocation342_spill] sm:$0xff] }
 0x680   :  { %v2882_v22 = vpop.f32.mrf.mxu2  ;;  %v9413_v35 = vand.u32 4294901760, %v9412_v53 }
 0x681   :  { %v2883_v14 = vadd.f32 %v2882_v22, %v9402_v28  ;;  %5052 = vxpose.xlu2.b32.cont [8/16] (narrow) %v4755_v50, 16 }
 0x682   :  { %v3652_v25 = vpop.f32.mrf.mxu3 }
 0x683   :  { %v4231_v37 = vpop.f32.mrf.mxu0  ;;  %v4766_v20 = vpop.f32.mrf.mxu1  ;;  %v3647_v45 = vadd.f32 %v3646_v56, %v2883_v14 }
 0x685   :  { %v4228_v27 = vadd.f32 %v4227_v58, %v3647_v45  ;;  %2966 = vmatmul.f32.gmra.mxu2 %v9400_v19  ;;  %v9419_v58 = vld [vmem:[#allocation352_spill] sm:$0xff]  ;;  %v9422_v19 = vld [vmem:[#allocation358_spill] sm:$0xff] }
 0x686   :  { %4294 = vmatmul.f32.gmra.mxu0 %v9399_v8  ;;  %4829 = vmatmul.f32.gmra.mxu1 %v9403_v60 }
 0x687   :  { %3753 = vmatmul.f32.gmra.mxu3 %v9405_v38  ;;  %v4759_v57 = vadd.f32 %v4758_v32, %v4228_v27  ;;  %v9416_v32 = vld [vmem:[#allocation348_spill] sm:$0xff] }
 0x688   :  { %v2887_v42 = vpop.f32.mrf.mxu2  ;;  %v9417_v1 = vand.u32 4294901760, %v9416_v32 }
 0x689   :  { %v2888_v40 = vadd.f32 %v2887_v42, %v9406_v51  ;;  %5053 = vxpose.xlu2.b32.cont [9/16] (narrow) %v4759_v57, 16 }
 0x68a   :  { %v3658_v15 = vpop.f32.mrf.mxu3 }
 0x68b   :  { %v4235_v52 = vpop.f32.mrf.mxu0  ;;  %v4770_v61 = vpop.f32.mrf.mxu1  ;;  %v3653_v7 = vadd.f32 %v3652_v25, %v2888_v40 }
 0x68d   :  { %v4232_v41 = vadd.f32 %v4231_v37, %v3653_v7  ;;  %2971 = vmatmul.f32.gmra.mxu2 %v9404_v18  ;;  %v9423_v37 = vld [vmem:[#allocation356_spill] sm:$0xff]  ;;  %v9426_v18 = vld [vmem:[#allocation359_spill] sm:$0xff] }
 0x68e   :  { %4298 = vmatmul.f32.gmra.mxu0 %v9403_v60  ;;  %4833 = vmatmul.f32.gmra.mxu1 %v9407_v59  ;;  %v9427_v7 = vld [vmem:[#allocation360_spill] sm:$0xff] }
 0x68f   :  { %3759 = vmatmul.f32.gmra.mxu3 %v9409_v55  ;;  %v4763_v39 = vadd.f32 %v4762_v31, %v4232_v41  ;;  %v9420_v31 = vld [vmem:[#allocation353_spill] sm:$0xff] }
 0x690   :  { %v2892_v5 = vpop.f32.mrf.mxu2  ;;  %v9421_v13 = vand.u32 4294901760, %v9420_v31 }
 0x691   :  { %v2893_v4 = vadd.f32 %v2892_v5, %v9410_v36  ;;  %5054 = vxpose.xlu2.b32.cont [10/16] (narrow) %v4763_v39, 16 }
 0x692   :  { %v3664_v2 = vpop.f32.mrf.mxu3 }
 0x693   :  { %v4239_v49 = vpop.f32.mrf.mxu0  ;;  %v4774_v12 = vpop.f32.mrf.mxu1  ;;  %v3659_v29 = vadd.f32 %v3658_v15, %v2893_v4 }
 0x695   :  { %v4236_v63 = vadd.f32 %v4235_v52, %v3659_v29  ;;  %2976 = vmatmul.f32.gmra.mxu2 %v9408_v54 }
 0x696   :  { %4302 = vmatmul.f32.gmra.mxu0 %v9407_v59  ;;  %4837 = vmatmul.f32.gmra.mxu1 %v9411_v34 }
 0x697   :  { %3765 = vmatmul.f32.gmra.mxu3 %v9413_v35  ;;  %v4767_v10 = vadd.f32 %v4766_v20, %v4236_v63  ;;  %v9424_v20 = vld [vmem:[#allocation357_spill] sm:$0xff] }
 0x698   :  { %v2897_v3 = vpop.f32.mrf.mxu2  ;;  %v9425_v45 = vand.u32 4294901760, %v9424_v20 }
 0x699   :  { %v2898_v6 = vadd.f32 %v2897_v3, %v9414_v47  ;;  %5055 = vxpose.xlu2.b32.cont [11/16] (narrow) %v4767_v10, 16  ;;  %v9429_v3 = vld [vmem:[#allocation362_spill] sm:$0xff] }
 0x69a   :  { %v3670_v21 = vpop.f32.mrf.mxu3 }
 0x69b   :  { %v4243_v33 = vpop.f32.mrf.mxu0  ;;  %v4778_v17 = vpop.f32.mrf.mxu1  ;;  %v3665_v0 = vadd.f32 %v3664_v2, %v2898_v6  ;;  %v9428_v2 = vld [vmem:[#allocation361_spill] sm:$0xff] }
 0x69d   :  { %v4240_v23 = vadd.f32 %v4239_v49, %v3665_v0  ;;  %2981 = vmatmul.f32.gmra.mxu2 %v9412_v53 }
 0x69e   :  { %4306 = vmatmul.f32.gmra.mxu0 %v9411_v34  ;;  %4841 = vmatmul.f32.gmra.mxu1 %v9415_v62 }
 0x69f   :  { %3771 = vmatmul.f32.gmra.mxu3 %v9417_v1  ;;  %v4771_v46 = vadd.f32 %v4770_v61, %v4240_v23 }
 0x6a0   :  { %v2902_v48 = vpop.f32.mrf.mxu2 }
 0x6a1   :  { %v2903_v26 = vadd.f32 %v2902_v48, %v9418_v16  ;;  %5056 = vxpose.xlu2.b32.cont [12/16] (narrow) %v4771_v46, 16 }
 0x6a2   :  { %v3676_v9 = vpop.f32.mrf.mxu3 }
 0x6a3   :  { %v4247_v44 = vpop.f32.mrf.mxu0  ;;  %v4782_v30 = vpop.f32.mrf.mxu1  ;;  %v3671_v43 = vadd.f32 %v3670_v21, %v2903_v26 }
 0x6a5   :  { %v4244_v56 = vadd.f32 %v4243_v33, %v3671_v43  ;;  %2986 = vmatmul.f32.gmra.mxu2 %v9416_v32  ;;  %v9430_v32 = vld [vmem:[#allocation363_spill] sm:$0xff]  ;;  %v9431_v43 = vld [vmem:[#allocation364_spill] sm:$0xff] }
 0x6a6   :  { %4310 = vmatmul.f32.gmra.mxu0 %v9415_v62  ;;  %4845 = vmatmul.f32.gmra.mxu1 %v9419_v58 }
 0x6a7   :  { %3777 = vmatmul.f32.gmra.mxu3 %v9421_v13  ;;  %v4775_v24 = vadd.f32 %v4774_v12, %v4244_v56 }
 0x6a8   :  { %v2907_v8 = vpop.f32.mrf.mxu2 }
 0x6a9   :  { %v2908_v11 = vadd.f32 %v2907_v8, %v9422_v19  ;;  %5057 = vxpose.xlu2.b32.cont [13/16] (narrow) %v4775_v24, 16 }
 0x6aa   :  { %v3682_v50 = vpop.f32.mrf.mxu3 }
 0x6ab   :  { %v4251_v22 = vpop.f32.mrf.mxu0  ;;  %v4786_v28 = vpop.f32.mrf.mxu1  ;;  %v3677_v14 = vadd.f32 %v3676_v9, %v2908_v11 }
 0x6ad   :  { %v4248_v25 = vadd.f32 %v4247_v44, %v3677_v14  ;;  %2991 = vmatmul.f32.gmra.mxu2 %v9420_v31 }
 0x6ae   :  { %4314 = vmatmul.f32.gmra.mxu0 %v9419_v58  ;;  %4849 = vmatmul.f32.gmra.mxu1 %v9423_v37 }
 0x6af   :  { %3783 = vmatmul.f32.gmra.mxu3 %v9425_v45  ;;  %v4779_v27 = vadd.f32 %v4778_v17, %v4248_v25 }
 0x6b0   :  { %v2912_v60 = vpop.f32.mrf.mxu2 }
 0x6b1   :  { %v2913_v38 = vadd.f32 %v2912_v60, %v9426_v18  ;;  %5058 = vxpose.xlu2.b32.cont [14/16] (narrow) %v4779_v27, 16  ;;  %v9433_v60 = vld [vmem:[#allocation366_spill] sm:$0xff] }
 0x6b2   :  { %v3688_v57 = vpop.f32.mrf.mxu3 }
 0x6b3   :  { %v4255_v42 = vpop.f32.mrf.mxu0  ;;  %v4790_v51 = vpop.f32.mrf.mxu1  ;;  %v3683_v40 = vadd.f32 %v3682_v50, %v2913_v38  ;;  %v9432_v50 = vld [vmem:[#allocation365_spill] sm:$0xff] }
 0x6b5   :  { %v4252_v15 = vadd.f32 %v4251_v22, %v3683_v40  ;;  %2996 = vmatmul.f32.gmra.mxu2 %v9424_v20 }
 0x6b6   :  { %4318 = vmatmul.f32.gmra.mxu0 %v9423_v37 }
 0x6b7   :  { %v4783_v52 = vadd.f32 %v4782_v30, %v4252_v15 }
 0x6b8   :  { %v2917_v61 = vpop.f32.mrf.mxu2 }
 0x6b9   :  { %v2918_v41 = vadd.f32 %v2917_v61, %v9427_v7  ;;  %5059 = vxpose.xlu2.b32.cont [15/16] (narrow) %v4783_v52, 16  ;;  %v9434_v61 = vld [vmem:[#allocation367_spill] sm:$0xff] }
 0x6ba   :  { %v3694_v59 = vpop.f32.mrf.mxu3 }
 0x6bb   :  { %v4259_v54 = vpop.f32.mrf.mxu0  ;;  %v4794_v55 = vpop.f32.mrf.mxu1  ;;  %v3689_v39 = vadd.f32 %v3688_v57, %v2918_v41 }
 0x6bd   :  { %v4256_v5 = vadd.f32 %v4255_v42, %v3689_v39 }
 0x6bf   :  { %v4787_v36 = vadd.f32 %v4786_v28, %v4256_v5 }
 0x6c0   :  { %v2922_v4 = vpop.f32.mrf.mxu2 }
 0x6c1   :  { %v2923_v49 = vadd.f32 %v2922_v4, %v9428_v2  ;;  %5060 = vxpose.xlu2.b32.end [16/16] (narrow) %v4787_v36, 16  ;;  %v9435_v4 = vld [vmem:[#allocation368_spill] sm:$0xff] }
 0x6c2   :  { %v3700_v12 = vpop.f32.mrf.mxu3 }
 0x6c3   :  { %v4263_v29 = vpop.f32.mrf.mxu0  ;;  %v4798_v63 = vpop.f32.mrf.mxu1  ;;  %v3695_v34 = vadd.f32 %v3694_v59, %v2923_v49 }
 0x6c5   :  { %v4260_v53 = vadd.f32 %v4259_v54, %v3695_v34 }
 0x6c7   :  { %v4791_v35 = vadd.f32 %v4790_v51, %v4260_v53 }
 0x6c8   :  { %v2927_v10 = vpop.f32.mrf.mxu2 }
 0x6c9   :  { %v2928_v47 = vadd.f32 %v2927_v10, %v9429_v3  ;;  %5077 = vxpose.xlu0.b32.start [1/16] (narrow) %v4791_v35, 16  ;;  %v9436_v35 = vld [vmem:[#allocation369_spill] sm:$0xff] }
 0x6ca   :  { %v3706_v6 = vpop.f32.mrf.mxu3 }
 0x6cb   :  { %v4267_v21 = vpop.f32.mrf.mxu0  ;;  %v4802_v33 = vpop.f32.mrf.mxu1  ;;  %v3701_v17 = vadd.f32 %v3700_v12, %v2928_v47 }
 0x6cd   :  { %v4264_v0 = vadd.f32 %v4263_v29, %v3701_v17 }
 0x6cf   :  { %v4795_v23 = vadd.f32 %v4794_v55, %v4264_v0 }
 0x6d0   :  { %v2932_v62 = vpop.f32.mrf.mxu2 }
 0x6d1   :  { %v2933_v1 = vadd.f32 %v2932_v62, %v9430_v32  ;;  %5078 = vxpose.xlu0.b32.cont [2/16] (narrow) %v4795_v23, 16  ;;  %v9437_v23 = vld [vmem:[#allocation370_spill] sm:$0xff] }
 0x6d2   :  { %v3712_v46 = vpop.f32.mrf.mxu3 }
 0x6d3   :  { %v4271_v48 = vpop.f32.mrf.mxu0  ;;  %v4806_v16 = vpop.f32.mrf.mxu1  ;;  %v3707_v26 = vadd.f32 %v3706_v6, %v2933_v1 }
 0x6d5   :  { %v4268_v9 = vadd.f32 %v4267_v21, %v3707_v26 }
 0x6d7   :  { %v4799_v44 = vadd.f32 %v4798_v63, %v4268_v9 }
 0x6d8   :  { %v2937_v30 = vpop.f32.mrf.mxu2 }
 0x6d9   :  { %v2938_v56 = vadd.f32 %v2937_v30, %v9431_v43  ;;  %5079 = vxpose.xlu0.b32.cont [3/16] (narrow) %v4799_v44, 16  ;;  %v9438_v44 = vld [vmem:[#allocation371_spill] sm:$0xff] }
 0x6da   :  { %v3718_v58 = vpop.f32.mrf.mxu3 }
 0x6db   :  { %v4275_v31 = vpop.f32.mrf.mxu0  ;;  %v4810_v13 = vpop.f32.mrf.mxu1  ;;  %v3713_v24 = vadd.f32 %v3712_v46, %v2938_v56 }
 0x6dd   :  { %v4272_v8 = vadd.f32 %v4271_v48, %v3713_v24 }
 0x6df   :  { %v4803_v19 = vadd.f32 %v4802_v33, %v4272_v8 }
 0x6e0   :  { %v2942_v11 = vpop.f32.mrf.mxu2 }
 0x6e1   :  { %v2943_v22 = vadd.f32 %v2942_v11, %v9432_v50  ;;  %5080 = vxpose.xlu0.b32.cont [4/16] (narrow) %v4803_v19, 16  ;;  %v9439_v19 = vld [vmem:[#allocation372_spill] sm:$0xff] }
 0x6e2   :  { %v3724_v28 = vpop.f32.mrf.mxu3 }
 0x6e3   :  { %v4279_v14 = vpop.f32.mrf.mxu0  ;;  %v3719_v25 = vadd.f32 %v3718_v58, %v2943_v22  ;;  %v4814_v37 = vpop.f32.mrf.mxu1 }
 0x6e5   :  { %v4276_v20 = vadd.f32 %v4275_v31, %v3719_v25 }
 0x6e7   :  { %v4807_v45 = vadd.f32 %v4806_v16, %v4276_v20 }
 0x6e8   :  { %v2947_v27 = vpop.f32.mrf.mxu2 }
 0x6e9   :  { %v2948_v18 = vadd.f32 %v2947_v27, %v9433_v60  ;;  %5081 = vxpose.xlu0.b32.cont [5/16] (narrow) %v4807_v45, 16  ;;  %v9440_v45 = vld [vmem:[#allocation374_spill] sm:$0xff]  ;;  %v4901_v60 = vpop.trf.xlu0 }
 0x6ea   :  { %v3730_v38 = vpop.f32.mrf.mxu3  ;;  %5111 = vst [vmem:[#allocation7 + $0x10] sm:$0xff] %v4901_v60 }
 0x6eb   :  { %v4283_v57 = vpop.f32.mrf.mxu0  ;;  %v3725_v42 = vadd.f32 %v3724_v28, %v2948_v18  ;;  %v4818_v40 = vpop.f32.mrf.mxu1 }
 0x6ed   :  { %v4280_v51 = vadd.f32 %v4279_v14, %v3725_v42 }
 0x6ef   :  { %v4811_v15 = vadd.f32 %v4810_v13, %v4280_v51 }
 0x6f0   :  { %v2952_v52 = vpop.f32.mrf.mxu2 }
 0x6f1   :  { %v2953_v7 = vadd.f32 %v2952_v52, %v9434_v61  ;;  %5082 = vxpose.xlu0.b32.cont [6/16] (narrow) %v4811_v15, 16  ;;  %v9441_v61 = vld [vmem:[#allocation376_spill] sm:$0xff] }
 0x6f2   :  { %v3736_v41 = vpop.f32.mrf.mxu3 }
 0x6f3   :  { %v4287_v59 = vpop.f32.mrf.mxu0  ;;  %v3731_v54 = vadd.f32 %v3730_v38, %v2953_v7  ;;  %v4822_v5 = vpop.f32.mrf.mxu1 }
 0x6f4   :  { %v4869_v38 = vpop.trf.xlu2 }
 0x6f5   :  { %v4284_v55 = vadd.f32 %v4283_v57, %v3731_v54  ;;  %v4933_v57 = vpop.trf.xlu1  ;;  %5109 = vst [vmem:[#allocation7] sm:$0xff] %v4869_v38 }
 0x6f6   :  { %5113 = vst [vmem:[#allocation7 + $0x20] sm:$0xff] %v4933_v57 }
 0x6f7   :  { %v4815_v39 = vadd.f32 %v4814_v37, %v4284_v55 }
 0x6f8   :  { %v2957_v36 = vpop.f32.mrf.mxu2 }
 0x6f9   :  { %v2958_v2 = vadd.f32 %v2957_v36, %v9435_v4  ;;  %5083 = vxpose.xlu0.b32.cont [7/16] (narrow) %v4815_v39, 16 }
 0x6fa   :  { %v3742_v49 = vpop.f32.mrf.mxu3 }
 0x6fb   :  { %v4291_v12 = vpop.f32.mrf.mxu0  ;;  %v3737_v29 = vadd.f32 %v3736_v41, %v2958_v2  ;;  %v4826_v6 = vpop.f32.mrf.mxu1 }
 0x6fc   :  { %v4870_v55 = vpop.trf.xlu2 }
 0x6fd   :  { %v4288_v63 = vadd.f32 %v4287_v59, %v3737_v29  ;;  %v4902_v59 = vpop.trf.xlu0  ;;  %v4934_v39 = vpop.trf.xlu1  ;;  %5110 = vst [vmem:[#allocation7 + $0x8] sm:$0xff] %v4870_v55 }
 0x6fe   :  { %5112 = vst [vmem:[#allocation7 + $0x18] sm:$0xff] %v4902_v59 }
 0x6ff   :  { %v4819_v34 = vadd.f32 %v4818_v40, %v4288_v63  ;;  %5114 = vst [vmem:[#allocation7 + $0x28] sm:$0xff] %v4934_v39 }
 0x700   :  { %v2962_v53 = vpop.f32.mrf.mxu2 }
 0x701   :  { %v2963_v10 = vadd.f32 %v2962_v53, %v9436_v35  ;;  %5084 = vxpose.xlu0.b32.cont [8/16] (narrow) %v4819_v34, 16 }
 0x702   :  { %v3748_v3 = vpop.f32.mrf.mxu3 }
 0x703   :  { %v4295_v47 = vpop.f32.mrf.mxu0  ;;  %v3743_v21 = vadd.f32 %v3742_v49, %v2963_v10  ;;  %v4830_v48 = vpop.f32.mrf.mxu1  ;;  %v9442_v49 = vld [vmem:[#allocation379_spill] sm:$0xff] }
 0x704   :  { %v4965_v53 = vpop.trf.xlu2 }
 0x705   :  { %v4292_v33 = vadd.f32 %v4291_v12, %v3743_v21  ;;  %v4997_v63 = vpop.trf.xlu0  ;;  %v5029_v35 = vpop.trf.xlu1  ;;  %5115 = vst [vmem:[#allocation7 + $0x30] sm:$0xff] %v4965_v53  ;;  %v9443_v21 = vld [vmem:[#allocation381_spill] sm:$0xff] }
 0x706   :  { %5117 = vst [vmem:[#allocation7 + $0x40] sm:$0xff] %v4997_v63 }
 0x707   :  { %v4823_v17 = vadd.f32 %v4822_v5, %v4292_v33  ;;  %5119 = vst [vmem:[#allocation7 + $0x50] sm:$0xff] %v5029_v35 }
 0x708   :  { %v2967_v0 = vpop.f32.mrf.mxu2 }
 0x709   :  { %v2968_v62 = vadd.f32 %v2967_v0, %v9437_v23  ;;  %5085 = vxpose.xlu0.b32.cont [9/16] (narrow) %v4823_v17, 16 }
 0x70a   :  { %v3754_v32 = vpop.f32.mrf.mxu3 }
 0x70b   :  { %v4299_v1 = vpop.f32.mrf.mxu0  ;;  %v3749_v46 = vadd.f32 %v3748_v3, %v2968_v62  ;;  %v4834_v13 = vpop.f32.mrf.mxu1 }
 0x70c   :  { %v4966_v62 = vpop.trf.xlu2 }
 0x70d   :  { %v4296_v16 = vadd.f32 %v4295_v47, %v3749_v46  ;;  %v4998_v0 = vpop.trf.xlu0  ;;  %5116 = vst [vmem:[#allocation7 + $0x38] sm:$0xff] %v4966_v62 }
 0x70e   :  { %5118 = vst [vmem:[#allocation7 + $0x48] sm:$0xff] %v4998_v0 }
 0x70f   :  { %v4827_v26 = vadd.f32 %v4826_v6, %v4296_v16 }
 0x710   :  { %v2972_v9 = vpop.f32.mrf.mxu2 }
 0x711   :  { %v2973_v30 = vadd.f32 %v2972_v9, %v9438_v44  ;;  %5086 = vxpose.xlu0.b32.cont [10/16] (narrow) %v4827_v26, 16  ;;  %v5030_v26 = vpop.trf.xlu1 }
 0x712   :  { %v3760_v43 = vpop.f32.mrf.mxu3  ;;  %5120 = vst [vmem:[#allocation7 + $0x58] sm:$0xff] %v5030_v26 }
 0x713   :  { %v3755_v56 = vadd.f32 %v3754_v32, %v2973_v30  ;;  %v4303_v58 = vpop.f32.mrf.mxu0  ;;  %v4838_v37 = vpop.f32.mrf.mxu1 }
 0x714   :  { %v5061_v16 = vpop.trf.xlu2 }
 0x715   :  { %v4300_v31 = vadd.f32 %v4299_v1, %v3755_v56  ;;  %5121 = vst [vmem:[#allocation7 + $0x60] sm:$0xff] %v5061_v16 }
 0x717   :  { %v4831_v24 = vadd.f32 %v4830_v48, %v4300_v31 }
 0x718   :  { %v2977_v8 = vpop.f32.mrf.mxu2 }
 0x719   :  { %v2978_v11 = vadd.f32 %v2977_v8, %v9439_v19  ;;  %5087 = vxpose.xlu0.b32.cont [11/16] (narrow) %v4831_v24, 16 }
 0x71a   :  { %v3766_v22 = vpop.f32.mrf.mxu3 }
 0x71b   :  { %v3761_v50 = vadd.f32 %v3760_v43, %v2978_v11  ;;  %v4307_v14 = vpop.f32.mrf.mxu0  ;;  %v4842_v41 = vpop.f32.mrf.mxu1 }
 0x71c   :  { %v5062_v9 = vpop.trf.xlu2 }
 0x71d   :  { %v4304_v28 = vadd.f32 %v4303_v58, %v3761_v50  ;;  %5122 = vst [vmem:[#allocation7 + $0x68] sm:$0xff] %v5062_v9 }
 0x71f   :  { %v4835_v25 = vadd.f32 %v4834_v13, %v4304_v28 }
 0x720   :  { %v2982_v20 = vpop.f32.mrf.mxu2 }
 0x721   :  { %v2983_v27 = vadd.f32 %v2982_v20, %v9440_v45  ;;  %5088 = vxpose.xlu0.b32.cont [12/16] (narrow) %v4835_v25, 16 }
 0x722   :  { %v3772_v51 = vpop.f32.mrf.mxu3 }
 0x723   :  { %v3767_v18 = vadd.f32 %v3766_v22, %v2983_v27  ;;  %v4311_v15 = vpop.f32.mrf.mxu0  ;;  %v4846_v10 = vpop.f32.mrf.mxu1 }
 0x725   :  { %v4308_v42 = vadd.f32 %v4307_v14, %v3767_v18 }
 0x727   :  { %v4839_v40 = vadd.f32 %v4838_v37, %v4308_v42 }
 0x728   :  { %v2987_v52 = vpop.f32.mrf.mxu2 }
 0x729   :  { %v2988_v7 = vadd.f32 %v2987_v52, %v9441_v61  ;;  %5089 = vxpose.xlu0.b32.cont [13/16] (narrow) %v4839_v40, 16 }
 0x72a   :  { %v3778_v4 = vpop.f32.mrf.mxu3 }
 0x72b   :  { %v3773_v54 = vadd.f32 %v3772_v51, %v2988_v7  ;;  %v4315_v29 = vpop.f32.mrf.mxu0  ;;  %v4850_v46 = vpop.f32.mrf.mxu1 }
 0x72d   :  { %v4312_v5 = vadd.f32 %v4311_v15, %v3773_v54 }
 0x72f   :  { %v4843_v36 = vadd.f32 %v4842_v41, %v4312_v5 }
 0x730   :  { %v2992_v2 = vpop.f32.mrf.mxu2 }
 0x731   :  { %v2993_v12 = vadd.f32 %v2992_v2, %v9442_v49  ;;  %5090 = vxpose.xlu0.b32.cont [14/16] (narrow) %v4843_v36, 16 }
 0x732   :  { %v3784_v17 = vpop.f32.mrf.mxu3 }
 0x733   :  { %v3779_v34 = vadd.f32 %v3778_v4, %v2993_v12  ;;  %v4319_v32 = vpop.f32.mrf.mxu0 }
 0x735   :  { %v4316_v3 = vadd.f32 %v4315_v29, %v3779_v34 }
 0x737   :  { %v4847_v47 = vadd.f32 %v4846_v10, %v4316_v3 }
 0x738   :  { %v2997_v6 = vpop.f32.mrf.mxu2 }
 0x739   :  { %v2998_v33 = vadd.f32 %v2997_v6, %v9443_v21  ;;  %5091 = vxpose.xlu0.b32.cont [15/16] (narrow) %v4847_v47, 16 }
 0x73b   :  { %v3785_v23 = vadd.f32 %v3784_v17, %v2998_v33 }
 0x73d   :  { %v4320_v1 = vadd.f32 %v4319_v32, %v3785_v23 }
 0x73f   :  { %v4851_v48 = vadd.f32 %v4850_v46, %v4320_v1 }
 0x741   :  { %5092 = vxpose.xlu0.b32.end [16/16] (narrow) %v4851_v48, 16 }
 0x76d   :  { %v5093_v44 = vpop.trf.xlu0 }
 0x76e   :  { %5123 = vst [vmem:[#allocation7 + $0x70] sm:$0xff] %v5093_v44 }
 0x775   :  { %v5094_v30 = vpop.trf.xlu0 }
 0x776   :  { %5124 = vst [vmem:[#allocation7 + $0x78] sm:$0xff] %v5094_v30 }
 0x777   :  { %5137 = dma.vmem_to_hbm [thread:$0]  %s5130_s1, 2048, %s5132_s23, [#allocation4], %s5234_s17, %s5234_s17, %s5235_s18  }
 0x778   :  { %5231 = dma.done.wait [#allocation4], 2048  }
 0x779   :  { %5232 = vsyncadd [#allocation4], 4294965248 }
 0x77a   :  { %5142 = vsyncpa [#allocation3], 1 }
 0x77b   :  { %5143 = vsyncpa [#allocation6], 1 }
 0x77c   :  { %5144 = vsyncpa [#allocation4], 1 }

</bundles_post_ra>
